<compile_context>
chip_gen: v6e
topology: v6e:2x2x1
jax: 0.10.0
libtpu: 0.0.40
codegen_flags: <defaults>
</compile_context>

<pallas_src>
import math
from functools import partial

import jax
import jax.numpy as jnp
from jax.experimental import pallas as pl
from jax.experimental.pallas import tpu as pltpu

C_PAD = 128  # logits padded to a 128-lane-dense store; sliced outside the kernel


def _layer_norm(x, w, b, eps=1e-5):
    inv_d = 1.0 / x.shape[-1]
    mu = jnp.sum(x, axis=-1, keepdims=True) * inv_d
    xc = x - mu
    var = jnp.sum(xc * xc, axis=-1, keepdims=True) * inv_d
    return xc * jax.lax.rsqrt(var + eps) * w + b


def make_kernel(*, B, S, D, nhead, num_layers, img_hid, c_pad):
    hd = D // nhead
    inv_s = 1.0 / S
    bf16, f32 = jnp.bfloat16, jnp.float32

    def kernel(front_x_ref, front_w_ref, img_mean_ref, img_w_ref,
               out_ws_ref, out_wi_ref, head_b_ref,
               wqkv_ref, wo_ref, w1_ref, w2_ref, bqkv_ref, lvec_ref, b1_ref,
               o_ref, x_ref):
        l = pl.program_id(0)

        # ---- layer 0: fused roi_fc + sift_fc + channel concat (block-diag W) ----
        @pl.when(l == 0)
        def _init():
            x_ref[...] = (jnp.dot(front_x_ref[...], front_w_ref[...],
                                  preferred_element_type=f32)
                          + head_b_ref[0:1, :D])

        x = x_ref[...]                                              # [B*S, D] f32

        # ---- self-attention: one lane-dense fused QKV projection ----
        qkv = (jnp.dot(x.astype(bf16), wqkv_ref[...],
                       preferred_element_type=f32) + bqkv_ref[...])  # [B*S, 3D]
        qkv = qkv.reshape(B, S, 3 * D)                               # split leading dim
        ctx_heads = []
        for h in range(nhead):          # nhead is a tiny fixed constant; B stays batched
            q = qkv[:, :, h * hd:(h + 1) * hd]                       # [B, S, hd]
            k = qkv[:, :, D + h * hd:D + (h + 1) * hd]
            v = qkv[:, :, 2 * D + h * hd:2 * D + (h + 1) * hd]
            sc = jnp.einsum('bqd,bkd->bqk', q.astype(bf16), k.astype(bf16),
                            preferred_element_type=f32)              # scale folded into wq/bq
            sc = sc - jnp.max(sc, axis=-1, keepdims=True)
            pr = jnp.exp(sc)
            pr = pr * pl.reciprocal(jnp.sum(pr, axis=-1, keepdims=True), approx=True)
            ctx_heads.append(jnp.einsum('bqk,bkd->bqd', pr.astype(bf16),
                                        v.astype(bf16),
                                        preferred_element_type=f32))  # [B, S, hd]
        ctx = jnp.concatenate(ctx_heads, axis=-1).reshape(B * S, D)   # [B*S, D]
        attn = (jnp.dot(ctx.astype(bf16), wo_ref[...],
                        preferred_element_type=f32) + lvec_ref[0:1, :])   # + bo

        # ---- post-norm residual + ReLU FFN ----
        h1 = _layer_norm(x + attn, lvec_ref[2:3, :], lvec_ref[3:4, :])
        ff = jnp.maximum(jnp.dot(h1.astype(bf16), w1_ref[...],
                                 preferred_element_type=f32) + b1_ref[...], 0.0)
        ff2 = (jnp.dot(ff.astype(bf16), w2_ref[...],
                       preferred_element_type=f32) + lvec_ref[1:2, :])    # + b2
        x_new = _layer_norm(h1 + ff2, lvec_ref[4:5, :], lvec_ref[5:6, :])
        x_ref[...] = x_new                                            # carry residual stream

        # ---- fusion head on the final layer ----
        @pl.when(l == num_layers - 1)
        def _head():
            # per-sample sequence mean as one tiny MXU matmul vs a constant 0/1 pool
            rows = jax.lax.broadcasted_iota(jnp.int32, (B, B * S), 0)
            cols = jax.lax.broadcasted_iota(jnp.int32, (B, B * S), 1)
            sel = jnp.logical_and(cols >= rows * S, cols < rows * S + S)
            pool = jnp.where(sel, 1.0, 0.0).astype(bf16)              # [B, B*S]
            seq_feat = jnp.dot(pool, x_new.astype(bf16),
                               preferred_element_type=f32) * inv_s     # [B, D]
            img_feat = (jnp.dot(img_mean_ref[...], img_w_ref[...],
                                preferred_element_type=f32)
                        + head_b_ref[1:2, :img_hid])                   # [B, img_hid]
            o_ref[...] = (jnp.dot(seq_feat.astype(bf16), out_ws_ref[...],
                                  preferred_element_type=f32)
                          + jnp.dot(img_feat.astype(bf16), out_wi_ref[...],
                                    preferred_element_type=f32)
                          + head_b_ref[2:3, :c_pad])                   # [B, C_PAD]

    return kernel


def orientation_net_forward(img_x, roi_x, sift_x, params, *, nhead):
    """Weights use the [in, out] convention (y = x @ W + b).
    NOTE: PyTorch nn.Linear stores [out, in]; checkpoint import must transpose."""
    f32, bf16 = jnp.float32, jnp.bfloat16
    B, S, roi_in = roi_x.shape
    sift_in = sift_x.shape[-1]
    img_in = img_x.shape[-1]

    roi_hid = params["roi_w"].shape[1]
    sift_hid = params["sift_w"].shape[1]
    D = roi_hid + sift_hid
    hd = D // nhead
    img_hid = params["img_w"].shape[1]
    num_classes = params["out_w"].shape[1]
    L = len(params["layers"])
    dff = params["layers"][0]["w1"].shape[1]
    fin = roi_in + sift_in

    # Front projection: concat roi/sift inputs + one block-diagonal weight
    # (== roi_fc ++ sift_fc followed by channel concat), inputs cast to bf16.
    front_x = jnp.concatenate([roi_x, sift_x], axis=-1).reshape(B * S, fin).astype(bf16)
    front_w = jnp.zeros((fin, D), f32)
    front_w = front_w.at[:roi_in, :roi_hid].set(params["roi_w"])
    front_w = front_w.at[roi_in:, roi_hid:].set(params["sift_w"]).astype(bf16)
    front_b = jnp.concatenate([params["roi_b"], params["sift_b"]])      # [D]

    # Image branch: mean over S outside the kernel (linear/mean commute), bf16.
    img_mean = jnp.mean(img_x, axis=1).astype(bf16)                     # [B, 2048]

    # out_fc split into seq / image parts, padded to a 128-lane-dense output.
    out_w, out_b = params["out_w"], params["out_b"]
    out_ws = jnp.zeros((D, C_PAD), f32).at[:, :num_classes].set(out_w[:D]).astype(bf16)
    out_wi = jnp.zeros((img_hid, C_PAD), f32).at[:, :num_classes].set(out_w[D:]).astype(bf16)

    wb = max(D, img_hid, C_PAD)
    head_b = jnp.zeros((8, wb), f32)
    head_b = head_b.at[0, :D].set(front_b)              # row 0: front bias
    head_b = head_b.at[1, :img_hid].set(params["img_b"])  # row 1: image_fc bias
    head_b = head_b.at[2, :num_classes].set(out_b)        # row 2: out_fc bias

    # Per-layer weights stacked on a leading layer axis (layer grid pipelines them).
    scale = 1.0 / math.sqrt(hd)                          # folded into wq / bq
    wqkv_l, wo_l, w1_l, w2_l, bqkv_l, lvec_l, b1_l = ([] for _ in range(7))
    for p in params["layers"]:
        wqkv_l.append(jnp.concatenate([p["wq"] * scale, p["wk"], p["wv"]],
                                      axis=1).astype(bf16))            # [D, 3D]
        bqkv_l.append(jnp.concatenate([p["bq"] * scale, p["bk"], p["bv"]]
                                      ).reshape(1, 3 * D))
        wo_l.append(p["wo"].astype(bf16))
        w1_l.append(p["w1"].astype(bf16))
        w2_l.append(p["w2"].astype(bf16))
        b1_l.append(p["b1"].reshape(1, dff))
        lvec = jnp.zeros((8, D), f32)
        lvec = lvec.at[0].set(p["bo"]).at[1].set(p["b2"])
        lvec = lvec.at[2].set(p["ln1w"]).at[3].set(p["ln1b"])
        lvec = lvec.at[4].set(p["ln2w"]).at[5].set(p["ln2b"])
        lvec_l.append(lvec)
    wqkv_s, wo_s = jnp.stack(wqkv_l), jnp.stack(wo_l)
    w1_s, w2_s = jnp.stack(w1_l), jnp.stack(w2_l)
    bqkv_s, lvec_s, b1_s = jnp.stack(bqkv_l), jnp.stack(lvec_l), jnp.stack(b1_l)

    fixed = lambda shape: pl.BlockSpec(shape, lambda l: (0, 0))
    per_layer = lambda d1, d2: pl.BlockSpec((None, d1, d2), lambda l: (l, 0, 0))
    grid_spec = pltpu.PrefetchScalarGridSpec(
        num_scalar_prefetch=0,
        grid=(L,),
        in_specs=[
            fixed((B * S, fin)),        # front_x (fetched once: constant index)
            fixed((fin, D)),            # front_w
            fixed((B, img_in)),         # img_mean
            fixed((img_in, img_hid)),   # img_w
            fixed((D, C_PAD)),          # out_ws
            fixed((img_hid, C_PAD)),    # out_wi
            fixed((8, wb)),             # packed head biases
            per_layer(D, 3 * D),        # wqkv (stacked over layers)
            per_layer(D, D),            # wo
            per_layer(D, dff),          # w1
            per_layer(dff, D),          # w2
            per_layer(1, 3 * D),        # bqkv
            per_layer(8, D),            # packed per-layer vectors (bo,b2,ln*)
            per_layer(1, dff),          # b1
        ],
        out_specs=pl.BlockSpec((B, C_PAD), lambda l: (0, 0)),
        scratch_shapes=[pltpu.VMEM((B * S, D), f32)],   # residual stream carry
    )

    kernel = make_kernel(B=B, S=S, D=D, nhead=nhead, num_layers=L,
                         img_hid=img_hid, c_pad=C_PAD)
    logits_pad = pl.pallas_call(
        kernel,
        grid_spec=grid_spec,
        out_shape=jax.ShapeDtypeStruct((B, C_PAD), f32),
        compiler_params=pltpu.CompilerParams(
            dimension_semantics=("arbitrary",),          # layer axis carries state
            vmem_limit_bytes=32 * 1024 * 1024),
    )(front_x, front_w, img_mean, params["img_w"].astype(bf16),
      out_ws, out_wi, head_b,
      wqkv_s, wo_s, w1_s, w2_s, bqkv_s, lvec_s, b1_s)
    return logits_pad[:, :num_classes]


if __name__ == "__main__":
    B, S = 2, 8
    roi_in, sift_in = 32, 16
    roi_hid, sift_hid = 64, 64           # roi_hid + sift_hid == d_model
    img_hid = 32
    d_model, nhead, num_layers = 128, 4, 2
    dff = 2048                           # TransformerEncoderLayer default
    num_classes = 4

    key = jax.random.PRNGKey(0)
    keys = iter(jax.random.split(key, 128))

    def init(shape, scl=0.05):
        return scl * jax.random.normal(next(keys), shape, dtype=jnp.float32)

    # Inputs (already padded to the common max_seq_len = S)
    img_x = init((B, S, 2048), 1.0)
    roi_x = init((B, S, roi_in), 1.0)
    sift_x = init((B, S, sift_in), 1.0)

    layers = []
    for _ in range(num_layers):
        layers.append(dict(
            wq=init((d_model, d_model)), wk=init((d_model, d_model)),
            wv=init((d_model, d_model)),
            bq=init((d_model,)), bk=init((d_model,)), bv=init((d_model,)),
            wo=init((d_model, d_model)), bo=init((d_model,)),
            w1=init((d_model, dff)), b1=init((dff,)),
            w2=init((dff, d_model)), b2=init((d_model,)),
            ln1w=jnp.ones((d_model,), jnp.float32),
            ln1b=jnp.zeros((d_model,), jnp.float32),
            ln2w=jnp.ones((d_model,), jnp.float32),
            ln2b=jnp.zeros((d_model,), jnp.float32),
        ))

    params = dict(
        roi_w=init((roi_in, roi_hid)), roi_b=init((roi_hid,)),
        sift_w=init((sift_in, sift_hid)), sift_b=init((sift_hid,)),
        img_w=init((2048, img_hid)), img_b=init((img_hid,)),
        layers=layers,
        out_w=init((d_model + img_hid, num_classes)), out_b=init((num_classes,)),
    )

    fwd = jax.jit(partial(orientation_net_forward, nhead=nhead))
    logits = jax.block_until_ready(fwd(img_x, roi_x, sift_x, params))
    assert logits.shape == (B, num_classes), logits.shape
    assert bool(jnp.all(jnp.isfinite(logits)))
    print("KERNEL_OK")
</pallas_src>

<mosaic_0001>
module attributes {stable_mosaic.version = 11 : i64} {
  func.func @kernel(%arg0: i32, %arg1: memref<16x48xbf16, #tpu.memory_space<vmem>>, %arg2: memref<48x128xbf16, #tpu.memory_space<vmem>>, %arg3: memref<2x2048xbf16, #tpu.memory_space<vmem>>, %arg4: memref<2048x32xbf16, #tpu.memory_space<vmem>>, %arg5: memref<128x128xbf16, #tpu.memory_space<vmem>>, %arg6: memref<32x128xbf16, #tpu.memory_space<vmem>>, %arg7: memref<8x128xf32, #tpu.memory_space<vmem>>, %arg8: memref<1x128x384xbf16, #tpu.memory_space<vmem>>, %arg9: memref<1x128x128xbf16, #tpu.memory_space<vmem>>, %arg10: memref<1x128x2048xbf16, #tpu.memory_space<vmem>>, %arg11: memref<1x2048x128xbf16, #tpu.memory_space<vmem>>, %arg12: memref<1x1x384xf32, #tpu.memory_space<vmem>>, %arg13: memref<1x8x128xf32, #tpu.memory_space<vmem>>, %arg14: memref<1x1x2048xf32, #tpu.memory_space<vmem>>, %arg15: memref<2x128xf32, #tpu.memory_space<vmem>>, %arg16: memref<16x128xf32, #tpu.memory_space<vmem>>) attributes {dimension_semantics = [#tpu.dimension_semantics<arbitrary>], iteration_bounds = array<i64: 2>, scalar_prefetch = 0 : i64, scratch_operands = 1 : i64, tpu.core_type = #tpu.core_type<tc>, window_params = [{pipeline_mode = #tpu.pipeline_mode<synchronous>, transform_indices = @transform_0, window_bounds = array<i64: 16, 48>}, {pipeline_mode = #tpu.pipeline_mode<synchronous>, transform_indices = @transform_1, window_bounds = array<i64: 48, 128>}, {pipeline_mode = #tpu.pipeline_mode<synchronous>, transform_indices = @transform_2, window_bounds = array<i64: 2, 2048>}, {pipeline_mode = #tpu.pipeline_mode<synchronous>, transform_indices = @transform_3, window_bounds = array<i64: 2048, 32>}, {pipeline_mode = #tpu.pipeline_mode<synchronous>, transform_indices = @transform_4, window_bounds = array<i64: 128, 128>}, {pipeline_mode = #tpu.pipeline_mode<synchronous>, transform_indices = @transform_5, window_bounds = array<i64: 32, 128>}, {pipeline_mode = #tpu.pipeline_mode<synchronous>, transform_indices = @transform_6, window_bounds = array<i64: 8, 128>}, {transform_indices = @transform_7, window_bounds = array<i64: 1, 128, 384>}, {transform_indices = @transform_8, window_bounds = array<i64: 1, 128, 128>}, {transform_indices = @transform_9, window_bounds = array<i64: 1, 128, 2048>}, {transform_indices = @transform_10, window_bounds = array<i64: 1, 2048, 128>}, {transform_indices = @transform_11, window_bounds = array<i64: 1, 1, 384>}, {transform_indices = @transform_12, window_bounds = array<i64: 1, 8, 128>}, {transform_indices = @transform_13, window_bounds = array<i64: 1, 1, 2048>}, {pipeline_mode = #tpu.pipeline_mode<synchronous>, transform_indices = @transform_14, window_bounds = array<i64: 2, 128>}]} {
    %c0_i32 = arith.constant 0 : i32
    %0 = arith.cmpi eq, %arg0, %c0_i32 : i32
    %1 = arith.extui %0 : i1 to i32
    %c0_i32_0 = arith.constant 0 : i32
    %2 = arith.cmpi ne, %1, %c0_i32_0 : i32
    scf.if %2 {
      %c0_66 = arith.constant 0 : index
      %c0_67 = arith.constant 0 : index
      %171 = vector.load %arg1[%c0_66, %c0_67] : memref<16x48xbf16, #tpu.memory_space<vmem>>, vector<16x48xbf16>
      %c0_68 = arith.constant 0 : index
      %c0_69 = arith.constant 0 : index
      %172 = vector.load %arg2[%c0_68, %c0_69] : memref<48x128xbf16, #tpu.memory_space<vmem>>, vector<48x128xbf16>
      %cst_70 = arith.constant dense<0.000000e+00> : vector<16x128xf32>
      %173 = tpu.matmul %171, %172, %cst_70 {dimension_numbers = #tpu.dot_dimension_numbers<[1], [0], [0], [1], [0, 0, 1, 1], [], []>} : vector<16x48xbf16>, vector<48x128xbf16>, vector<16x128xf32> -> vector<16x128xf32>
      %c0_71 = arith.constant 0 : index
      %c0_72 = arith.constant 0 : index
      %174 = vector.load %arg7[%c0_71, %c0_72] : memref<8x128xf32, #tpu.memory_space<vmem>>, vector<1x128xf32>
      %175 = vector.broadcast %174 : vector<1x128xf32> to vector<16x128xf32>
      %176 = arith.addf %173, %175 : vector<16x128xf32>
      %c0_73 = arith.constant 0 : index
      %c0_74 = arith.constant 0 : index
      %177 = vector.load %arg16[%c0_73, %c0_74] : memref<16x128xf32, #tpu.memory_space<vmem>>, vector<16x128xf32>
      tpu.vector_store %arg16[%c0_73, %c0_74], %176 {strides = array<i32>} : memref<16x128xf32, #tpu.memory_space<vmem>>, vector<16x128xf32>,
    } else {
    }
    %c0 = arith.constant 0 : index
    %c0_1 = arith.constant 0 : index
    %3 = vector.load %arg16[%c0, %c0_1] : memref<16x128xf32, #tpu.memory_space<vmem>>, vector<16x128xf32>
    %4 = arith.truncf %3 : vector<16x128xf32> to vector<16x128xbf16>
    %c0_2 = arith.constant 0 : index
    %c0_3 = arith.constant 0 : index
    %c0_4 = arith.constant 0 : index
    %5 = vector.load %arg8[%c0_2, %c0_3, %c0_4] : memref<1x128x384xbf16, #tpu.memory_space<vmem>>, vector<1x128x384xbf16>
    %6 = vector.shape_cast %5 : vector<1x128x384xbf16> to vector<128x384xbf16>
    %cst = arith.constant dense<0.000000e+00> : vector<16x384xf32>
    %7 = tpu.matmul %4, %6, %cst {dimension_numbers = #tpu.dot_dimension_numbers<[1], [0], [0], [1], [0, 0, 1, 1], [], []>} : vector<16x128xbf16>, vector<128x384xbf16>, vector<16x384xf32> -> vector<16x384xf32>
    %c0_5 = arith.constant 0 : index
    %c0_6 = arith.constant 0 : index
    %c0_7 = arith.constant 0 : index
    %8 = vector.load %arg12[%c0_5, %c0_6, %c0_7] : memref<1x1x384xf32, #tpu.memory_space<vmem>>, vector<1x1x384xf32>
    %9 = vector.shape_cast %8 : vector<1x1x384xf32> to vector<1x384xf32>
    %10 = vector.broadcast %9 : vector<1x384xf32> to vector<16x384xf32>
    %11 = arith.addf %7, %10 : vector<16x384xf32>
    %12 = vector.shape_cast %11 : vector<16x384xf32> to vector<2x8x384xf32>
    %13 = vector.extract_strided_slice %12 {offsets = [0, 0, 0], sizes = [2, 8, 32], strides = [1, 1, 1]} : vector<2x8x384xf32> to vector<2x8x32xf32>
    %14 = vector.extract_strided_slice %12 {offsets = [0, 0, 128], sizes = [2, 8, 32], strides = [1, 1, 1]} : vector<2x8x384xf32> to vector<2x8x32xf32>
    %15 = vector.extract_strided_slice %12 {offsets = [0, 0, 256], sizes = [2, 8, 32], strides = [1, 1, 1]} : vector<2x8x384xf32> to vector<2x8x32xf32>
    %16 = arith.truncf %13 : vector<2x8x32xf32> to vector<2x8x32xbf16>
    %17 = arith.truncf %14 : vector<2x8x32xf32> to vector<2x8x32xbf16>
    "tpu.trace_start"() <{level = 10 : i32, message = "bqd,bkd->bqk"}> : () -> ()
    %cst_8 = arith.constant dense<0.000000e+00> : vector<2x8x8xf32>
    %18 = tpu.matmul %16, %17, %cst_8 {dimension_numbers = #tpu.dot_dimension_numbers<[2], [2], [1], [1], [0, 0, 0, 1, 1, 1], [0], [0]>} : vector<2x8x32xbf16>, vector<2x8x32xbf16>, vector<2x8x8xf32> -> vector<2x8x8xf32>
    "tpu.trace_stop"() : () -> ()
    %cst_9 = arith.constant dense<0xFF800000> : vector<2x8xf32>
    %19 = vector.multi_reduction <maximumf>, %18, %cst_9 [2] : vector<2x8x8xf32> to vector<2x8xf32>
    %20 = vector.shape_cast %19 : vector<2x8xf32> to vector<2x8x1xf32>
    %21 = vector.broadcast %20 : vector<2x8x1xf32> to vector<2x8x8xf32>
    %22 = arith.subf %18, %21 : vector<2x8x8xf32>
    %23 = math.exp %22 : vector<2x8x8xf32>
    %cst_10 = arith.constant dense<0.000000e+00> : vector<2x8xf32>
    %24 = vector.multi_reduction <add>, %23, %cst_10 [2] : vector<2x8x8xf32> to vector<2x8xf32>
    %25 = vector.shape_cast %24 : vector<2x8xf32> to vector<2x8x1xf32>
    %26 = tpu.reciprocal %25 {approx = true} : vector<2x8x1xf32> -> vector<2x8x1xf32>
    %27 = vector.broadcast %26 : vector<2x8x1xf32> to vector<2x8x8xf32>
    %28 = arith.mulf %23, %27 : vector<2x8x8xf32>
    %29 = arith.truncf %28 : vector<2x8x8xf32> to vector<2x8x8xbf16>
    %30 = arith.truncf %15 : vector<2x8x32xf32> to vector<2x8x32xbf16>
    "tpu.trace_start"() <{level = 10 : i32, message = "bqk,bkd->bqd"}> : () -> ()
    %cst_11 = arith.constant dense<0.000000e+00> : vector<2x8x32xf32>
    %31 = tpu.matmul %29, %30, %cst_11 {dimension_numbers = #tpu.dot_dimension_numbers<[2], [1], [1], [2], [0, 0, 0, 1, 1, 2], [0], [0]>} : vector<2x8x8xbf16>, vector<2x8x32xbf16>, vector<2x8x32xf32> -> vector<2x8x32xf32>
    "tpu.trace_stop"() : () -> ()
    %32 = vector.extract_strided_slice %12 {offsets = [0, 0, 32], sizes = [2, 8, 32], strides = [1, 1, 1]} : vector<2x8x384xf32> to vector<2x8x32xf32>
    %33 = vector.extract_strided_slice %12 {offsets = [0, 0, 160], sizes = [2, 8, 32], strides = [1, 1, 1]} : vector<2x8x384xf32> to vector<2x8x32xf32>
    %34 = vector.extract_strided_slice %12 {offsets = [0, 0, 288], sizes = [2, 8, 32], strides = [1, 1, 1]} : vector<2x8x384xf32> to vector<2x8x32xf32>
    %35 = arith.truncf %32 : vector<2x8x32xf32> to vector<2x8x32xbf16>
    %36 = arith.truncf %33 : vector<2x8x32xf32> to vector<2x8x32xbf16>
    "tpu.trace_start"() <{level = 10 : i32, message = "bqd,bkd->bqk"}> : () -> ()
    %cst_12 = arith.constant dense<0.000000e+00> : vector<2x8x8xf32>
    %37 = tpu.matmul %35, %36, %cst_12 {dimension_numbers = #tpu.dot_dimension_numbers<[2], [2], [1], [1], [0, 0, 0, 1, 1, 1], [0], [0]>} : vector<2x8x32xbf16>, vector<2x8x32xbf16>, vector<2x8x8xf32> -> vector<2x8x8xf32>
    "tpu.trace_stop"() : () -> ()
    %cst_13 = arith.constant dense<0xFF800000> : vector<2x8xf32>
    %38 = vector.multi_reduction <maximumf>, %37, %cst_13 [2] : vector<2x8x8xf32> to vector<2x8xf32>
    %39 = vector.shape_cast %38 : vector<2x8xf32> to vector<2x8x1xf32>
    %40 = vector.broadcast %39 : vector<2x8x1xf32> to vector<2x8x8xf32>
    %41 = arith.subf %37, %40 : vector<2x8x8xf32>
    %42 = math.exp %41 : vector<2x8x8xf32>
    %cst_14 = arith.constant dense<0.000000e+00> : vector<2x8xf32>
    %43 = vector.multi_reduction <add>, %42, %cst_14 [2] : vector<2x8x8xf32> to vector<2x8xf32>
    %44 = vector.shape_cast %43 : vector<2x8xf32> to vector<2x8x1xf32>
    %45 = tpu.reciprocal %44 {approx = true} : vector<2x8x1xf32> -> vector<2x8x1xf32>
    %46 = vector.broadcast %45 : vector<2x8x1xf32> to vector<2x8x8xf32>
    %47 = arith.mulf %42, %46 : vector<2x8x8xf32>
    %48 = arith.truncf %47 : vector<2x8x8xf32> to vector<2x8x8xbf16>
    %49 = arith.truncf %34 : vector<2x8x32xf32> to vector<2x8x32xbf16>
    "tpu.trace_start"() <{level = 10 : i32, message = "bqk,bkd->bqd"}> : () -> ()
    %cst_15 = arith.constant dense<0.000000e+00> : vector<2x8x32xf32>
    %50 = tpu.matmul %48, %49, %cst_15 {dimension_numbers = #tpu.dot_dimension_numbers<[2], [1], [1], [2], [0, 0, 0, 1, 1, 2], [0], [0]>} : vector<2x8x8xbf16>, vector<2x8x32xbf16>, vector<2x8x32xf32> -> vector<2x8x32xf32>
    "tpu.trace_stop"() : () -> ()
    %51 = vector.extract_strided_slice %12 {offsets = [0, 0, 64], sizes = [2, 8, 32], strides = [1, 1, 1]} : vector<2x8x384xf32> to vector<2x8x32xf32>
    %52 = vector.extract_strided_slice %12 {offsets = [0, 0, 192], sizes = [2, 8, 32], strides = [1, 1, 1]} : vector<2x8x384xf32> to vector<2x8x32xf32>
    %53 = vector.extract_strided_slice %12 {offsets = [0, 0, 320], sizes = [2, 8, 32], strides = [1, 1, 1]} : vector<2x8x384xf32> to vector<2x8x32xf32>
    %54 = arith.truncf %51 : vector<2x8x32xf32> to vector<2x8x32xbf16>
    %55 = arith.truncf %52 : vector<2x8x32xf32> to vector<2x8x32xbf16>
    "tpu.trace_start"() <{level = 10 : i32, message = "bqd,bkd->bqk"}> : () -> ()
    %cst_16 = arith.constant dense<0.000000e+00> : vector<2x8x8xf32>
    %56 = tpu.matmul %54, %55, %cst_16 {dimension_numbers = #tpu.dot_dimension_numbers<[2], [2], [1], [1], [0, 0, 0, 1, 1, 1], [0], [0]>} : vector<2x8x32xbf16>, vector<2x8x32xbf16>, vector<2x8x8xf32> -> vector<2x8x8xf32>
    "tpu.trace_stop"() : () -> ()
    %cst_17 = arith.constant dense<0xFF800000> : vector<2x8xf32>
    %57 = vector.multi_reduction <maximumf>, %56, %cst_17 [2] : vector<2x8x8xf32> to vector<2x8xf32>
    %58 = vector.shape_cast %57 : vector<2x8xf32> to vector<2x8x1xf32>
    %59 = vector.broadcast %58 : vector<2x8x1xf32> to vector<2x8x8xf32>
    %60 = arith.subf %56, %59 : vector<2x8x8xf32>
    %61 = math.exp %60 : vector<2x8x8xf32>
    %cst_18 = arith.constant dense<0.000000e+00> : vector<2x8xf32>
    %62 = vector.multi_reduction <add>, %61, %cst_18 [2] : vector<2x8x8xf32> to vector<2x8xf32>
    %63 = vector.shape_cast %62 : vector<2x8xf32> to vector<2x8x1xf32>
    %64 = tpu.reciprocal %63 {approx = true} : vector<2x8x1xf32> -> vector<2x8x1xf32>
    %65 = vector.broadcast %64 : vector<2x8x1xf32> to vector<2x8x8xf32>
    %66 = arith.mulf %61, %65 : vector<2x8x8xf32>
    %67 = arith.truncf %66 : vector<2x8x8xf32> to vector<2x8x8xbf16>
    %68 = arith.truncf %53 : vector<2x8x32xf32> to vector<2x8x32xbf16>
    "tpu.trace_start"() <{level = 10 : i32, message = "bqk,bkd->bqd"}> : () -> ()
    %cst_19 = arith.constant dense<0.000000e+00> : vector<2x8x32xf32>
    %69 = tpu.matmul %67, %68, %cst_19 {dimension_numbers = #tpu.dot_dimension_numbers<[2], [1], [1], [2], [0, 0, 0, 1, 1, 2], [0], [0]>} : vector<2x8x8xbf16>, vector<2x8x32xbf16>, vector<2x8x32xf32> -> vector<2x8x32xf32>
    "tpu.trace_stop"() : () -> ()
    %70 = vector.extract_strided_slice %12 {offsets = [0, 0, 96], sizes = [2, 8, 32], strides = [1, 1, 1]} : vector<2x8x384xf32> to vector<2x8x32xf32>
    %71 = vector.extract_strided_slice %12 {offsets = [0, 0, 224], sizes = [2, 8, 32], strides = [1, 1, 1]} : vector<2x8x384xf32> to vector<2x8x32xf32>
    %72 = vector.extract_strided_slice %12 {offsets = [0, 0, 352], sizes = [2, 8, 32], strides = [1, 1, 1]} : vector<2x8x384xf32> to vector<2x8x32xf32>
    %73 = arith.truncf %70 : vector<2x8x32xf32> to vector<2x8x32xbf16>
    %74 = arith.truncf %71 : vector<2x8x32xf32> to vector<2x8x32xbf16>
    "tpu.trace_start"() <{level = 10 : i32, message = "bqd,bkd->bqk"}> : () -> ()
    %cst_20 = arith.constant dense<0.000000e+00> : vector<2x8x8xf32>
    %75 = tpu.matmul %73, %74, %cst_20 {dimension_numbers = #tpu.dot_dimension_numbers<[2], [2], [1], [1], [0, 0, 0, 1, 1, 1], [0], [0]>} : vector<2x8x32xbf16>, vector<2x8x32xbf16>, vector<2x8x8xf32> -> vector<2x8x8xf32>
    "tpu.trace_stop"() : () -> ()
    %cst_21 = arith.constant dense<0xFF800000> : vector<2x8xf32>
    %76 = vector.multi_reduction <maximumf>, %75, %cst_21 [2] : vector<2x8x8xf32> to vector<2x8xf32>
    %77 = vector.shape_cast %76 : vector<2x8xf32> to vector<2x8x1xf32>
    %78 = vector.broadcast %77 : vector<2x8x1xf32> to vector<2x8x8xf32>
    %79 = arith.subf %75, %78 : vector<2x8x8xf32>
    %80 = math.exp %79 : vector<2x8x8xf32>
    %cst_22 = arith.constant dense<0.000000e+00> : vector<2x8xf32>
    %81 = vector.multi_reduction <add>, %80, %cst_22 [2] : vector<2x8x8xf32> to vector<2x8xf32>
    %82 = vector.shape_cast %81 : vector<2x8xf32> to vector<2x8x1xf32>
    %83 = tpu.reciprocal %82 {approx = true} : vector<2x8x1xf32> -> vector<2x8x1xf32>
    %84 = vector.broadcast %83 : vector<2x8x1xf32> to vector<2x8x8xf32>
    %85 = arith.mulf %80, %84 : vector<2x8x8xf32>
    %86 = arith.truncf %85 : vector<2x8x8xf32> to vector<2x8x8xbf16>
    %87 = arith.truncf %72 : vector<2x8x32xf32> to vector<2x8x32xbf16>
    "tpu.trace_start"() <{level = 10 : i32, message = "bqk,bkd->bqd"}> : () -> ()
    %cst_23 = arith.constant dense<0.000000e+00> : vector<2x8x32xf32>
    %88 = tpu.matmul %86, %87, %cst_23 {dimension_numbers = #tpu.dot_dimension_numbers<[2], [1], [1], [2], [0, 0, 0, 1, 1, 2], [0], [0]>} : vector<2x8x8xbf16>, vector<2x8x32xbf16>, vector<2x8x32xf32> -> vector<2x8x32xf32>
    "tpu.trace_stop"() : () -> ()
    %89 = tpu.concatenate %31, %50, %69, %88 in 2 : vector<2x8x32xf32>, vector<2x8x32xf32>, vector<2x8x32xf32>, vector<2x8x32xf32> -> vector<2x8x128xf32>
    %90 = vector.shape_cast %89 : vector<2x8x128xf32> to vector<16x128xf32>
    %91 = arith.truncf %90 : vector<16x128xf32> to vector<16x128xbf16>
    %c0_24 = arith.constant 0 : index
    %c0_25 = arith.constant 0 : index
    %c0_26 = arith.constant 0 : index
    %92 = vector.load %arg9[%c0_24, %c0_25, %c0_26] : memref<1x128x128xbf16, #tpu.memory_space<vmem>>, vector<1x128x128xbf16>
    %93 = vector.shape_cast %92 : vector<1x128x128xbf16> to vector<128x128xbf16>
    %cst_27 = arith.constant dense<0.000000e+00> : vector<16x128xf32>
    %94 = tpu.matmul %91, %93, %cst_27 {dimension_numbers = #tpu.dot_dimension_numbers<[1], [0], [0], [1], [0, 0, 1, 1], [], []>} : vector<16x128xbf16>, vector<128x128xbf16>, vector<16x128xf32> -> vector<16x128xf32>
    %c0_28 = arith.constant 0 : index
    %c0_29 = arith.constant 0 : index
    %c0_30 = arith.constant 0 : index
    %95 = vector.load %arg13[%c0_28, %c0_29, %c0_30] : memref<1x8x128xf32, #tpu.memory_space<vmem>>, vector<1x1x128xf32>
    %96 = vector.shape_cast %95 : vector<1x1x128xf32> to vector<1x128xf32>
    %97 = vector.broadcast %96 : vector<1x128xf32> to vector<16x128xf32>
    %98 = arith.addf %94, %97 : vector<16x128xf32>
    %99 = arith.addf %3, %98 : vector<16x128xf32>
    %c0_31 = arith.constant 0 : index
    %c2 = arith.constant 2 : index
    %c0_32 = arith.constant 0 : index
    %100 = vector.load %arg13[%c0_31, %c2, %c0_32] : memref<1x8x128xf32, #tpu.memory_space<vmem>>, vector<1x1x128xf32>
    %101 = vector.shape_cast %100 : vector<1x1x128xf32> to vector<1x128xf32>
    %c0_33 = arith.constant 0 : index
    %c3 = arith.constant 3 : index
    %c0_34 = arith.constant 0 : index
    %102 = vector.load %arg13[%c0_33, %c3, %c0_34] : memref<1x8x128xf32, #tpu.memory_space<vmem>>, vector<1x1x128xf32>
    %103 = vector.shape_cast %102 : vector<1x1x128xf32> to vector<1x128xf32>
    %cst_35 = arith.constant dense<0.000000e+00> : vector<16xf32>
    %104 = vector.multi_reduction <add>, %99, %cst_35 [1] : vector<16x128xf32> to vector<16xf32>
    %105 = vector.shape_cast %104 : vector<16xf32> to vector<16x1xf32>
    %cst_36 = arith.constant 7.812500e-03 : f32
    %106 = vector.broadcast %cst_36 : f32 to vector<16x1xf32>
    %107 = arith.mulf %105, %106 : vector<16x1xf32>
    %108 = vector.broadcast %107 : vector<16x1xf32> to vector<16x128xf32>
    %109 = arith.subf %99, %108 : vector<16x128xf32>
    %110 = arith.mulf %109, %109 : vector<16x128xf32>
    %cst_37 = arith.constant dense<0.000000e+00> : vector<16xf32>
    %111 = vector.multi_reduction <add>, %110, %cst_37 [1] : vector<16x128xf32> to vector<16xf32>
    %112 = vector.shape_cast %111 : vector<16xf32> to vector<16x1xf32>
    %cst_38 = arith.constant 7.812500e-03 : f32
    %113 = vector.broadcast %cst_38 : f32 to vector<16x1xf32>
    %114 = arith.mulf %112, %113 : vector<16x1xf32>
    %cst_39 = arith.constant 9.99999974E-6 : f32
    %115 = vector.broadcast %cst_39 : f32 to vector<16x1xf32>
    %116 = arith.addf %114, %115 : vector<16x1xf32>
    %117 = math.rsqrt %116 : vector<16x1xf32>
    %118 = vector.broadcast %117 : vector<16x1xf32> to vector<16x128xf32>
    %119 = arith.mulf %109, %118 : vector<16x128xf32>
    %120 = vector.broadcast %101 : vector<1x128xf32> to vector<16x128xf32>
    %121 = arith.mulf %119, %120 : vector<16x128xf32>
    %122 = vector.broadcast %103 : vector<1x128xf32> to vector<16x128xf32>
    %123 = arith.addf %121, %122 : vector<16x128xf32>
    %124 = arith.truncf %123 : vector<16x128xf32> to vector<16x128xbf16>
    %c0_40 = arith.constant 0 : index
    %c0_41 = arith.constant 0 : index
    %c0_42 = arith.constant 0 : index
    %125 = vector.load %arg10[%c0_40, %c0_41, %c0_42] : memref<1x128x2048xbf16, #tpu.memory_space<vmem>>, vector<1x128x2048xbf16>
    %126 = vector.shape_cast %125 : vector<1x128x2048xbf16> to vector<128x2048xbf16>
    %cst_43 = arith.constant dense<0.000000e+00> : vector<16x2048xf32>
    %127 = tpu.matmul %124, %126, %cst_43 {dimension_numbers = #tpu.dot_dimension_numbers<[1], [0], [0], [1], [0, 0, 1, 1], [], []>} : vector<16x128xbf16>, vector<128x2048xbf16>, vector<16x2048xf32> -> vector<16x2048xf32>
    %c0_44 = arith.constant 0 : index
    %c0_45 = arith.constant 0 : index
    %c0_46 = arith.constant 0 : index
    %128 = vector.load %arg14[%c0_44, %c0_45, %c0_46] : memref<1x1x2048xf32, #tpu.memory_space<vmem>>, vector<1x1x2048xf32>
    %129 = vector.shape_cast %128 : vector<1x1x2048xf32> to vector<1x2048xf32>
    %130 = vector.broadcast %129 : vector<1x2048xf32> to vector<16x2048xf32>
    %131 = arith.addf %127, %130 : vector<16x2048xf32>
    %cst_47 = arith.constant 0.000000e+00 : f32
    %132 = vector.broadcast %cst_47 : f32 to vector<16x2048xf32>
    %133 = arith.maximumf %131, %132 : vector<16x2048xf32>
    %134 = arith.truncf %133 : vector<16x2048xf32> to vector<16x2048xbf16>
    %c0_48 = arith.constant 0 : index
    %c0_49 = arith.constant 0 : index
    %c0_50 = arith.constant 0 : index
    %135 = vector.load %arg11[%c0_48, %c0_49, %c0_50] : memref<1x2048x128xbf16, #tpu.memory_space<vmem>>, vector<1x2048x128xbf16>
    %136 = vector.shape_cast %135 : vector<1x2048x128xbf16> to vector<2048x128xbf16>
    %cst_51 = arith.constant dense<0.000000e+00> : vector<16x128xf32>
    %137 = tpu.matmul %134, %136, %cst_51 {dimension_numbers = #tpu.dot_dimension_numbers<[1], [0], [0], [1], [0, 0, 1, 1], [], []>} : vector<16x2048xbf16>, vector<2048x128xbf16>, vector<16x128xf32> -> vector<16x128xf32>
    %c0_52 = arith.constant 0 : index
    %c1 = arith.constant 1 : index
    %c0_53 = arith.constant 0 : index
    %138 = vector.load %arg13[%c0_52, %c1, %c0_53] : memref<1x8x128xf32, #tpu.memory_space<vmem>>, vector<1x1x128xf32>
    %139 = vector.shape_cast %138 : vector<1x1x128xf32> to vector<1x128xf32>
    %140 = vector.broadcast %139 : vector<1x128xf32> to vector<16x128xf32>
    %141 = arith.addf %137, %140 : vector<16x128xf32>
    %142 = arith.addf %123, %141 : vector<16x128xf32>
    %c0_54 = arith.constant 0 : index
    %c4 = arith.constant 4 : index
    %c0_55 = arith.constant 0 : index
    %143 = vector.load %arg13[%c0_54, %c4, %c0_55] : memref<1x8x128xf32, #tpu.memory_space<vmem>>, vector<1x1x128xf32>
    %144 = vector.shape_cast %143 : vector<1x1x128xf32> to vector<1x128xf32>
    %c0_56 = arith.constant 0 : index
    %c5 = arith.constant 5 : index
    %c0_57 = arith.constant 0 : index
    %145 = vector.load %arg13[%c0_56, %c5, %c0_57] : memref<1x8x128xf32, #tpu.memory_space<vmem>>, vector<1x1x128xf32>
    %146 = vector.shape_cast %145 : vector<1x1x128xf32> to vector<1x128xf32>
    %cst_58 = arith.constant dense<0.000000e+00> : vector<16xf32>
    %147 = vector.multi_reduction <add>, %142, %cst_58 [1] : vector<16x128xf32> to vector<16xf32>
    %148 = vector.shape_cast %147 : vector<16xf32> to vector<16x1xf32>
    %cst_59 = arith.constant 7.812500e-03 : f32
    %149 = vector.broadcast %cst_59 : f32 to vector<16x1xf32>
    %150 = arith.mulf %148, %149 : vector<16x1xf32>
    %151 = vector.broadcast %150 : vector<16x1xf32> to vector<16x128xf32>
    %152 = arith.subf %142, %151 : vector<16x128xf32>
    %153 = arith.mulf %152, %152 : vector<16x128xf32>
    %cst_60 = arith.constant dense<0.000000e+00> : vector<16xf32>
    %154 = vector.multi_reduction <add>, %153, %cst_60 [1] : vector<16x128xf32> to vector<16xf32>
    %155 = vector.shape_cast %154 : vector<16xf32> to vector<16x1xf32>
    %cst_61 = arith.constant 7.812500e-03 : f32
    %156 = vector.broadcast %cst_61 : f32 to vector<16x1xf32>
    %157 = arith.mulf %155, %156 : vector<16x1xf32>
    %cst_62 = arith.constant 9.99999974E-6 : f32
    %158 = vector.broadcast %cst_62 : f32 to vector<16x1xf32>
    %159 = arith.addf %157, %158 : vector<16x1xf32>
    %160 = math.rsqrt %159 : vector<16x1xf32>
    %161 = vector.broadcast %160 : vector<16x1xf32> to vector<16x128xf32>
    %162 = arith.mulf %152, %161 : vector<16x128xf32>
    %163 = vector.broadcast %144 : vector<1x128xf32> to vector<16x128xf32>
    %164 = arith.mulf %162, %163 : vector<16x128xf32>
    %165 = vector.broadcast %146 : vector<1x128xf32> to vector<16x128xf32>
    %166 = arith.addf %164, %165 : vector<16x128xf32>
    %c0_63 = arith.constant 0 : index
    %c0_64 = arith.constant 0 : index
    %167 = vector.load %arg16[%c0_63, %c0_64] : memref<16x128xf32, #tpu.memory_space<vmem>>, vector<16x128xf32>
    tpu.vector_store %arg16[%c0_63, %c0_64], %166 {strides = array<i32>} : memref<16x128xf32, #tpu.memory_space<vmem>>, vector<16x128xf32>,
    %c1_i32 = arith.constant 1 : i32
    %168 = arith.cmpi eq, %arg0, %c1_i32 : i32
    %169 = arith.extui %168 : i1 to i32
    %c0_i32_65 = arith.constant 0 : i32
    %170 = arith.cmpi ne, %169, %c0_i32_65 : i32
    scf.if %170 {
      %171 = tpu.iota {dimensions = array<i32: 0>} : vector<2x16xi32>
      %172 = tpu.iota {dimensions = array<i32: 1>} : vector<2x16xi32>
      %c8_i32 = arith.constant 8 : i32
      %173 = vector.broadcast %c8_i32 : i32 to vector<2x16xi32>
      %174 = arith.muli %171, %173 : vector<2x16xi32>
      %175 = arith.cmpi sge, %172, %174 : vector<2x16xi32>
      %c8_i32_66 = arith.constant 8 : i32
      %176 = vector.broadcast %c8_i32_66 : i32 to vector<2x16xi32>
      %177 = arith.muli %171, %176 : vector<2x16xi32>
      %c8_i32_67 = arith.constant 8 : i32
      %178 = vector.broadcast %c8_i32_67 : i32 to vector<2x16xi32>
      %179 = arith.addi %177, %178 : vector<2x16xi32>
      %180 = arith.cmpi slt, %172, %179 : vector<2x16xi32>
      %181 = arith.andi %175, %180 : vector<2x16xi1>
      %cst_68 = arith.constant 1.000000e+00 : f32
      %cst_69 = arith.constant 0.000000e+00 : f32
      %182 = vector.broadcast %cst_68 : f32 to vector<2x16xf32>
      %183 = vector.broadcast %cst_69 : f32 to vector<2x16xf32>
      %184 = arith.select %181, %182, %183 : vector<2x16xi1>, vector<2x16xf32>
      %185 = arith.truncf %184 : vector<2x16xf32> to vector<2x16xbf16>
      %186 = arith.truncf %166 : vector<16x128xf32> to vector<16x128xbf16>
      %cst_70 = arith.constant dense<0.000000e+00> : vector<2x128xf32>
      %187 = tpu.matmul %185, %186, %cst_70 {dimension_numbers = #tpu.dot_dimension_numbers<[1], [0], [0], [1], [0, 0, 1, 1], [], []>} : vector<2x16xbf16>, vector<16x128xbf16>, vector<2x128xf32> -> vector<2x128xf32>
      %cst_71 = arith.constant 1.250000e-01 : f32
      %188 = vector.broadcast %cst_71 : f32 to vector<2x128xf32>
      %189 = arith.mulf %187, %188 : vector<2x128xf32>
      %c0_72 = arith.constant 0 : index
      %c0_73 = arith.constant 0 : index
      %190 = vector.load %arg3[%c0_72, %c0_73] : memref<2x2048xbf16, #tpu.memory_space<vmem>>, vector<2x2048xbf16>
      %c0_74 = arith.constant 0 : index
      %c0_75 = arith.constant 0 : index
      %191 = vector.load %arg4[%c0_74, %c0_75] : memref<2048x32xbf16, #tpu.memory_space<vmem>>, vector<2048x32xbf16>
      %cst_76 = arith.constant dense<0.000000e+00> : vector<2x32xf32>
      %192 = tpu.matmul %190, %191, %cst_76 {dimension_numbers = #tpu.dot_dimension_numbers<[1], [0], [0], [1], [0, 0, 1, 1], [], []>} : vector<2x2048xbf16>, vector<2048x32xbf16>, vector<2x32xf32> -> vector<2x32xf32>
      %c1_77 = arith.constant 1 : index
      %c0_78 = arith.constant 0 : index
      %193 = vector.load %arg7[%c1_77, %c0_78] : memref<8x128xf32, #tpu.memory_space<vmem>>, vector<1x32xf32>
      %194 = vector.broadcast %193 : vector<1x32xf32> to vector<2x32xf32>
      %195 = arith.addf %192, %194 : vector<2x32xf32>
      %196 = arith.truncf %189 : vector<2x128xf32> to vector<2x128xbf16>
      %c0_79 = arith.constant 0 : index
      %c0_80 = arith.constant 0 : index
      %197 = vector.load %arg5[%c0_79, %c0_80] : memref<128x128xbf16, #tpu.memory_space<vmem>>, vector<128x128xbf16>
      %cst_81 = arith.constant dense<0.000000e+00> : vector<2x128xf32>
      %198 = tpu.matmul %196, %197, %cst_81 {dimension_numbers = #tpu.dot_dimension_numbers<[1], [0], [0], [1], [0, 0, 1, 1], [], []>} : vector<2x128xbf16>, vector<128x128xbf16>, vector<2x128xf32> -> vector<2x128xf32>
      %199 = arith.truncf %195 : vector<2x32xf32> to vector<2x32xbf16>
      %c0_82 = arith.constant 0 : index
      %c0_83 = arith.constant 0 : index
      %200 = vector.load %arg6[%c0_82, %c0_83] : memref<32x128xbf16, #tpu.memory_space<vmem>>, vector<32x128xbf16>
      %cst_84 = arith.constant dense<0.000000e+00> : vector<2x128xf32>
      %201 = tpu.matmul %199, %200, %cst_84 {dimension_numbers = #tpu.dot_dimension_numbers<[1], [0], [0], [1], [0, 0, 1, 1], [], []>} : vector<2x32xbf16>, vector<32x128xbf16>, vector<2x128xf32> -> vector<2x128xf32>
      %202 = arith.addf %198, %201 : vector<2x128xf32>
      %c2_85 = arith.constant 2 : index
      %c0_86 = arith.constant 0 : index
      %203 = vector.load %arg7[%c2_85, %c0_86] : memref<8x128xf32, #tpu.memory_space<vmem>>, vector<1x128xf32>
      %204 = vector.broadcast %203 : vector<1x128xf32> to vector<2x128xf32>
      %205 = arith.addf %202, %204 : vector<2x128xf32>
      %c0_87 = arith.constant 0 : index
      %c0_88 = arith.constant 0 : index
      %206 = vector.load %arg15[%c0_87, %c0_88] : memref<2x128xf32, #tpu.memory_space<vmem>>, vector<2x128xf32>
      tpu.vector_store %arg15[%c0_87, %c0_88], %205 {strides = array<i32>} : memref<2x128xf32, #tpu.memory_space<vmem>>, vector<2x128xf32>,
    } else {
    }
    return
  }
  func.func @transform_0(%arg0: i32) -> (i32, i32) {
    %c0_i32 = arith.constant 0 : i32
    %c0_i32_0 = arith.constant 0 : i32
    %c0_i32_1 = arith.constant 0 : i32
    return %c0_i32, %c0_i32_0 : i32, i32
  }
  func.func @transform_1(%arg0: i32) -> (i32, i32) {
    %c0_i32 = arith.constant 0 : i32
    %c0_i32_0 = arith.constant 0 : i32
    %c0_i32_1 = arith.constant 0 : i32
    return %c0_i32, %c0_i32_0 : i32, i32
  }
  func.func @transform_2(%arg0: i32) -> (i32, i32) {
    %c0_i32 = arith.constant 0 : i32
    %c0_i32_0 = arith.constant 0 : i32
    %c0_i32_1 = arith.constant 0 : i32
    return %c0_i32, %c0_i32_0 : i32, i32
  }
  func.func @transform_3(%arg0: i32) -> (i32, i32) {
    %c0_i32 = arith.constant 0 : i32
    %c0_i32_0 = arith.constant 0 : i32
    %c0_i32_1 = arith.constant 0 : i32
    return %c0_i32, %c0_i32_0 : i32, i32
  }
  func.func @transform_4(%arg0: i32) -> (i32, i32) {
    %c0_i32 = arith.constant 0 : i32
    %c0_i32_0 = arith.constant 0 : i32
    %c0_i32_1 = arith.constant 0 : i32
    return %c0_i32, %c0_i32_0 : i32, i32
  }
  func.func @transform_5(%arg0: i32) -> (i32, i32) {
    %c0_i32 = arith.constant 0 : i32
    %c0_i32_0 = arith.constant 0 : i32
    %c0_i32_1 = arith.constant 0 : i32
    return %c0_i32, %c0_i32_0 : i32, i32
  }
  func.func @transform_6(%arg0: i32) -> (i32, i32) {
    %c0_i32 = arith.constant 0 : i32
    %c0_i32_0 = arith.constant 0 : i32
    %c0_i32_1 = arith.constant 0 : i32
    return %c0_i32, %c0_i32_0 : i32, i32
  }
  func.func @transform_7(%arg0: i32) -> (i32, i32, i32) {
    %c0_i32 = arith.constant 0 : i32
    %c0_i32_0 = arith.constant 0 : i32
    %c0_i32_1 = arith.constant 0 : i32
    return %arg0, %c0_i32, %c0_i32_0 : i32, i32, i32
  }
  func.func @transform_8(%arg0: i32) -> (i32, i32, i32) {
    %c0_i32 = arith.constant 0 : i32
    %c0_i32_0 = arith.constant 0 : i32
    %c0_i32_1 = arith.constant 0 : i32
    return %arg0, %c0_i32, %c0_i32_0 : i32, i32, i32
  }
  func.func @transform_9(%arg0: i32) -> (i32, i32, i32) {
    %c0_i32 = arith.constant 0 : i32
    %c0_i32_0 = arith.constant 0 : i32
    %c0_i32_1 = arith.constant 0 : i32
    return %arg0, %c0_i32, %c0_i32_0 : i32, i32, i32
  }
  func.func @transform_10(%arg0: i32) -> (i32, i32, i32) {
    %c0_i32 = arith.constant 0 : i32
    %c0_i32_0 = arith.constant 0 : i32
    %c0_i32_1 = arith.constant 0 : i32
    return %arg0, %c0_i32, %c0_i32_0 : i32, i32, i32
  }
  func.func @transform_11(%arg0: i32) -> (i32, i32, i32) {
    %c0_i32 = arith.constant 0 : i32
    %c0_i32_0 = arith.constant 0 : i32
    %c0_i32_1 = arith.constant 0 : i32
    return %arg0, %c0_i32, %c0_i32_0 : i32, i32, i32
  }
  func.func @transform_12(%arg0: i32) -> (i32, i32, i32) {
    %c0_i32 = arith.constant 0 : i32
    %c0_i32_0 = arith.constant 0 : i32
    %c0_i32_1 = arith.constant 0 : i32
    return %arg0, %c0_i32, %c0_i32_0 : i32, i32, i32
  }
  func.func @transform_13(%arg0: i32) -> (i32, i32, i32) {
    %c0_i32 = arith.constant 0 : i32
    %c0_i32_0 = arith.constant 0 : i32
    %c0_i32_1 = arith.constant 0 : i32
    return %arg0, %c0_i32, %c0_i32_0 : i32, i32, i32
  }
  func.func @transform_14(%arg0: i32) -> (i32, i32) {
    %c0_i32 = arith.constant 0 : i32
    %c0_i32_0 = arith.constant 0 : i32
    %c0_i32_1 = arith.constant 0 : i32
    return %c0_i32, %c0_i32_0 : i32, i32
  }
}

</mosaic_0001>

<bundles_post_ra>
// kernel: orientation_net_forward.1
= control target key start
LH: loop header
LB: loop body
LE: loop exit
PB: predicated region body
PF: predicated region fallthrough
CT: control target
= control target key end

     0   :  { %s9182_s0 = inlined_call_operand.vmem [shape: bf16[16,48], index: 0, kind: input, shape index: {}]   ;;  %s9183_s1 = inlined_call_operand.vmem [shape: bf16[48,128], index: 1, kind: input, shape index: {}]   ;;  %s9184_s2 = inlined_call_operand.vmem [shape: bf16[2,2048], index: 2, kind: input, shape index: {}]   ;;  %s9185_s3 = inlined_call_operand.vmem [shape: bf16[2048,32], index: 3, kind: input, shape index: {}]   ;;  %s9186_s4 = inlined_call_operand.vmem [shape: bf16[128,128], index: 4, kind: input, shape index: {}]   ;;  %s9187_s5 = inlined_call_operand.vmem [shape: bf16[32,128], index: 5, kind: input, shape index: {}]   ;;  %s9188_s6 = inlined_call_operand.vmem [shape: f32[8,128], index: 6, kind: input, shape index: {}]   ;;  %s9189_s7 = inlined_call_operand.vmem [shape: bf16[2,128,384], index: 7, kind: input, shape index: {}]   ;;  %s9190_s8 = inlined_call_operand.vmem [shape: bf16[2,128,128], index: 8, kind: input, shape index: {}]   ;;  %s9191_s9 = inlined_call_operand.vmem [shape: bf16[2,128,2048], index: 9, kind: input, shape index: {}]   ;;  %s9192_s10 = inlined_call_operand.vmem [shape: bf16[2,2048,128], index: 10, kind: input, shape index: {}]   ;;  %s9193_s11 = inlined_call_operand.vmem [shape: f32[2,1,384], index: 11, kind: input, shape index: {}]   ;;  %s9194_s12 = inlined_call_operand.vmem [shape: f32[2,8,128], index: 12, kind: input, shape index: {}]   ;;  %s9195_s13 = inlined_call_operand.vmem [shape: f32[2,1,2048], index: 13, kind: input, shape index: {}]   ;;  %s9196_s14 = inlined_call_operand.hbm [shape: f32[2,128], index: 14, kind: output, shape index: {}]  }
   0x1   :  { %9200 = sst [smem:[#allocation7_spill]] %s9186_s4 }
   0x2   :  { %9201 = sst [smem:[#allocation8_spill]] %s9187_s5 }
   0x3   :  { %9202 = sst [smem:[#allocation9_spill]] %s9189_s7 }
   0x4   :  { %9203 = sst [smem:[#allocation10_spill]] %s9190_s8 }
   0x5   :  { %9204 = sst [smem:[#allocation11_spill]] %s9196_s14 }
   0x6   :  { %19 = vsyncpa [#allocation4], 0  ;;  %s8041_s29 = smov 0  }
   0x7 LB: > { %9205 = sst [smem:[#allocation6_spill]] %s7952_s29  ;;  %s8047_s30 = sadd.s32 4294967295, %s7952_s29   ;;  %s7952_s29 = sphi %s8041_s29, %s25_s29  }
   0x8   : > { %p6444_p0 = scmp.ge.s32.totalorder %s7952_s29, 1  ;;  %p465_p1 = scmp.lt.s32.totalorder %s7952_s29, 3 }
   0xa   : > { %p466_p2 = pnand %p6444_p0, %p465_p1 }
   0xb   : > { %p533_p3 = scmp.lt.s32.totalorder (!%p466_p2), %s8047_s30, 1  ;;  %s9206_s8 = sld [smem:[#allocation10_spill]] (!%p466_p2) }
   0xc   : > { %469 = sbr.rel (%p466_p2) target bundleno = 4790 (0x12b6), region = 76  ;;  %s9207_s7 = sld [smem:[#allocation9_spill]] (!%p466_p2) }
   0xd   : > { %p6454_p4 = scmp.ne.s32.totalorder (!%p466_p2), %s8047_s30, 0 }
  0x11   : > { %s534_s15 = scalar_select %p533_p3, %s8047_s30, 1 }
  0x13   : > { %s7521_s16 = smul.u32 192, %s534_s15  ;;  %s6918_s17 = sshll.u32 %s534_s15, 6 }
  0x14   : > { %s8056_s20 = scalar_lea.vmem %s9206_s8, %s6918_s17  ;;  %s6919_s21 = sshll.u32 %s534_s15, 10 }
  0x15   : > { %s8061_s24 = scalar_lea.vmem %s9207_s7, %s7521_s16  ;;  %s8066_s27 = scalar_lea.vmem %s9191_s9, %s6919_s21 }
  0x16   : > { %s8071_s14 = scalar_lea.vmem %s9192_s10, %s6919_s21  ;;  %s7522_s5 = smul.u32 3, %s534_s15 }
  0x17   : > { %s6452_s18 = sshll.u32 %s534_s15, 3  ;;  %s6453_s17 = sshll.u32 %s534_s15, 4 }
  0x18   : > { %s8076_s4 = scalar_lea.vmem %s9193_s11, %s7522_s5  ;;  %s8081_s23 = scalar_lea.vmem %s9194_s12, %s6452_s18 }
  0x19   : > { %s8086_s7 = scalar_lea.vmem %s9195_s13, %s6453_s17  ;;  %569 = sbr.rel (%p6454_p4) target bundleno = 243 (0xf3), region = 80 }
  0x1e   : > { %v7549_v0 = vld [vmem:[%s9183_s1 + $0x10] sm:$0xff]   ;;  %v7954_v1 = vmov 0.0   ;;  %v7550_v2 = vld [vmem:[%s9183_s1 + $0x8] sm:$0xff]   ;;  %vm7955_vm0 = vmmov 0   ;;  %v7551_v3 = vld [vmem:[%s9183_s1] sm:$0xff]   ;;  %vm606_vm1 = vcmask 392192  }
  0x1f   : > { %7341 = vmatprep.subr.bf16.mxu0 %v7954_v1  ;;  %7347 = vmatprep.mubr.msk.bf16.mxu0 %vm7955_vm0, %v7954_v1  ;;  %v7552_v4 = vld [vmem:[%s9182_s0] sm:$0xff]  }
  0x20   : > { %7342 = vmatpush3.bf16.msra.mxu0 %v7549_v0  ;;  %v6455_v5 = vld [vmem:[%s9188_s6] ss:$0 sm:$0xff] }
  0x21   : > { %7343 = vmatprep.subr.bf16.mxu0 %v7954_v1 }
  0x24   : > { %7344 = vmatpush3.bf16.msra.mxu0 %v7550_v2 }
  0x25   : > { %7345 = vmatprep.subr.bf16.mxu0 %v7954_v1 }
  0x28   : > { %7346 = vmatpush3.bf16.msra.mxu0 %v7551_v3 }
  0x2b   : > { %7348 = vmatmul.mubr.msk.bf16.vlgmr.msra.gmra.mxu0 %vm606_vm1, %v7552_v4 }
  0xeb   : > { %v644_v6 = vpop.f32.mrf.mxu0 }
  0xec   : > { %v645_v7 = vadd.f32 %v6455_v5, %v644_v6 }
  0xed   : > { %v7349_v8 = vpop.f32.mrf.mxu0 }
  0xee   : > { %651 = vst [vmem:[#allocation2] sm:$0xff] %v645_v7 }
  0xef   : > { %v647_v9 = vpop.f32.mrf.mxu0 }
  0xf0   : > { %v648_v10 = vadd.f32 %v6455_v5, %v647_v9 }
  0xf1   : > { %v7350_v11 = vpop.f32.mrf.mxu0 }
  0xf2   : > { %652 = vst [vmem:[#allocation2 + $0x8] sm:$0xff] %v648_v10 }
  0xf3 PF: > { %v7568_v12 = vld [vmem:[%s8061_s24 + $0xac] ss:$12 sps:$4 sm:$0xff]   ;;  %v7570_v13 = vld [vmem:[%s8061_s24 + $0xa8] ss:$12 sps:$4 sm:$0xff]   ;;  %v7956_v14 = vmov 0   ;;  %v7957_v15 = vmov 0.0   ;;  %v690_v41 = vlaneseq }
  0xf4   : > { %865 = vmatprep.mubr.bf16.mxu0 %v7956_v14  ;;  %7351 = vmatprep.subr.bf16.mxu1 %v7957_v15  ;;  %v7571_v16 = vld [vmem:[%s8061_s24 + $0x94] ss:$12 sps:$4 sm:$0xff]   ;;  %v7573_v17 = vld [vmem:[%s8061_s24 + $0x90] ss:$12 sps:$4 sm:$0xff]   ;;  %v7576_v19 = vld [vmem:[%s8061_s24 + $0x78] ss:$12 sps:$4 sm:$0xff]  }
  0xf5   : > { %833 = vmatprep.subr.bf16.mxu0 %v7568_v12  ;;  %v7574_v18 = vld [vmem:[%s8061_s24 + $0x7c] ss:$12 sps:$4 sm:$0xff]   ;;  %v7577_v20 = vld [vmem:[%s8061_s24 + $0x64] ss:$12 sps:$4 sm:$0xff]   ;;  %v7579_v21 = vld [vmem:[%s8061_s24 + $0x60] ss:$12 sps:$4 sm:$0xff]  }
  0xf6   : > { %834 = vmatpush1.bf16.msra.mxu0 %v7570_v13  ;;  %v7580_v22 = vld [vmem:[%s8061_s24 + $0x4c] ss:$12 sps:$4 sm:$0xff]   ;;  %v7592_v23 = vld [vmem:[%s8061_s24 + $0xb0] ss:$12 sps:$4 sm:$0xff]   ;;  %v7582_v25 = vld [vmem:[%s8061_s24 + $0x48] ss:$12 sps:$4 sm:$0xff]  }
  0xf7   : > { %835 = vmatprep.subr.bf16.mxu0 %v7571_v16  ;;  %7352 = vmatpush3.bf16.msra.mxu1 %v7592_v23  ;;  %v7593_v24 = vld [vmem:[%s8061_s24 + $0x98] ss:$12 sps:$4 sm:$0xff]   ;;  %v7583_v26 = vld [vmem:[%s8061_s24 + $0x34] ss:$12 sps:$4 sm:$0xff]   ;;  %v7585_v28 = vld [vmem:[%s8061_s24 + $0x30] ss:$12 sps:$4 sm:$0xff]  }
  0xf8   : > { %7353 = vmatprep.subr.bf16.mxu1 %v7957_v15  ;;  %v7594_v27 = vld [vmem:[%s8061_s24 + $0x80] ss:$12 sps:$4 sm:$0xff]   ;;  %v7586_v29 = vld [vmem:[%s8061_s24 + $0x1c] ss:$12 sps:$4 sm:$0xff]   ;;  %v7588_v31 = vld [vmem:[%s8061_s24 + $0x18] ss:$12 sps:$4 sm:$0xff]  }
  0xf9   : > { %v7595_v30 = vld [vmem:[%s8061_s24 + $0x68] ss:$12 sps:$4 sm:$0xff]   ;;  %v7589_v32 = vld [vmem:[%s8061_s24 + $0x4] ss:$12 sps:$4 sm:$0xff]   ;;  %v7591_v34 = vld [vmem:[%s8061_s24] ss:$12 sps:$4 sm:$0xff]  }
  0xfa   : > { %836 = vmatpush1.bf16.msra.mxu0 %v7573_v17  ;;  %v7596_v33 = vld [vmem:[%s8061_s24 + $0x50] ss:$12 sps:$4 sm:$0xff]   ;;  %v653_v35 = vld [vmem:[#allocation2] sm:$0xff]  ;;  %v654_v36 = vld [vmem:[#allocation2 + $0x8] sm:$0xff]  ;;  %vm7958_vm2 = vmmov 0   ;;  %v8146_v42 = vshrl.u32 %v690_v41, 7 }
  0xfb   : > { %837 = vmatprep.subr.bf16.mxu0 %v7574_v18  ;;  %7354 = vmatpush3.bf16.msra.mxu1 %v7593_v24  ;;  %v7597_v37 = vld [vmem:[%s8061_s24 + $0x38] ss:$12 sps:$4 sm:$0xff]   ;;  %v655_v38 = vpack.c.bf16 %v654_v36, %v653_v35  ;;  %v7598_v39 = vld [vmem:[%s8061_s24 + $0x20] ss:$12 sps:$4 sm:$0xff]   ;;  %v7599_v40 = vld [vmem:[%s8061_s24 + $0x8] ss:$12 sps:$4 sm:$0xff]  }
  0xfc   : > { %7355 = vmatprep.subr.bf16.mxu1 %v7957_v15  ;;  %7367 = vmatprep.mubr.msk.bf16.mxu1 %vm7958_vm2, %v7957_v15  ;;  %v8149_v43 = vsub.s32 1, %v8146_v42  ;;  %v688_v44 = vld [vmem:[%s8076_s4] sm:$0x7]  ;;  %v8154_v47 = vsub.s32 0, %v8146_v42  ;;  %vm921_vm3 = vcmask 261120   ;;  %v8180_v62 = vsub.s32 2, %v8146_v42 }
  0xfd   : > { %vm1044_vm4 = vcmask 1043456   ;;  %vm1014_vm5 = vcmask 64512   ;;  %s7959_s4 = smov 96   ;;  %s7960_s24 = smov 64   ;;  %vm1826_vm6 = vcmask 523264   ;;  %vm1829_vm7 = vcmask 785408  }
  0xfe   : > { %838 = vmatpush1.bf16.msra.mxu0 %v7576_v19  ;;  %v697_v45 = vrot.slane %v688_v44, %v8149_v43  ;;  %v693_v51 = vrot.slane %v688_v44, %v8154_v47  ;;  %v701_v63 = vrot.slane %v688_v44, %v8180_v62  ;;  %s7961_s22 = smov 32   ;;  %p6771_p5 = scmp.ne.s32.totalorder %s8047_s30, 1 }
  0xff   : > { %839 = vmatprep.subr.bf16.mxu0 %v7577_v20  ;;  %7356 = vmatpush3.bf16.msra.mxu1 %v7594_v27 }
 0x100   : > { %7357 = vmatprep.subr.bf16.mxu1 %v7957_v15 }
 0x102   : > { %840 = vmatpush1.bf16.msra.mxu0 %v7579_v21 }
 0x103   : > { %841 = vmatprep.subr.bf16.mxu0 %v7580_v22  ;;  %7358 = vmatpush3.bf16.msra.mxu1 %v7595_v30 }
 0x104   : > { %7359 = vmatprep.subr.bf16.mxu1 %v7957_v15 }
 0x106   : > { %842 = vmatpush1.bf16.msra.mxu0 %v7582_v25 }
 0x107   : > { %843 = vmatprep.subr.bf16.mxu0 %v7583_v26  ;;  %7360 = vmatpush3.bf16.msra.mxu1 %v7596_v33 }
 0x108   : > { %7361 = vmatprep.subr.bf16.mxu1 %v7957_v15 }
 0x10a   : > { %844 = vmatpush1.bf16.msra.mxu0 %v7585_v28 }
 0x10b   : > { %845 = vmatprep.subr.bf16.mxu0 %v7586_v29  ;;  %7362 = vmatpush3.bf16.msra.mxu1 %v7597_v37 }
 0x10c   : > { %7363 = vmatprep.subr.bf16.mxu1 %v7957_v15 }
 0x10e   : > { %846 = vmatpush1.bf16.msra.mxu0 %v7588_v31 }
 0x10f   : > { %847 = vmatprep.subr.bf16.mxu0 %v7589_v32  ;;  %7364 = vmatpush3.bf16.msra.mxu1 %v7598_v39 }
 0x110   : > { %7365 = vmatprep.subr.bf16.mxu1 %v7957_v15 }
 0x112   : > { %848 = vmatpush1.bf16.msra.mxu0 %v7591_v34 }
 0x113   : > { %7395 = vmatprep.subr.bf16.mxu0 %v7957_v15  ;;  %7366 = vmatpush3.bf16.msra.mxu1 %v7599_v40 }
 0x114   : > { %7371 = vmatprep.subr.bf16.mxu1 %v7957_v15 }
 0x115   : > { %866 = vmatmul.mubr.bf16.vlgmr.msra.gmra.mxu0 %v655_v38 }
 0x116   : > { %7397 = vmatprep.mubr.msk.bf16.mxu0 %vm7958_vm2, %v7957_v15  ;;  %7368 = vmatmul.mubr.bf16.vlgmr.msra.gmra.mxu1 %v655_v38 }
 0x117   : > { %7373 = vmatprep.mubr.msk.bf16.mxu1 %vm7958_vm2, %v7957_v15 }
 0x1d5   : > { %v867_v46 = vpop.f32.mrf.mxu0 }
 0x1d6   : > { %v868_v56 = vadd.f32 %v867_v46, %v693_v51  ;;  %v910_v0 = vpop.f32.mrf.mxu1 }
 0x1d7   : > { %v869_v48 = vpop.f32.mrf.mxu0  ;;  %v911_v1 = vadd.f32 %v910_v0, %v701_v63 }
 0x1d8   : > { %v870_v49 = vadd.f32 %v869_v48, %v697_v45  ;;  %v8164_v58 = vpack.c.bf16 %v868_v56, %v868_v56  ;;  %v7369_v2 = vpop.f32.mrf.mxu1 }
 0x1d9   : > { %v871_v50 = vpop.f32.mrf.mxu0  ;;  %v8183_v3 = vpack.c.bf16 %v911_v1, %v911_v1 }
 0x1da   : > { %v8157_v52 = vpack.c.bf16 %v870_v49, %v870_v49  ;;  %v872_v60 = vadd.f32 %v871_v50, %v693_v51  ;;  %v913_v4 = vpop.f32.mrf.mxu1 }
 0x1db   : > { %v873_v53 = vpop.f32.mrf.mxu0  ;;  %v914_v5 = vadd.f32 %v913_v4, %v701_v63  ;;  %v1046_v6 = vsel %vm1044_vm4, %v8183_v3, 0 }
 0x1dc   : > { %v874_v54 = vadd.f32 %v873_v53, %v697_v45  ;;  %v926_v55 = vsel %vm921_vm3, %v8157_v52, 0  ;;  %v8173_v61 = vpack.c.bf16 %v872_v60, %v872_v60  ;;  %v7370_v7 = vpop.f32.mrf.mxu1 }
 0x1dd   : > { %7372 = vmatpush3.bf16.xpose.msra.mxu1 %v926_v55  ;;  %v8202_v34 = vpack.c.bf16 %v914_v5, %v914_v5 }
 0x1de   : > { %7377 = vmatprep.subr.bf16.mxu1 %v7957_v15  ;;  %v8162_v57 = vpack.c.bf16 %v874_v54, %v874_v54 }
 0x1df   : > { %v1092_v37 = vsel %vm1044_vm4, %v8202_v34, 0 }
 0x1e0   : > { %v972_v59 = vsel %vm921_vm3, %v8162_v57, 0 }
 0x1e4   : > { %7374 = vmatmul.mubr.msk.bf16.vlgmr.msra.gmra.mxu1 %vm921_vm3, %v8164_v58 }
 0x1e5   : > { %7378 = vmatpush3.bf16.xpose.msra.mxu1 %v972_v59  ;;  %7379 = vmatprep.mubr.msk.bf16.mxu1 %vm7958_vm2, %v7957_v15 }
 0x1e6   : > { %7383 = vmatprep.subr.bf16.mxu1 %v7957_v15 }
 0x1ec   : > { %7380 = vmatmul.mubr.msk.bf16.vlgmr.msra.gmra.mxu1 %vm921_vm3, %v8173_v61 }
 0x1ed   : > { %7385 = vmatprep.mubr.msk.bf16.mxu1 %vm7958_vm2, %v7957_v15  ;;  %7384 = vmatpush3.bf16.msra.mxu1 %v1046_v6 }
 0x1ee   : > { %7389 = vmatprep.subr.bf16.mxu1 %v7957_v15 }
 0x2a4   : > { %v962_v8 = vpop.f32.mrf.mxu1 }
 0x2a5   : > { %v1015_v9 = vsel %vm1014_vm5, %v962_v8, -inf }
 0x2a6   : > { %1016 = vmax.xlane.f32.xlu0 %v1015_v9  ;;  %v7375_v10 = vpop.f32.mrf.mxu1 }
 0x2a8   : > { %v965_v11 = vpop.f32.mrf.mxu1 }
 0x2aa   : > { %v7376_v12 = vpop.f32.mrf.mxu1 }
 0x2ac   : > { %v1008_v13 = vpop.f32.mrf.mxu1 }
 0x2ad   : > { %v1018_v16 = vsel %vm1014_vm5, %v1008_v13, -inf }
 0x2ae   : > { %1019 = vmax.xlane.f32.xlu0 %v1018_v16  ;;  %v7381_v17 = vpop.f32.mrf.mxu1 }
 0x2b0   : > { %v1011_v18 = vpop.f32.mrf.mxu1 }
 0x2b2   : > { %v7382_v19 = vpop.f32.mrf.mxu1 }
 0x2c4   : > { %1138 = vrot.lane.b32.xlu0 %v8157_v52, %s7959_s4 }
 0x32f   : > { %v1017_v20 = vpop.xlane.xlu0 %1016 }
 0x330   : > { %v1021_v21 = vsub.f32 %v962_v8, %v1017_v20 }
 0x332   : > { %v1023_v22 = vmul.f32 1.442695, %v1021_v21 }
 0x334   : > { %7736 = vpow2.f32 %v1023_v22 }
 0x337   : > { %v1020_v23 = vpop.xlane.xlu0 %1019 }
 0x338   : > { %v1022_v28 = vsub.f32 %v1008_v13, %v1020_v23 }
 0x33a   : > { %v1025_v29 = vmul.f32 1.442695, %v1022_v28 }
 0x33b   : > { %v1139_v24 = vpop.permute.xlu0 %1138 }
 0x33c   : > { %v1144_v25 = vsel %vm921_vm3, %v1139_v24, 0  ;;  %7738 = vpow2.f32 %v1025_v29 }
 0x33d   : > { %7396 = vmatpush3.bf16.xpose.msra.mxu0 %v1144_v25 }
 0x33e   : > { %7407 = vmatprep.subr.bf16.mxu0 %v7957_v15 }
 0x341   : > { %v7737_v26 = vpop.eup %7736 }
 0x342   : > { %v1027_v27 = vsel %vm1014_vm5, %v7737_v26, 0.0 }
 0x343   : > { %1028 = vadd.xlane.f32.xlu1 %v1027_v27 }
 0x349   : > { %v7739_v30 = vpop.eup %7738 }
 0x34a   : > { %v1030_v31 = vsel %vm1014_vm5, %v7739_v30, 0.0 }
 0x354   : > { %1190 = vrot.lane.b32.xlu1 %v8162_v57, %s7959_s4 }
 0x378   : > { %1031 = vadd.xlane.f32.xlu1 %v1030_v31 }
 0x389   : > { %1135 = vrot.lane.b32.xlu1 %v8164_v58, %s7959_s4 }
 0x38d   : > { %1187 = vrot.lane.b32.xlu1 %v8173_v61, %s7959_s4 }
 0x3cc   : > { %v1029_v32 = vpop.xlane.xlu1 %1028 }
 0x3cd   : > { %7740 = vrcp.f32 %v1029_v32 }
 0x3d0   : > { %v1191_v38 = vpop.permute.xlu1 %1190 }
 0x3d1   : > { %v1196_v48 = vsel %vm921_vm3, %v1191_v38, 0 }
 0x3da   : > { %v7741_v33 = vpop.eup %7740 }
 0x3db   : > { %v1035_v35 = vmul.f32 %v7741_v33, %v7737_v26 }
 0x3dd   : > { %v1037_v36 = vpack.c.bf16 %v1035_v35, %v1035_v35 }
 0x3df   : > { %7386 = vmatmul.mubr.msk.bf16.vlgmr.msra.gmra.mxu1 %vm1014_vm5, %v1037_v36 }
 0x3e0   : > { %7390 = vmatpush3.bf16.msra.mxu1 %v1092_v37  ;;  %7391 = vmatprep.mubr.msk.bf16.mxu1 %vm7958_vm2, %v7957_v15 }
 0x3e1   : > { %7401 = vmatprep.subr.bf16.mxu1 %v7957_v15 }
 0x401   : > { %v1032_v39 = vpop.xlane.xlu1 %1031 }
 0x402   : > { %7742 = vrcp.f32 %v1032_v39 }
 0x405   : > { %v1136_v40 = vpop.permute.xlu1 %1135 }
 0x406   : > { %7398 = vmatmul.mubr.msk.bf16.vlgmr.msra.gmra.mxu0 %vm921_vm3, %v1136_v40 }
 0x407   : > { %7409 = vmatprep.mubr.msk.bf16.mxu0 %vm7958_vm2, %v7957_v15 }
 0x409   : > { %v1188_v49 = vpop.permute.xlu1 %1187 }
 0x40f   : > { %v7743_v44 = vpop.eup %7742 }
 0x410   : > { %v1036_v45 = vmul.f32 %v7743_v44, %v7739_v30 }
 0x412   : > { %v1038_v46 = vpack.c.bf16 %v1036_v45, %v1036_v45 }
 0x414   : > { %7392 = vmatmul.mubr.msk.bf16.vlgmr.msra.gmra.mxu1 %vm1014_vm5, %v1038_v46 }
 0x415   : > { %7402 = vmatpush3.bf16.xpose.msra.mxu1 %v1196_v48  ;;  %7403 = vmatprep.mubr.msk.bf16.mxu1 %vm7958_vm2, %v7957_v15 }
 0x416   : > { %7413 = vmatprep.subr.bf16.mxu1 %v7957_v15 }
 0x41c   : > { %7404 = vmatmul.mubr.msk.bf16.vlgmr.msra.gmra.mxu1 %vm921_vm3, %v1188_v49 }
 0x41d   : > { %7415 = vmatprep.mubr.msk.bf16.mxu1 %vm7958_vm2, %v7957_v15 }
 0x49f   : > { %v8221_v50 = vpop.f32.mrf.mxu1 }
 0x4a1   : > { %v7387_v51 = vpop.f32.mrf.mxu1 }
 0x4a3   : > { %v1085_v53 = vpop.f32.mrf.mxu1 }
 0x4a5   : > { %v7388_v54 = vpop.f32.mrf.mxu1 }
 0x4c6   : > { %v1180_v55 = vpop.f32.mrf.mxu0 }
 0x4c7   : > { %v1238_v56 = vsel %vm1014_vm5, %v1180_v55, -inf }
 0x4c8   : > { %1239 = vmax.xlane.f32.xlu0 %v1238_v56  ;;  %v7399_v59 = vpop.f32.mrf.mxu0 }
 0x4ca   : > { %v1183_v60 = vpop.f32.mrf.mxu0 }
 0x4cc   : > { %v7400_v63 = vpop.f32.mrf.mxu0 }
 0x4d4   : > { %v8224_v0 = vpop.f32.mrf.mxu1 }
 0x4d6   : > { %v7393_v1 = vpop.f32.mrf.mxu1 }
 0x4d8   : > { %v1131_v2 = vpop.f32.mrf.mxu1 }
 0x4da   : > { %v7394_v4 = vpop.f32.mrf.mxu1 }
 0x4dc   : > { %v1232_v5 = vpop.f32.mrf.mxu1 }
 0x4dd   : > { %v1241_v6 = vsel %vm1014_vm5, %v1232_v5, -inf }
 0x4de   : > { %1242 = vmax.xlane.f32.xlu1 %v1241_v6  ;;  %v7405_v7 = vpop.f32.mrf.mxu1 }
 0x4e0   : > { %v1235_v8 = vpop.f32.mrf.mxu1 }
 0x4e2   : > { %v7406_v9 = vpop.f32.mrf.mxu1 }
 0x4ef   : > { %1312 = vrot.lane.b32.xlu1 %v8202_v34, %s7959_s4 }
 0x4f3   : > { %1362 = vrot.lane.b32.xlu1 %v8157_v52, %s7960_s24 }
 0x4f7   : > { %1412 = vrot.lane.b32.xlu1 %v8162_v57, %s7960_s24 }
 0x4fb   : > { %1410 = vrot.lane.b32.xlu1 %v8173_v61, %s7960_s24 }
 0x551   : > { %v1240_v10 = vpop.xlane.xlu0 %1239 }
 0x552   : > { %v1244_v11 = vsub.f32 %v1180_v55, %v1240_v10 }
 0x554   : > { %v1246_v12 = vmul.f32 1.442695, %v1244_v11 }
 0x556   : > { %7744 = vpow2.f32 %v1246_v12 }
 0x563   : > { %v7745_v13 = vpop.eup %7744 }
 0x564   : > { %v1250_v16 = vsel %vm1014_vm5, %v7745_v13, 0.0 }
 0x565   : > { %1251 = vadd.xlane.f32.xlu0 %v1250_v16 }
 0x567   : > { %v1243_v17 = vpop.xlane.xlu1 %1242 }
 0x568   : > { %v1245_v18 = vsub.f32 %v1232_v5, %v1243_v17 }
 0x56a   : > { %v1248_v19 = vmul.f32 1.442695, %v1245_v18 }
 0x56b   : > { %v1313_v20 = vpop.permute.xlu1 %1312 }
 0x56c   : > { %7746 = vpow2.f32 %v1248_v19  ;;  %v1318_v21 = vsel %vm1044_vm4, %v1313_v20, 0 }
 0x56d   : > { %7414 = vmatpush3.bf16.msra.mxu1 %v1318_v21 }
 0x56e   : > { %7425 = vmatprep.subr.bf16.mxu1 %v7957_v15 }
 0x56f   : > { %v1363_v30 = vpop.permute.xlu1 %1362 }
 0x570   : > { %v1368_v32 = vsel %vm921_vm3, %v1363_v30, 0 }
 0x573   : > { %v1413_v36 = vpop.permute.xlu1 %1412 }
 0x574   : > { %v1418_v39 = vsel %vm921_vm3, %v1413_v36, 0 }
 0x577   : > { %v1411_v40 = vpop.permute.xlu1 %1410 }
 0x579   : > { %v7747_v22 = vpop.eup %7746 }
 0x57a   : > { %v1253_v23 = vsel %vm1014_vm5, %v7747_v22, 0.0 }
 0x57b   : > { %1254 = vadd.xlane.f32.xlu0 %v1253_v23 }
 0x591   : > { %1263 = vrot.lane.b32.xlu0 %v8183_v3, %s7959_s4 }
 0x595   : > { %1360 = vrot.lane.b32.xlu0 %v8164_v58, %s7960_s24 }
 0x5ee   : > { %v1252_v24 = vpop.xlane.xlu0 %1251 }
 0x5ef   : > { %7748 = vrcp.f32 %v1252_v24 }
 0x5fc   : > { %v7749_v25 = vpop.eup %7748 }
 0x5fd   : > { %v1258_v27 = vmul.f32 %v7749_v25, %v7745_v13 }
 0x5ff   : > { %v1260_v31 = vpack.c.bf16 %v1258_v27, %v1258_v27 }
 0x604   : > { %v1255_v26 = vpop.xlane.xlu0 %1254 }
 0x605   : > { %7750 = vrcp.f32 %v1255_v26 }
 0x608   : > { %v1264_v28 = vpop.permute.xlu0 %1263 }
 0x609   : > { %v1269_v29 = vsel %vm1044_vm4, %v1264_v28, 0 }
 0x60a   : > { %7408 = vmatpush3.bf16.msra.mxu0 %v1269_v29 }
 0x60b   : > { %7419 = vmatprep.subr.bf16.mxu0 %v7957_v15 }
 0x60c   : > { %v1361_v37 = vpop.permute.xlu0 %1360 }
 0x60d   : > { %7410 = vmatmul.mubr.msk.bf16.vlgmr.msra.gmra.mxu0 %vm1014_vm5, %v1260_v31 }
 0x60e   : > { %7420 = vmatpush3.bf16.xpose.msra.mxu0 %v1368_v32  ;;  %7421 = vmatprep.mubr.msk.bf16.mxu0 %vm7958_vm2, %v7957_v15 }
 0x60f   : > { %7431 = vmatprep.subr.bf16.mxu0 %v7957_v15 }
 0x612   : > { %v7751_v33 = vpop.eup %7750 }
 0x613   : > { %v1259_v35 = vmul.f32 %v7751_v33, %v7747_v22 }
 0x615   : > { %7422 = vmatmul.mubr.msk.bf16.vlgmr.msra.gmra.mxu0 %vm921_vm3, %v1361_v37  ;;  %v1261_v38 = vpack.c.bf16 %v1259_v35, %v1259_v35 }
 0x616   : > { %7433 = vmatprep.mubr.msk.bf16.mxu0 %vm7958_vm2, %v7957_v15 }
 0x617   : > { %7416 = vmatmul.mubr.msk.bf16.vlgmr.msra.gmra.mxu1 %vm1014_vm5, %v1261_v38 }
 0x618   : > { %7426 = vmatpush3.bf16.xpose.msra.mxu1 %v1418_v39  ;;  %7427 = vmatprep.mubr.msk.bf16.mxu1 %vm7958_vm2, %v7957_v15 }
 0x619   : > { %7437 = vmatprep.subr.bf16.mxu1 %v7957_v15 }
 0x61f   : > { %7428 = vmatmul.mubr.msk.bf16.vlgmr.msra.gmra.mxu1 %vm921_vm3, %v1411_v40 }
 0x620   : > { %7439 = vmatprep.mubr.msk.bf16.mxu1 %vm7958_vm2, %v7957_v15 }
 0x6cd   : > { %v8261_v44 = vpop.f32.mrf.mxu0 }
 0x6cf   : > { %v7411_v45 = vpop.f32.mrf.mxu0 }
 0x6d1   : > { %v1308_v46 = vpop.f32.mrf.mxu0 }
 0x6d3   : > { %v7412_v48 = vpop.f32.mrf.mxu0 }
 0x6d5   : > { %v1404_v49 = vpop.f32.mrf.mxu0 }
 0x6d6   : > { %v1460_v51 = vsel %vm1014_vm5, %v1404_v49, -inf }
 0x6d7   : > { %1461 = vmax.xlane.f32.xlu0 %v1460_v51  ;;  %v8264_v53 = vpop.f32.mrf.mxu1  ;;  %v7423_v54 = vpop.f32.mrf.mxu0 }
 0x6d8   : > { %v7553_v55 = vpack.i.bf16 %v8264_v53, %v8261_v44 }
 0x6d9   : > { %v7417_v56 = vpop.f32.mrf.mxu1  ;;  %v1407_v59 = vpop.f32.mrf.mxu0 }
 0x6db   : > { %v1357_v60 = vpop.f32.mrf.mxu1  ;;  %v7424_v63 = vpop.f32.mrf.mxu0 }
 0x6dd   : > { %v7418_v1 = vpop.f32.mrf.mxu1 }
 0x6df   : > { %v1454_v2 = vpop.f32.mrf.mxu1 }
 0x6e0   : > { %v1463_v4 = vsel %vm1014_vm5, %v1454_v2, -inf }
 0x6e1   : > { %1464 = vmax.xlane.f32.xlu1 %v1463_v4  ;;  %v7429_v5 = vpop.f32.mrf.mxu1 }
 0x6e3   : > { %v1457_v6 = vpop.f32.mrf.mxu1 }
 0x6e5   : > { %v7430_v7 = vpop.f32.mrf.mxu1 }
 0x6f2   : > { %1532 = vrot.lane.b32.xlu1 %v8202_v34, %s7960_s24 }
 0x6f6   : > { %1582 = vrot.lane.b32.xlu1 %v8157_v52, %s7961_s22 }
 0x6fa   : > { %1632 = vrot.lane.b32.xlu1 %v8162_v57, %s7961_s22 }
 0x6fe   : > { %1630 = vrot.lane.b32.xlu1 %v8173_v61, %s7961_s22 }
 0x760   : > { %v1462_v8 = vpop.xlane.xlu0 %1461 }
 0x761   : > { %v1466_v9 = vsub.f32 %v1404_v49, %v1462_v8 }
 0x763   : > { %v1468_v10 = vmul.f32 1.442695, %v1466_v9 }
 0x765   : > { %7752 = vpow2.f32 %v1468_v10 }
 0x76a   : > { %v1465_v11 = vpop.xlane.xlu1 %1464 }
 0x76b   : > { %v1467_v12 = vsub.f32 %v1454_v2, %v1465_v11 }
 0x76d   : > { %v1470_v13 = vmul.f32 1.442695, %v1467_v12 }
 0x76e   : > { %v1533_v16 = vpop.permute.xlu1 %1532 }
 0x76f   : > { %7754 = vpow2.f32 %v1470_v13  ;;  %v1538_v17 = vsel %vm1044_vm4, %v1533_v16, 0 }
 0x770   : > { %7438 = vmatpush3.bf16.msra.mxu1 %v1538_v17 }
 0x771   : > { %7449 = vmatprep.subr.bf16.mxu1 %v7957_v15 }
 0x772   : > { %v7753_v52 = vpop.eup %7752  ;;  %v1583_v25 = vpop.permute.xlu1 %1582 }
 0x773   : > { %v1472_v57 = vsel %vm1014_vm5, %v7753_v52, 0.0  ;;  %v1588_v27 = vsel %vm921_vm3, %v1583_v25, 0  ;;  %v7604_v25 = vld [vmem:[%s8056_s20 + $0x18] sm:$0xff]  }
 0x774   : > { %1473 = vadd.xlane.f32.xlu0 %v1472_v57 }
 0x776   : > { %v1633_v29 = vpop.permute.xlu1 %1632 }
 0x777   : > { %v1638_v32 = vsel %vm921_vm3, %v1633_v29, 0 }
 0x77a   : > { %v1631_v33 = vpop.permute.xlu1 %1630 }
 0x77c   : > { %v7755_v18 = vpop.eup %7754 }
 0x77d   : > { %v1475_v61 = vsel %vm1014_vm5, %v7755_v18, 0.0 }
 0x77e   : > { %1476 = vadd.xlane.f32.xlu0 %v1475_v61 }
 0x794   : > { %1484 = vrot.lane.b32.xlu0 %v8183_v3, %s7960_s24 }
 0x798   : > { %1580 = vrot.lane.b32.xlu0 %v8164_v58, %s7961_s22 }
 0x7fd   : > { %v1474_v19 = vpop.xlane.xlu0 %1473 }
 0x7fe   : > { %7756 = vrcp.f32 %v1474_v19 }
 0x807   : > { %v1477_v20 = vpop.xlane.xlu0 %1476 }
 0x808   : > { %7758 = vrcp.f32 %v1477_v20 }
 0x80b   : > { %v7757_v21 = vpop.eup %7756  ;;  %v1485_v22 = vpop.permute.xlu0 %1484 }
 0x80c   : > { %v1490_v23 = vsel %vm1044_vm4, %v1485_v22, 0  ;;  %v1480_v24 = vmul.f32 %v7757_v21, %v7753_v52  ;;  %v7600_v21 = vld [vmem:[%s8056_s20 + $0x38] sm:$0xff]   ;;  %v7601_v22 = vld [vmem:[%s8056_s20 + $0x30] sm:$0xff]  }
 0x80d   : > { %7432 = vmatpush3.bf16.msra.mxu0 %v1490_v23  ;;  %v7602_v23 = vld [vmem:[%s8056_s20 + $0x28] sm:$0xff]  }
 0x80e   : > { %v1482_v26 = vpack.c.bf16 %v1480_v24, %v1480_v24  ;;  %7443 = vmatprep.subr.bf16.mxu0 %v7957_v15  ;;  %v7603_v24 = vld [vmem:[%s8056_s20 + $0x20] sm:$0xff]  }
 0x80f   : > { %v1581_v30 = vpop.permute.xlu0 %1580 }
 0x810   : > { %7434 = vmatmul.mubr.msk.bf16.vlgmr.msra.gmra.mxu0 %vm1014_vm5, %v1482_v26  ;;  %v7605_v26 = vld [vmem:[%s8056_s20 + $0x10] sm:$0xff]  }
 0x811   : > { %7444 = vmatpush3.bf16.xpose.msra.mxu0 %v1588_v27  ;;  %7445 = vmatprep.mubr.msk.bf16.mxu0 %vm7958_vm2, %v7957_v15  ;;  %v7606_v27 = vld [vmem:[%s8056_s20 + $0x8] sm:$0xff]  }
 0x812   : > { %7455 = vmatprep.subr.bf16.mxu0 %v7957_v15 }
 0x815   : > { %v7759_v58 = vpop.eup %7758 }
 0x816   : > { %v1481_v28 = vmul.f32 %v7759_v58, %v7755_v18 }
 0x818   : > { %7446 = vmatmul.mubr.msk.bf16.vlgmr.msra.gmra.mxu0 %vm921_vm3, %v1581_v30  ;;  %v1483_v31 = vpack.c.bf16 %v1481_v28, %v1481_v28  ;;  %v7607_v28 = vld [vmem:[%s8056_s20] sm:$0xff]   ;;  %s9208_s20 = sld [smem:[#allocation7_spill]] (!%p6771_p5) }
 0x819   : > { %7457 = vmatprep.mubr.msk.bf16.mxu0 %vm7958_vm2, %v7957_v15 }
 0x81a   : > { %7440 = vmatmul.mubr.msk.bf16.vlgmr.msra.gmra.mxu1 %vm1014_vm5, %v1483_v31 }
 0x81b   : > { %7450 = vmatpush3.bf16.xpose.msra.mxu1 %v1638_v32  ;;  %7451 = vmatprep.mubr.msk.bf16.mxu1 %vm7958_vm2, %v7957_v15 }
 0x81c   : > { %7461 = vmatprep.subr.bf16.mxu1 %v7957_v15 }
 0x822   : > { %7452 = vmatmul.mubr.msk.bf16.vlgmr.msra.gmra.mxu1 %vm921_vm3, %v1631_v33 }
 0x823   : > { %7463 = vmatprep.mubr.msk.bf16.mxu1 %vm7958_vm2, %v7957_v15 }
 0x8d0   : > { %v1526_v35 = vpop.f32.mrf.mxu0 }
 0x8d2   : > { %v7435_v36 = vpop.f32.mrf.mxu0 }
 0x8d4   : > { %v1529_v37 = vpop.f32.mrf.mxu0 }
 0x8d6   : > { %v7436_v38 = vpop.f32.mrf.mxu0 }
 0x8d8   : > { %v1624_v39 = vpop.f32.mrf.mxu0 }
 0x8d9   : > { %v1680_v40 = vsel %vm1014_vm5, %v1624_v39, -inf }
 0x8da   : > { %1681 = vmax.xlane.f32.xlu0 %v1680_v40  ;;  %v1574_v45 = vpop.f32.mrf.mxu1  ;;  %v7447_v46 = vpop.f32.mrf.mxu0 }
 0x8db   : > { %v7558_v4 = vpack.i.bf16 %v1574_v45, %v1526_v35 }
 0x8dc   : > { %v7441_v48 = vpop.f32.mrf.mxu1  ;;  %v1627_v49 = vpop.f32.mrf.mxu0 }
 0x8de   : > { %v1577_v51 = vpop.f32.mrf.mxu1  ;;  %v7448_v54 = vpop.f32.mrf.mxu0 }
 0x8e0   : > { %v7442_v56 = vpop.f32.mrf.mxu1 }
 0x8e2   : > { %v1674_v59 = vpop.f32.mrf.mxu1 }
 0x8e3   : > { %v1683_v60 = vsel %vm1014_vm5, %v1674_v59, -inf }
 0x8e4   : > { %1684 = vmax.xlane.f32.xlu1 %v1683_v60  ;;  %v7453_v63 = vpop.f32.mrf.mxu1 }
 0x8e6   : > { %v1677_v1 = vpop.f32.mrf.mxu1 }
 0x8e8   : > { %v7454_v2 = vpop.f32.mrf.mxu1 }
 0x8f5   : > { %1752 = vrot.lane.b32.xlu1 %v8202_v34, %s7961_s22 }
 0x8f9   : > { %7554 = vrot.lane.b32.xlu1 %v7553_v55, %s7961_s22 }
 0x8fd   : > { %7559 = vrot.lane.b32.xlu1 %v7558_v4, %s7960_s24  ;;  %v6501_v4 = vld [vmem:[%s8081_s23] ss:$0 sm:$0xff] }
 0x963   : > { %v1682_v5 = vpop.xlane.xlu0 %1681 }
 0x964   : > { %v1686_v6 = vsub.f32 %v1624_v39, %v1682_v5 }
 0x966   : > { %v1688_v7 = vmul.f32 1.442695, %v1686_v6 }
 0x968   : > { %7760 = vpow2.f32 %v1688_v7  ;;  %v7776_v7 = vld [vmem:[#allocation2] sm:$0xff] }
 0x96d   : > { %v1685_v8 = vpop.xlane.xlu1 %1684 }
 0x96e   : > { %v1687_v9 = vsub.f32 %v1674_v59, %v1685_v8 }
 0x970   : > { %v1690_v10 = vmul.f32 1.442695, %v1687_v9 }
 0x971   : > { %v1753_v11 = vpop.permute.xlu1 %1752 }
 0x972   : > { %7762 = vpow2.f32 %v1690_v10  ;;  %v1758_v12 = vsel %vm1044_vm4, %v1753_v11, 0  ;;  %v7777_v11 = vld [vmem:[#allocation2 + $0x8] sm:$0xff] }
 0x973   : > { %7462 = vmatpush3.bf16.msra.mxu1 %v1758_v12 }
 0x975   : > { %v7761_v34 = vpop.eup %7760  ;;  %v7555_v38 = vpop.permute.xlu1 %7554 }
 0x976   : > { %v1692_v13 = vsel %vm1014_vm5, %v7761_v34, 0.0  ;;  %v7557_v40 = vunpack.i.h.bf16 %v7555_v38  ;;  %v7556_v45 = vunpack.i.l.bf16 %v7555_v38 }
 0x977   : > { %1693 = vadd.xlane.f32.xlu0 %v1692_v13  ;;  %v2102_v13 = vld [vmem:[%s8066_s27 + $0x3c0] sm:$0xff] }
 0x978   : > { %v1825_v49 = vsel %vm921_vm3, %v8224_v0, %v7557_v40  ;;  %v1824_v51 = vsel %vm921_vm3, %v8221_v50, %v7556_v45  ;;  %v2054_v40 = vld [vmem:[%s8066_s27 + $0x240] sm:$0xff]  ;;  %v2047_v45 = vld [vmem:[%s8066_s27 + $0x208] sm:$0xff] }
 0x979   : > { %v7560_v39 = vpop.permute.xlu1 %7559 }
 0x97a   : > { %v7562_v46 = vunpack.i.h.bf16 %v7560_v39 }
 0x97c   : > { %v1828_v60 = vsel %vm1826_vm6, %v1825_v49, %v7562_v46 }
 0x97f   : > { %v7763_v44 = vpop.eup %7762 }
 0x980   : > { %v1695_v53 = vsel %vm1014_vm5, %v7763_v44, 0.0 }
 0x981   : > { %1696 = vadd.xlane.f32.xlu0 %v1695_v53 }
 0x997   : > { %1704 = vrot.lane.b32.xlu0 %v8183_v3, %s7961_s22  ;;  %s9209_s22 = sld [smem:[#allocation8_spill]] (!%p6771_p5) }
 0xa00   : > { %v1694_v55 = vpop.xlane.xlu0 %1693 }
 0xa01   : > { %7764 = vrcp.f32 %v1694_v55 }
 0xa0a   : > { %v1697_v16 = vpop.xlane.xlu0 %1696 }
 0xa0b   : > { %7766 = vrcp.f32 %v1697_v16  ;;  %v2103_v16 = vld [vmem:[%s8066_s27 + $0x3c8] sm:$0xff] }
 0xa0e   : > { %v7765_v17 = vpop.eup %7764  ;;  %v1705_v52 = vpop.permute.xlu0 %1704 }
 0xa0f   : > { %v1710_v57 = vsel %vm1044_vm4, %v1705_v52, 0  ;;  %v1700_v18 = vmul.f32 %v7765_v17, %v7761_v34  ;;  %v2094_v34 = vld [vmem:[%s8066_s27 + $0x380] sm:$0xff] }
 0xa10   : > { %7456 = vmatpush3.bf16.msra.mxu0 %v1710_v57  ;;  %v6624_v53 = vcombine.low %v2094_v34, %v2102_v13  ;;  %v6625_v55 = vcombine.high %v2094_v34, %v2102_v13  ;;  %v1999_v34 = vld [vmem:[%s8066_s27 + $0x88] sm:$0xff] }
 0xa11   : > { %v1702_v61 = vpack.c.bf16 %v1700_v18, %v1700_v18  ;;  %7467 = vmatprep.subr.bf16.mxu0 %v7957_v15 }
 0xa12   : > { %2834 = vmatprep.subr.bf16.mxu1 %v6625_v55 }
 0xa13   : > { %7458 = vmatmul.mubr.msk.bf16.vlgmr.msra.gmra.mxu0 %vm1014_vm5, %v1702_v61 }
 0xa14   : > { %7483 = vmatprep.mubr.msk.bf16.mxu0 %vm7958_vm2, %v7957_v15  ;;  %7468 = vmatpush3.bf16.msra.mxu0 %v7600_v21 }
 0xa15   : > { %7469 = vmatprep.subr.bf16.mxu0 %v7957_v15 }
 0xa18   : > { %v7767_v3 = vpop.eup %7766  ;;  %7470 = vmatpush3.bf16.msra.mxu0 %v7601_v22 }
 0xa19   : > { %v1701_v19 = vmul.f32 %v7767_v3, %v7763_v44  ;;  %7471 = vmatprep.subr.bf16.mxu0 %v7957_v15  ;;  %v2095_v44 = vld [vmem:[%s8066_s27 + $0x388] sm:$0xff] }
 0xa1a   : > { %v6626_v17 = vcombine.low %v2095_v44, %v2103_v16  ;;  %v6627_v52 = vcombine.high %v2095_v44, %v2103_v16  ;;  %v2007_v44 = vld [vmem:[%s8066_s27 + $0xc8] sm:$0xff] }
 0xa1b   : > { %v1703_v20 = vpack.c.bf16 %v1701_v19, %v1701_v19  ;;  %v6530_v55 = vcombine.low %v1999_v34, %v2007_v44  ;;  %v6531_v16 = vcombine.high %v1999_v34, %v2007_v44 }
 0xa1c   : > { %7472 = vmatpush3.bf16.msra.mxu0 %v7602_v23  ;;  %v2078_v23 = vld [vmem:[%s8066_s27 + $0x300] sm:$0xff] }
 0xa1d   : > { %7464 = vmatmul.mubr.msk.bf16.vlgmr.msra.gmra.mxu1 %vm1014_vm5, %v1703_v20  ;;  %7473 = vmatprep.subr.bf16.mxu0 %v7957_v15 }
 0xa1e   : > { %2866 = vmatprep.mubr.bf16.mxu1 %v7956_v14  ;;  %2835 = vmatpush1.bf16.msra.mxu1 %v6624_v53 }
 0xa20   : > { %7474 = vmatpush3.bf16.msra.mxu0 %v7603_v24  ;;  %v2086_v24 = vld [vmem:[%s8066_s27 + $0x340] sm:$0xff] }
 0xa21   : > { %7475 = vmatprep.subr.bf16.mxu0 %v7957_v15 }
 0xa24   : > { %7476 = vmatpush3.bf16.msra.mxu0 %v7604_v25  ;;  %v2079_v25 = vld [vmem:[%s8066_s27 + $0x308] sm:$0xff] }
 0xa25   : > { %7477 = vmatprep.subr.bf16.mxu0 %v7957_v15 }
 0xa28   : > { %7478 = vmatpush3.bf16.msra.mxu0 %v7605_v26  ;;  %v6609_v26 = vcombine.high %v2078_v23, %v2086_v24 }
 0xa29   : > { %7479 = vmatprep.subr.bf16.mxu0 %v7957_v15 }
 0xa2a   : > { %2836 = vmatprep.subr.bf16.mxu1 %v6609_v26 }
 0xa2c   : > { %7480 = vmatpush3.bf16.msra.mxu0 %v7606_v27  ;;  %v2087_v27 = vld [vmem:[%s8066_s27 + $0x348] sm:$0xff] }
 0xa2d   : > { %7481 = vmatprep.subr.bf16.mxu0 %v7957_v15  ;;  %v7561_v15 = vunpack.i.l.bf16 %v7560_v39  ;;  %v2046_v39 = vld [vmem:[%s8066_s27 + $0x200] sm:$0xff] }
 0xa2e   : > { %v6577_v46 = vcombine.high %v2046_v39, %v2054_v40 }
 0xa2f   : > { %v1827_v59 = vsel %vm1826_vm6, %v1824_v51, %v7561_v15  ;;  %v2055_v15 = vld [vmem:[%s8066_s27 + $0x248] sm:$0xff] }
 0xa30   : > { %7482 = vmatpush3.bf16.msra.mxu0 %v7607_v28  ;;  %v6610_v28 = vcombine.low %v2079_v25, %v2087_v27  ;;  %v6578_v49 = vcombine.low %v2047_v45, %v2055_v15  ;;  %v6579_v51 = vcombine.high %v2047_v45, %v2055_v15  ;;  %v6511_v15 = vld [vmem:[%s8081_s23 + $0x3] ss:$0 sm:$0xff] }
 0xa31   : > { %2877 = vmatprep.subr.bf16.mxu0 %v6627_v52  ;;  %v1990_v52 = vld [vmem:[%s8066_s27 + $0x40] sm:$0xff] }
 0xad3   : > { %v1746_v58 = vpop.f32.mrf.mxu0 }
 0xad5   : > { %v7459_v29 = vpop.f32.mrf.mxu0 }
 0xad6   : > { %v6611_v29 = vcombine.high %v2079_v25, %v2087_v27  ;;  %v2097_v25 = vld [vmem:[%s8066_s27 + $0x398] sm:$0xff] }
 0xad7   : > { %v1749_v30 = vpop.f32.mrf.mxu0 }
 0xad8   : > { %v2062_v30 = vld [vmem:[%s8066_s27 + $0x280] sm:$0xff] }
 0xad9   : > { %v7460_v31 = vpop.f32.mrf.mxu0 }
 0xada   : > { %v2070_v31 = vld [vmem:[%s8066_s27 + $0x2c0] sm:$0xff] }
 0xadd   : > { %v1794_v32 = vpop.f32.mrf.mxu1 }
 0xade   : > { %v7563_v33 = vpack.i.bf16 %v1794_v32, %v1746_v58  ;;  %v6608_v58 = vcombine.low %v2078_v23, %v2086_v24  ;;  %v2063_v32 = vld [vmem:[%s8066_s27 + $0x288] sm:$0xff]  ;;  %v2096_v23 = vld [vmem:[%s8066_s27 + $0x390] sm:$0xff] }
 0xadf   : > { %v7465_v35 = vpop.f32.mrf.mxu1  ;;  %v2104_v24 = vld [vmem:[%s8066_s27 + $0x3d0] sm:$0xff] }
 0xae0   : > { %7564 = vrot.lane.b32.xlu0 %v7563_v33, %s7959_s4  ;;  %2837 = vmatpush1.bf16.msra.mxu1 %v6608_v58  ;;  %v6593_v33 = vcombine.high %v2062_v30, %v2070_v31  ;;  %v2071_v35 = vld [vmem:[%s8066_s27 + $0x2c8] sm:$0xff]  ;;  %v6628_v26 = vcombine.low %v2096_v23, %v2104_v24  ;;  %v6629_v27 = vcombine.high %v2096_v23, %v2104_v24  ;;  %v2105_v58 = vld [vmem:[%s8066_s27 + $0x3d8] sm:$0xff] }
 0xae1   : > { %v1797_v36 = vpop.f32.mrf.mxu1  ;;  %v6595_v38 = vcombine.high %v2063_v32, %v2071_v35  ;;  %v2025_v23 = vld [vmem:[%s8066_s27 + $0x158] sm:$0xff] }
 0xae2   : > { %v6592_v36 = vcombine.low %v2062_v30, %v2070_v31  ;;  %2838 = vmatprep.subr.bf16.mxu1 %v6593_v33 }
 0xae3   : > { %v7466_v37 = vpop.f32.mrf.mxu1 }
 0xae4   : > { %v6594_v37 = vcombine.low %v2063_v32, %v2071_v35  ;;  %2839 = vmatpush1.bf16.msra.mxu1 %v6592_v36 }
 0xae5   : > { %2840 = vmatprep.subr.bf16.mxu1 %v6577_v46 }
 0xb52   : > { %v7565_v48 = vpop.permute.xlu0 %7564 }
 0xb53   : > { %v7567_v54 = vunpack.i.h.bf16 %v7565_v48  ;;  %v7566_v56 = vunpack.i.l.bf16 %v7565_v48  ;;  %v6576_v48 = vcombine.low %v2046_v39, %v2054_v40  ;;  %v6510_v39 = vld [vmem:[%s8081_s23 + $0x2] ss:$0 sm:$0xff] }
 0xb55   : > { %v1831_v63 = vsel %vm1829_vm7, %v1828_v60, %v7567_v54  ;;  %v1830_v1 = vsel %vm1829_vm7, %v1827_v59, %v7566_v56  ;;  %2841 = vmatpush1.bf16.msra.mxu1 %v6576_v48  ;;  %v2030_v54 = vld [vmem:[%s8066_s27 + $0x180] sm:$0xff]  ;;  %v2031_v59 = vld [vmem:[%s8066_s27 + $0x188] sm:$0xff] }
 0xb56   : > { %v1832_v2 = vpack.c.bf16 %v1831_v63, %v1830_v1  ;;  %v2038_v56 = vld [vmem:[%s8066_s27 + $0x1c0] sm:$0xff]  ;;  %v2039_v63 = vld [vmem:[%s8066_s27 + $0x1c8] sm:$0xff] }
 0xb57   : > { %v6561_v60 = vcombine.high %v2030_v54, %v2038_v56  ;;  %v6560_v1 = vcombine.low %v2030_v54, %v2038_v56  ;;  %v2081_v54 = vld [vmem:[%s8066_s27 + $0x318] sm:$0xff] }
 0xb58   : > { %7484 = vmatmul.mubr.bf16.vlgmr.msra.gmra.mxu0 %v1832_v2  ;;  %v6562_v2 = vcombine.low %v2031_v59, %v2039_v63  ;;  %v2089_v56 = vld [vmem:[%s8066_s27 + $0x358] sm:$0xff] }
 0xb59   : > { %2909 = vmatprep.mubr.bf16.mxu0 %v7956_v14  ;;  %2878 = vmatpush1.bf16.msra.mxu0 %v6626_v17  ;;  %v1982_v17 = vld [vmem:[%s8066_s27] sm:$0xff] }
 0xb5a   : > { %2879 = vmatprep.subr.bf16.mxu0 %v6611_v29  ;;  %2842 = vmatprep.subr.bf16.mxu1 %v6561_v60  ;;  %v6631_v29 = vcombine.high %v2097_v25, %v2105_v58 }
 0xb5b   : > { %2843 = vmatpush1.bf16.msra.mxu1 %v6560_v1  ;;  %v6615_v1 = vcombine.high %v2081_v54, %v2089_v56 }
 0xb5d   : > { %2880 = vmatpush1.bf16.msra.mxu0 %v6610_v28  ;;  %v6630_v28 = vcombine.low %v2097_v25, %v2105_v58  ;;  %v2000_v58 = vld [vmem:[%s8066_s27 + $0x90] sm:$0xff] }
 0xb5e   : > { %2881 = vmatprep.subr.bf16.mxu0 %v6595_v38 }
 0xb61   : > { %2882 = vmatpush1.bf16.msra.mxu0 %v6594_v37 }
 0xb62   : > { %2883 = vmatprep.subr.bf16.mxu0 %v6579_v51  ;;  %v2088_v51 = vld [vmem:[%s8066_s27 + $0x350] sm:$0xff] }
 0xb65   : > { %2884 = vmatpush1.bf16.msra.mxu0 %v6578_v49  ;;  %v2080_v49 = vld [vmem:[%s8066_s27 + $0x310] sm:$0xff] }
 0xc18   : > { %v1936_v5 = vpop.f32.mrf.mxu0 }
 0xc19   : > { %v1937_v6 = vadd.f32 %v6501_v4, %v1936_v5  ;;  %v2014_v5 = vld [vmem:[%s8066_s27 + $0x100] sm:$0xff] }
 0xc1a   : > { %v7485_v0 = vpop.f32.mrf.mxu0 }
 0xc1b   : > { %v1943_v50 = vadd.f32 %v7776_v7, %v1937_v6  ;;  %v2022_v6 = vld [vmem:[%s8066_s27 + $0x140] sm:$0xff]  ;;  %v2015_v0 = vld [vmem:[%s8066_s27 + $0x108] sm:$0xff] }
 0xc1c   : > { %v1939_v8 = vpop.f32.mrf.mxu0  ;;  %v6545_v7 = vcombine.high %v2014_v5, %v2022_v6 }
 0xc1d   : > { %v1940_v9 = vadd.f32 %v6501_v4, %v1939_v8  ;;  %1947 = vadd.xlane.f32.xlu1 %v1943_v50  ;;  %v6563_v4 = vcombine.high %v2031_v59, %v2039_v63  ;;  %v6544_v8 = vcombine.low %v2014_v5, %v2022_v6  ;;  %v6613_v63 = vcombine.high %v2080_v49, %v2088_v51  ;;  %v2073_v5 = vld [vmem:[%s8066_s27 + $0x2d8] sm:$0xff] }
 0xc1e   : > { %v7486_v10 = vpop.f32.mrf.mxu0  ;;  %2844 = vmatprep.subr.bf16.mxu1 %v6545_v7  ;;  %v6612_v6 = vcombine.low %v2080_v49, %v2088_v51  ;;  %v2106_v49 = vld [vmem:[%s8066_s27 + $0x3e0] sm:$0xff]  ;;  %v2099_v51 = vld [vmem:[%s8066_s27 + $0x3a8] sm:$0xff] }
 0xc1f   : > { %v1944_v12 = vadd.f32 %v7777_v11, %v1940_v9  ;;  %2885 = vmatprep.subr.bf16.mxu0 %v6563_v4  ;;  %2845 = vmatpush1.bf16.msra.mxu1 %v6544_v8  ;;  %v1998_v11 = vld [vmem:[%s8066_s27 + $0x80] sm:$0xff]  ;;  %v2065_v4 = vld [vmem:[%s8066_s27 + $0x298] sm:$0xff]  ;;  %v2048_v8 = vld [vmem:[%s8066_s27 + $0x210] sm:$0xff] }
 0xc20   : > { %2886 = vmatpush1.bf16.msra.mxu0 %v6562_v2  ;;  %v2064_v2 = vld [vmem:[%s8066_s27 + $0x290] sm:$0xff]  ;;  %v6598_v34 = vcombine.low %v2065_v4, %v2073_v5 }
 0xc21   : > { %1949 = vadd.xlane.f32.xlu0 %v1944_v12 }
 0xca6   : > { %v1948_v57 = vpop.xlane.xlu1 %1947 }
 0xca7   : > { %v1951_v18 = vmul.f32 0.0078125, %v1948_v57  ;;  %v1983_v57 = vld [vmem:[%s8066_s27 + $0x8] sm:$0xff] }
 0xca9   : > { %v8350_v61 = vsub.f32 %v1943_v50, %v1951_v18  ;;  %v2023_v50 = vld [vmem:[%s8066_s27 + $0x148] sm:$0xff]  ;;  %v6513_v18 = vcombine.high %v1982_v17, %v1990_v52 }
 0xcaa   : > { %v1950_v3 = vpop.xlane.xlu0 %1949  ;;  %v6546_v9 = vcombine.low %v2015_v0, %v2023_v50  ;;  %v6547_v10 = vcombine.high %v2015_v0, %v2023_v50  ;;  %v6614_v0 = vcombine.low %v2081_v54, %v2089_v56  ;;  %v6599_v50 = vcombine.high %v2065_v4, %v2073_v5  ;;  %v2107_v54 = vld [vmem:[%s8066_s27 + $0x3e8] sm:$0xff]  ;;  %v2090_v4 = vld [vmem:[%s8066_s27 + $0x360] sm:$0xff] }
 0xcab   : > { %v1952_v19 = vmul.f32 0.0078125, %v1950_v3  ;;  %v1955_v20 = vmul.f32 %v8350_v61, %v8350_v61  ;;  %v1991_v3 = vld [vmem:[%s8066_s27 + $0x48] sm:$0xff] }
 0xcac   : > { %2887 = vmatprep.subr.bf16.mxu0 %v6547_v10  ;;  %v2049_v10 = vld [vmem:[%s8066_s27 + $0x218] sm:$0xff]  ;;  %v2083_v5 = vld [vmem:[%s8066_s27 + $0x328] sm:$0xff] }
 0xcad   : > { %v8354_v21 = vsub.f32 %v1944_v12, %v1952_v19  ;;  %1957 = vadd.xlane.f32.xlu0 %v1955_v20  ;;  %v2006_v12 = vld [vmem:[%s8066_s27 + $0xc0] sm:$0xff]  ;;  %2888 = vmatpush1.bf16.msra.mxu0 %v6546_v9  ;;  %v6512_v19 = vcombine.low %v1982_v17, %v1990_v52  ;;  %v6514_v20 = vcombine.low %v1983_v57, %v1991_v3  ;;  %v2056_v9 = vld [vmem:[%s8066_s27 + $0x250] sm:$0xff]  ;;  %v2041_v17 = vld [vmem:[%s8066_s27 + $0x1d8] sm:$0xff] }
 0xcae   : > { %v6529_v13 = vcombine.high %v1998_v11, %v2006_v12  ;;  %v6528_v53 = vcombine.low %v1998_v11, %v2006_v12  ;;  %2889 = vmatprep.subr.bf16.mxu0 %v6531_v16  ;;  %v2057_v11 = vld [vmem:[%s8066_s27 + $0x258] sm:$0xff]  ;;  %v6580_v52 = vcombine.low %v2048_v8, %v2056_v9 }
 0xcaf   : > { %v1956_v22 = vmul.f32 %v8354_v21, %v8354_v21  ;;  %v6583_v44 = vcombine.high %v2049_v10, %v2057_v11  ;;  %v2033_v16 = vld [vmem:[%s8066_s27 + $0x198] sm:$0xff] }
 0xcb0   : > { %2846 = vmatprep.subr.bf16.mxu1 %v6529_v13  ;;  %v6581_v13 = vcombine.high %v2048_v8, %v2056_v9  ;;  %v6566_v25 = vcombine.low %v2033_v16, %v2041_v17  ;;  %v2066_v9 = vld [vmem:[%s8066_s27 + $0x2a0] sm:$0xff] }
 0xcb1   : > { %1959 = vadd.xlane.f32.xlu0 %v1956_v22  ;;  %2847 = vmatpush1.bf16.msra.mxu1 %v6528_v53  ;;  %v6515_v22 = vcombine.high %v1983_v57, %v1991_v3  ;;  %v2032_v53 = vld [vmem:[%s8066_s27 + $0x190] sm:$0xff]  ;;  %v6582_v57 = vcombine.low %v2049_v10, %v2057_v11  ;;  %v6567_v3 = vcombine.high %v2033_v16, %v2041_v17  ;;  %v2074_v10 = vld [vmem:[%s8066_s27 + $0x2e0] sm:$0xff]  ;;  %v2067_v11 = vld [vmem:[%s8066_s27 + $0x2a8] sm:$0xff] }
 0xcb2   : > { %2890 = vmatpush1.bf16.msra.mxu0 %v6530_v55  ;;  %2848 = vmatprep.subr.bf16.mxu1 %v6513_v18  ;;  %v2040_v55 = vld [vmem:[%s8066_s27 + $0x1d0] sm:$0xff]  ;;  %v2058_v16 = vld [vmem:[%s8066_s27 + $0x260] sm:$0xff]  ;;  %v2051_v17 = vld [vmem:[%s8066_s27 + $0x228] sm:$0xff] }
 0xcb3   : > { %2891 = vmatprep.subr.bf16.mxu0 %v6515_v22  ;;  %v6565_v18 = vcombine.high %v2032_v53, %v2040_v55  ;;  %v2017_v22 = vld [vmem:[%s8066_s27 + $0x118] sm:$0xff]  ;;  %v6564_v24 = vcombine.low %v2032_v53, %v2040_v55  ;;  %v2050_v55 = vld [vmem:[%s8066_s27 + $0x220] sm:$0xff] }
 0xcb5   : > { %2849 = vmatpush1.bf16.msra.mxu1 %v6512_v19  ;;  %v2016_v19 = vld [vmem:[%s8066_s27 + $0x110] sm:$0xff] }
 0xcb6   : > { %2892 = vmatpush1.bf16.msra.mxu0 %v6514_v20  ;;  %2920 = vmatprep.subr.bf16.mxu1 %v6629_v27  ;;  %v2024_v20 = vld [vmem:[%s8066_s27 + $0x150] sm:$0xff]  ;;  %v6551_v27 = vcombine.high %v2017_v22, %v2025_v23 }
 0xcb7   : > { %2963 = vmatprep.subr.bf16.mxu0 %v6631_v29  ;;  %v2001_v29 = vld [vmem:[%s8066_s27 + $0x98] sm:$0xff] }
 0xd36   : > { %v1958_v30 = vpop.xlane.xlu0 %1957 }
 0xd37   : > { %v1961_v31 = vmul.f32 0.0078125, %v1958_v30  ;;  %v2009_v30 = vld [vmem:[%s8066_s27 + $0xd8] sm:$0xff] }
 0xd39   : > { %v1963_v32 = vadd.f32 1e-05, %v1961_v31  ;;  %v6548_v31 = vcombine.low %v2016_v19, %v2024_v20 }
 0xd3a   : > { %v1960_v33 = vpop.xlane.xlu0 %1959 }
 0xd3b   : > { %7768 = vrsqrt.f32 %v1963_v32  ;;  %v1962_v35 = vmul.f32 0.0078125, %v1960_v33  ;;  %v6550_v32 = vcombine.low %v2017_v22, %v2025_v23  ;;  %v2042_v22 = vld [vmem:[%s8066_s27 + $0x1e0] sm:$0xff]  ;;  %v2035_v23 = vld [vmem:[%s8066_s27 + $0x1a8] sm:$0xff] }
 0xd3d   : > { %v1964_v36 = vadd.f32 1e-05, %v1962_v35  ;;  %v6535_v35 = vcombine.high %v2001_v29, %v2009_v30 }
 0xd3f   : > { %7770 = vrsqrt.f32 %v1964_v36  ;;  %v1984_v36 = vld [vmem:[%s8066_s27 + $0x10] sm:$0xff] }
 0xd48   : > { %v7769_v37 = vpop.eup %7768 }
 0xd49   : > { %v1967_v38 = vmul.f32 %v7769_v37, %v8350_v61  ;;  %v1992_v37 = vld [vmem:[%s8066_s27 + $0x50] sm:$0xff] }
 0xd4a   : > { %v6516_v56 = vcombine.low %v1984_v36, %v1992_v37 }
 0xd4b   : > { %v1973_v45 = vmul.f32 %v6510_v39, %v1967_v38  ;;  %v1985_v38 = vld [vmem:[%s8066_s27 + $0x18] sm:$0xff] }
 0xd4c   : > { %v7771_v40 = vpop.eup %7770 }
 0xd4d   : > { %v1968_v46 = vmul.f32 %v7771_v40, %v8354_v21  ;;  %v8398_v59 = vadd.f32 %v6511_v15, %v1973_v45  ;;  %v2072_v21 = vld [vmem:[%s8066_s27 + $0x2d0] sm:$0xff]  ;;  %v6534_v45 = vcombine.low %v2001_v29, %v2009_v30  ;;  %v2026_v29 = vld [vmem:[%s8066_s27 + $0x160] sm:$0xff]  ;;  %v2019_v30 = vld [vmem:[%s8066_s27 + $0x128] sm:$0xff] }
 0xd4e   : > { %v6597_v7 = vcombine.high %v2064_v2, %v2072_v21  ;;  %v6596_v12 = vcombine.low %v2064_v2, %v2072_v21  ;;  %v6635_v2 = vcombine.high %v2099_v51, %v2107_v54  ;;  %v2082_v21 = vld [vmem:[%s8066_s27 + $0x320] sm:$0xff] }
 0xd4f   : > { %v1974_v48 = vmul.f32 %v6510_v39, %v1968_v46  ;;  %v1993_v39 = vld [vmem:[%s8066_s27 + $0x58] sm:$0xff]  ;;  %v6517_v46 = vcombine.high %v1984_v36, %v1992_v37  ;;  %v2002_v37 = vld [vmem:[%s8066_s27 + $0xa0] sm:$0xff] }
 0xd51   : > { %v8400_v60 = vadd.f32 %v6511_v15, %v1974_v48  ;;  %v6519_v15 = vcombine.high %v1985_v38, %v1993_v39  ;;  %v2098_v48 = vld [vmem:[%s8066_s27 + $0x3a0] sm:$0xff] }
 0xd53   : > { %v8404_v61 = vpack.c.bf16 %v8400_v60, %v8398_v59 }
 0xd55   : > { %2867 = vmatmul.mubr.bf16.vlgmr.msra.gmra.mxu1 %v8404_v61  ;;  %2910 = vmatmul.mubr.bf16.vlgmr.msra.gmra.mxu0 %v8404_v61 }
 0xd56   : > { %2921 = vmatpush1.bf16.msra.mxu1 %v6628_v26  ;;  %2964 = vmatpush1.bf16.msra.mxu0 %v6630_v28  ;;  %v6549_v26 = vcombine.high %v2016_v19, %v2024_v20  ;;  %v2008_v28 = vld [vmem:[%s8066_s27 + $0xd0] sm:$0xff]  ;;  %v2034_v20 = vld [vmem:[%s8066_s27 + $0x1a0] sm:$0xff] }
 0xd57   : > { %2922 = vmatprep.subr.bf16.mxu1 %v6613_v63  ;;  %2965 = vmatprep.subr.bf16.mxu0 %v6615_v1  ;;  %v6533_v33 = vcombine.high %v2000_v58, %v2008_v28  ;;  %v6532_v40 = vcombine.low %v2000_v58, %v2008_v28  ;;  %v6518_v63 = vcombine.low %v1985_v38, %v1993_v39  ;;  %v2018_v28 = vld [vmem:[%s8066_s27 + $0x120] sm:$0xff]  ;;  %v2003_v39 = vld [vmem:[%s8066_s27 + $0xa8] sm:$0xff] }
 0xd58   : > { %2952 = vmatprep.mubr.bf16.mxu1 %v7956_v14  ;;  %2995 = vmatprep.mubr.bf16.mxu0 %v7956_v14  ;;  %v6633_v1 = vcombine.high %v2098_v48, %v2106_v49  ;;  %v2010_v38 = vld [vmem:[%s8066_s27 + $0xe0] sm:$0xff] }
 0xd5a   : > { %2923 = vmatpush1.bf16.msra.mxu1 %v6612_v6  ;;  %2966 = vmatpush1.bf16.msra.mxu0 %v6614_v0  ;;  %v2091_v6 = vld [vmem:[%s8066_s27 + $0x368] sm:$0xff]  ;;  %v6632_v0 = vcombine.low %v2098_v48, %v2106_v49  ;;  %v1986_v49 = vld [vmem:[%s8066_s27 + $0x20] sm:$0xff] }
 0xd5b   : > { %2924 = vmatprep.subr.bf16.mxu1 %v6597_v7  ;;  %2967 = vmatprep.subr.bf16.mxu0 %v6599_v50  ;;  %v6634_v7 = vcombine.low %v2099_v51, %v2107_v54  ;;  %v6617_v50 = vcombine.high %v2082_v21, %v2090_v4  ;;  %v6619_v8 = vcombine.high %v2083_v5, %v2091_v6  ;;  %v1994_v51 = vld [vmem:[%s8066_s27 + $0x60] sm:$0xff]  ;;  %v1987_v54 = vld [vmem:[%s8066_s27 + $0x28] sm:$0xff] }
 0xd5e   : > { %2925 = vmatpush1.bf16.msra.mxu1 %v6596_v12  ;;  %2968 = vmatpush1.bf16.msra.mxu0 %v6598_v34  ;;  %v2075_v12 = vld [vmem:[%s8066_s27 + $0x2e8] sm:$0xff]  ;;  %v6616_v34 = vcombine.low %v2082_v21, %v2090_v4  ;;  %v2100_v4 = vld [vmem:[%s8066_s27 + $0x3b0] sm:$0xff] }
 0xd5f   : > { %2926 = vmatprep.subr.bf16.mxu1 %v6581_v13  ;;  %2969 = vmatprep.subr.bf16.mxu0 %v6583_v44  ;;  %v6618_v13 = vcombine.low %v2083_v5, %v2091_v6  ;;  %v6601_v44 = vcombine.high %v2066_v9, %v2074_v10  ;;  %v6603_v53 = vcombine.high %v2067_v11, %v2075_v12  ;;  %v2108_v5 = vld [vmem:[%s8066_s27 + $0x3f0] sm:$0xff]  ;;  %v2101_v6 = vld [vmem:[%s8066_s27 + $0x3b8] sm:$0xff] }
 0xd62   : > { %2927 = vmatpush1.bf16.msra.mxu1 %v6580_v52  ;;  %2970 = vmatpush1.bf16.msra.mxu0 %v6582_v57  ;;  %v2059_v52 = vld [vmem:[%s8066_s27 + $0x268] sm:$0xff]  ;;  %v6600_v57 = vcombine.low %v2066_v9, %v2074_v10  ;;  %v2084_v10 = vld [vmem:[%s8066_s27 + $0x330] sm:$0xff] }
 0xd63   : > { %2928 = vmatprep.subr.bf16.mxu1 %v6565_v18  ;;  %2971 = vmatprep.subr.bf16.mxu0 %v6567_v3  ;;  %v6602_v18 = vcombine.low %v2067_v11, %v2075_v12  ;;  %v6585_v3 = vcombine.high %v2050_v55, %v2058_v16  ;;  %v6587_v19 = vcombine.high %v2051_v17, %v2059_v52  ;;  %v2092_v11 = vld [vmem:[%s8066_s27 + $0x370] sm:$0xff]  ;;  %v2085_v12 = vld [vmem:[%s8066_s27 + $0x338] sm:$0xff] }
 0xd66   : > { %2929 = vmatpush1.bf16.msra.mxu1 %v6564_v24  ;;  %2972 = vmatpush1.bf16.msra.mxu0 %v6566_v25  ;;  %v2043_v24 = vld [vmem:[%s8066_s27 + $0x1e8] sm:$0xff]  ;;  %v6584_v25 = vcombine.low %v2050_v55, %v2058_v16  ;;  %v2068_v16 = vld [vmem:[%s8066_s27 + $0x2b0] sm:$0xff] }
 0xd67   : > { %2930 = vmatprep.subr.bf16.mxu1 %v6549_v26  ;;  %2973 = vmatprep.subr.bf16.mxu0 %v6551_v27  ;;  %v6586_v26 = vcombine.low %v2051_v17, %v2059_v52  ;;  %v6569_v27 = vcombine.high %v2034_v20, %v2042_v22  ;;  %v6571_v58 = vcombine.high %v2035_v23, %v2043_v24  ;;  %v2076_v17 = vld [vmem:[%s8066_s27 + $0x2f0] sm:$0xff]  ;;  %v2069_v52 = vld [vmem:[%s8066_s27 + $0x2b8] sm:$0xff] }
 0xd6a   : > { %2931 = vmatpush1.bf16.msra.mxu1 %v6548_v31  ;;  %2974 = vmatpush1.bf16.msra.mxu0 %v6550_v32  ;;  %v2027_v31 = vld [vmem:[%s8066_s27 + $0x168] sm:$0xff]  ;;  %v6568_v32 = vcombine.low %v2034_v20, %v2042_v22  ;;  %v2052_v22 = vld [vmem:[%s8066_s27 + $0x230] sm:$0xff] }
 0xd6b   : > { %2932 = vmatprep.subr.bf16.mxu1 %v6533_v33  ;;  %2975 = vmatprep.subr.bf16.mxu0 %v6535_v35  ;;  %v6570_v33 = vcombine.low %v2035_v23, %v2043_v24  ;;  %v6553_v35 = vcombine.high %v2018_v28, %v2026_v29  ;;  %v6555_v36 = vcombine.high %v2019_v30, %v2027_v31  ;;  %v2060_v23 = vld [vmem:[%s8066_s27 + $0x270] sm:$0xff]  ;;  %v2053_v24 = vld [vmem:[%s8066_s27 + $0x238] sm:$0xff] }
 0xd6e   : > { %2933 = vmatpush1.bf16.msra.mxu1 %v6532_v40  ;;  %2976 = vmatpush1.bf16.msra.mxu0 %v6534_v45  ;;  %v2011_v40 = vld [vmem:[%s8066_s27 + $0xe8] sm:$0xff]  ;;  %v6552_v45 = vcombine.low %v2018_v28, %v2026_v29  ;;  %v2036_v29 = vld [vmem:[%s8066_s27 + $0x1b0] sm:$0xff] }
 0xd6f   : > { %2934 = vmatprep.subr.bf16.mxu1 %v6517_v46  ;;  %2977 = vmatprep.subr.bf16.mxu0 %v6519_v15  ;;  %v6554_v46 = vcombine.low %v2019_v30, %v2027_v31  ;;  %v6537_v15 = vcombine.high %v2002_v37, %v2010_v38  ;;  %v6539_v48 = vcombine.high %v2003_v39, %v2011_v40  ;;  %v2044_v30 = vld [vmem:[%s8066_s27 + $0x1f0] sm:$0xff]  ;;  %v2037_v31 = vld [vmem:[%s8066_s27 + $0x1b8] sm:$0xff] }
 0xd72   : > { %2935 = vmatpush1.bf16.msra.mxu1 %v6516_v56  ;;  %2978 = vmatpush1.bf16.msra.mxu0 %v6518_v63  ;;  %v1995_v56 = vld [vmem:[%s8066_s27 + $0x68] sm:$0xff]  ;;  %v6536_v63 = vcombine.low %v2002_v37, %v2010_v38  ;;  %v2020_v37 = vld [vmem:[%s8066_s27 + $0x130] sm:$0xff] }
 0xd73   : > { %3006 = vmatprep.subr.bf16.mxu1 %v6633_v1  ;;  %3049 = vmatprep.subr.bf16.mxu0 %v6635_v2  ;;  %v6538_v1 = vcombine.low %v2003_v39, %v2011_v40  ;;  %v6521_v2 = vcombine.high %v1986_v49, %v1994_v51  ;;  %v6523_v21 = vcombine.high %v1987_v54, %v1995_v56  ;;  %v2028_v38 = vld [vmem:[%s8066_s27 + $0x170] sm:$0xff]  ;;  %v2021_v39 = vld [vmem:[%s8066_s27 + $0x138] sm:$0xff] }
 0xd74   : > { %v2029_v40 = vld [vmem:[%s8066_s27 + $0x178] sm:$0xff] }
 0xd75   : > { %2953 = vmatmul.mubr.bf16.vlgmr.msra.gmra.mxu1 %v8404_v61  ;;  %2996 = vmatmul.mubr.bf16.vlgmr.msra.gmra.mxu0 %v8404_v61 }
 0xd76   : > { %3007 = vmatpush1.bf16.msra.mxu1 %v6632_v0  ;;  %3050 = vmatpush1.bf16.msra.mxu0 %v6634_v7  ;;  %v2109_v0 = vld [vmem:[%s8066_s27 + $0x3f8] sm:$0xff]  ;;  %v6520_v7 = vcombine.low %v1986_v49, %v1994_v51  ;;  %v2004_v49 = vld [vmem:[%s8066_s27 + $0xb0] sm:$0xff] }
 0xd77   : > { %3008 = vmatprep.subr.bf16.mxu1 %v6617_v50  ;;  %3051 = vmatprep.subr.bf16.mxu0 %v6619_v8  ;;  %v6522_v50 = vcombine.low %v1987_v54, %v1995_v56  ;;  %v6637_v8 = vcombine.high %v2100_v4, %v2108_v5  ;;  %v6639_v9 = vcombine.high %v2101_v6, %v2109_v0  ;;  %v2012_v51 = vld [vmem:[%s8066_s27 + $0xf0] sm:$0xff]  ;;  %v2005_v54 = vld [vmem:[%s8066_s27 + $0xb8] sm:$0xff] }
 0xd78   : > { %3038 = vmatprep.mubr.bf16.mxu1 %v7956_v14  ;;  %3081 = vmatprep.mubr.bf16.mxu0 %v7956_v14  ;;  %v2013_v56 = vld [vmem:[%s8066_s27 + $0xf8] sm:$0xff] }
 0xd7a   : > { %3009 = vmatpush1.bf16.msra.mxu1 %v6616_v34  ;;  %3052 = vmatpush1.bf16.msra.mxu0 %v6618_v13  ;;  %v2093_v34 = vld [vmem:[%s8066_s27 + $0x378] sm:$0xff]  ;;  %v6636_v13 = vcombine.low %v2100_v4, %v2108_v5  ;;  %v1988_v4 = vld [vmem:[%s8066_s27 + $0x30] sm:$0xff] }
 0xd7b   : > { %3010 = vmatprep.subr.bf16.mxu1 %v6601_v44  ;;  %3053 = vmatprep.subr.bf16.mxu0 %v6603_v53  ;;  %v6638_v44 = vcombine.low %v2101_v6, %v2109_v0  ;;  %v6621_v53 = vcombine.high %v2084_v10, %v2092_v11  ;;  %v6623_v55 = vcombine.high %v2085_v12, %v2093_v34  ;;  %v1996_v5 = vld [vmem:[%s8066_s27 + $0x70] sm:$0xff]  ;;  %v1989_v6 = vld [vmem:[%s8066_s27 + $0x38] sm:$0xff] }
 0xd7c   : > { %v1997_v0 = vld [vmem:[%s8066_s27 + $0x78] sm:$0xff] }
 0xd7e   : > { %3011 = vmatpush1.bf16.msra.mxu1 %v6600_v57  ;;  %3054 = vmatpush1.bf16.msra.mxu0 %v6602_v18  ;;  %v2077_v57 = vld [vmem:[%s8066_s27 + $0x2f8] sm:$0xff]  ;;  %v6620_v18 = vcombine.low %v2084_v10, %v2092_v11  ;;  %v6524_v10 = vcombine.low %v1988_v4, %v1996_v5  ;;  %v6526_v11 = vcombine.low %v1989_v6, %v1997_v0 }
 0xd7f   : > { %3012 = vmatprep.subr.bf16.mxu1 %v6585_v3  ;;  %3055 = vmatprep.subr.bf16.mxu0 %v6587_v19  ;;  %v6622_v3 = vcombine.low %v2085_v12, %v2093_v34  ;;  %v6605_v19 = vcombine.high %v2068_v16, %v2076_v17  ;;  %v6607_v20 = vcombine.high %v2069_v52, %v2077_v57  ;;  %v7608_v12 = vld [vmem:[%s8071_s14 + $0x78] sm:$0xff]  }
 0xd80   : > { %v7609_v34 = vld [vmem:[%s8071_s14 + $0xf8] sm:$0xff]  }
 0xd82   : > { %3013 = vmatpush1.bf16.msra.mxu1 %v6584_v25  ;;  %3056 = vmatpush1.bf16.msra.mxu0 %v6586_v26  ;;  %v2061_v25 = vld [vmem:[%s8066_s27 + $0x278] sm:$0xff]  ;;  %v6604_v26 = vcombine.low %v2068_v16, %v2076_v17  ;;  %v7614_v16 = vld [vmem:[%s8071_s14 + $0x30] sm:$0xff]  }
 0xd83   : > { %3014 = vmatprep.subr.bf16.mxu1 %v6569_v27  ;;  %3057 = vmatprep.subr.bf16.mxu0 %v6571_v58  ;;  %v6606_v27 = vcombine.low %v2069_v52, %v2077_v57  ;;  %v6589_v58 = vcombine.high %v2052_v22, %v2060_v23  ;;  %v6591_v28 = vcombine.high %v2053_v24, %v2061_v25  ;;  %v7615_v17 = vld [vmem:[%s8071_s14 + $0xb0] sm:$0xff]   ;;  %v7616_v52 = vld [vmem:[%s8071_s14 + $0x68] sm:$0xff]  }
 0xd84   : > { %v7617_v57 = vld [vmem:[%s8071_s14 + $0xe8] sm:$0xff]  }
 0xd86   : > { %3015 = vmatpush1.bf16.msra.mxu1 %v6568_v32  ;;  %3058 = vmatpush1.bf16.msra.mxu0 %v6570_v33  ;;  %v2045_v32 = vld [vmem:[%s8066_s27 + $0x1f8] sm:$0xff]  ;;  %v6588_v33 = vcombine.low %v2052_v22, %v2060_v23  ;;  %v7623_v22 = vld [vmem:[%s8071_s14 + $0xa0] sm:$0xff]  }
 0xd87   : > { %3016 = vmatprep.subr.bf16.mxu1 %v6553_v35  ;;  %3059 = vmatprep.subr.bf16.mxu0 %v6555_v36  ;;  %v6573_v35 = vcombine.high %v2036_v29, %v2044_v30  ;;  %v6575_v36 = vcombine.high %v2037_v31, %v2045_v32  ;;  %v7624_v23 = vld [vmem:[%s8071_s14 + $0x58] sm:$0xff]  }
 0xd8a   : > { %3017 = vmatpush1.bf16.msra.mxu1 %v6552_v45  ;;  %3060 = vmatpush1.bf16.msra.mxu0 %v6554_v46  ;;  %v6572_v45 = vcombine.low %v2036_v29, %v2044_v30  ;;  %v6574_v46 = vcombine.low %v2037_v31, %v2045_v32  ;;  %v7631_v29 = vld [vmem:[%s8071_s14 + $0x90] sm:$0xff]   ;;  %v7632_v30 = vld [vmem:[%s8071_s14 + $0x48] sm:$0xff]  }
 0xd8b   : > { %3018 = vmatprep.subr.bf16.mxu1 %v6537_v15  ;;  %3061 = vmatprep.subr.bf16.mxu0 %v6539_v48  ;;  %v6557_v15 = vcombine.high %v2020_v37, %v2028_v38  ;;  %v6559_v48 = vcombine.high %v2021_v39, %v2029_v40  ;;  %v7633_v31 = vld [vmem:[%s8071_s14 + $0xc8] sm:$0xff]  }
 0xd8c   : > { %v7634_v32 = vld [vmem:[%s8071_s14 + $0x8] sm:$0xff]  }
 0xd8e   : > { %3019 = vmatpush1.bf16.msra.mxu1 %v6536_v63  ;;  %3062 = vmatpush1.bf16.msra.mxu0 %v6538_v1  ;;  %v6556_v63 = vcombine.low %v2020_v37, %v2028_v38  ;;  %v6558_v1 = vcombine.low %v2021_v39, %v2029_v40  ;;  %v7639_v37 = vld [vmem:[%s8071_s14 + $0x80] sm:$0xff]   ;;  %v7640_v38 = vld [vmem:[%s8071_s14 + $0x178] sm:$0xff]   ;;  %v2128_v40 = vsub.s32 3, %v8146_v42 }
 0xd8f   : > { %3020 = vmatprep.subr.bf16.mxu1 %v6521_v2  ;;  %3063 = vmatprep.subr.bf16.mxu0 %v6523_v21  ;;  %v6541_v2 = vcombine.high %v2004_v49, %v2012_v51  ;;  %v6543_v21 = vcombine.high %v2005_v54, %v2013_v56  ;;  %v7641_v39 = vld [vmem:[%s8071_s14 + $0x1f8] sm:$0xff]  }
 0xd92   : > { %3021 = vmatpush1.bf16.msra.mxu1 %v6520_v7  ;;  %3064 = vmatpush1.bf16.msra.mxu0 %v6522_v50  ;;  %v6540_v7 = vcombine.low %v2004_v49, %v2012_v51  ;;  %v6542_v50 = vcombine.low %v2005_v54, %v2013_v56 }
 0xd93   : > { %3092 = vmatprep.subr.bf16.mxu1 %v6637_v8  ;;  %3135 = vmatprep.subr.bf16.mxu0 %v6639_v9  ;;  %v6525_v8 = vcombine.high %v1988_v4, %v1996_v5  ;;  %v6527_v9 = vcombine.high %v1989_v6, %v1997_v0 }
 0xd95   : > { %3039 = vmatmul.mubr.bf16.vlgmr.msra.gmra.mxu1 %v8404_v61  ;;  %3082 = vmatmul.mubr.bf16.vlgmr.msra.gmra.mxu0 %v8404_v61 }
 0xd96   : > { %3093 = vmatpush1.bf16.msra.mxu1 %v6636_v13  ;;  %3136 = vmatpush1.bf16.msra.mxu0 %v6638_v44  ;;  %v7610_v13 = vld [vmem:[%s8071_s14 + $0x38] sm:$0xff]  }
 0xd97   : > { %3094 = vmatprep.subr.bf16.mxu1 %v6621_v53  ;;  %3137 = vmatprep.subr.bf16.mxu0 %v6623_v55  ;;  %v7611_v44 = vld [vmem:[%s8071_s14 + $0xb8] sm:$0xff]   ;;  %v7612_v53 = vld [vmem:[%s8071_s14 + $0x70] sm:$0xff]  }
 0xd98   : > { %3124 = vmatprep.mubr.bf16.mxu1 %v7956_v14  ;;  %3167 = vmatprep.mubr.bf16.mxu0 %v7956_v14  ;;  %v6590_v14 = vcombine.low %v2053_v24, %v2061_v25  ;;  %v7613_v55 = vld [vmem:[%s8071_s14 + $0xf0] sm:$0xff]   ;;  %v7625_v24 = vld [vmem:[%s8071_s14 + $0xd8] sm:$0xff]  }
 0xd99   : > { %v7626_v25 = vld [vmem:[%s8071_s14 + $0x18] sm:$0xff]  }
 0xd9a   : > { %3095 = vmatpush1.bf16.msra.mxu1 %v6620_v18  ;;  %3138 = vmatpush1.bf16.msra.mxu0 %v6622_v3  ;;  %v7618_v18 = vld [vmem:[%s8071_s14 + $0x28] sm:$0xff]  }
 0xd9b   : > { %3096 = vmatprep.subr.bf16.mxu1 %v6605_v19  ;;  %3139 = vmatprep.subr.bf16.mxu0 %v6607_v20  ;;  %v7619_v3 = vld [vmem:[%s8071_s14 + $0xa8] sm:$0xff]   ;;  %v7621_v19 = vld [vmem:[%s8071_s14 + $0xe0] sm:$0xff]  }
 0xd9c   : > { %v7622_v20 = vld [vmem:[%s8071_s14 + $0x20] sm:$0xff]  }
 0xd9e   : > { %3097 = vmatpush1.bf16.msra.mxu1 %v6604_v26  ;;  %3140 = vmatpush1.bf16.msra.mxu0 %v6606_v27  ;;  %v7627_v26 = vld [vmem:[%s8071_s14 + $0x98] sm:$0xff]   ;;  %v7628_v27 = vld [vmem:[%s8071_s14 + $0x50] sm:$0xff]  }
 0xd9f   : > { %3098 = vmatprep.subr.bf16.mxu1 %v6589_v58  ;;  %3141 = vmatprep.subr.bf16.mxu0 %v6591_v28  ;;  %v7629_v58 = vld [vmem:[%s8071_s14 + $0xd0] sm:$0xff]  }
 0xda0   : > { %v7630_v28 = vld [vmem:[%s8071_s14 + $0x10] sm:$0xff]  }
 0xda2   : > { %3099 = vmatpush1.bf16.msra.mxu1 %v6588_v33  ;;  %3142 = vmatpush1.bf16.msra.mxu0 %v6590_v14  ;;  %v7635_v33 = vld [vmem:[%s8071_s14 + $0x88] sm:$0xff]   ;;  %v7636_v14 = vld [vmem:[%s8071_s14 + $0x40] sm:$0xff]  }
 0xda3   : > { %3100 = vmatprep.subr.bf16.mxu1 %v6573_v35  ;;  %3143 = vmatprep.subr.bf16.mxu0 %v6575_v36  ;;  %v7637_v35 = vld [vmem:[%s8071_s14 + $0xc0] sm:$0xff]  }
 0xda4   : > { %v7638_v36 = vld [vmem:[%s8071_s14] sm:$0xff]  }
 0xda6   : > { %3101 = vmatpush1.bf16.msra.mxu1 %v6572_v45  ;;  %3144 = vmatpush1.bf16.msra.mxu0 %v6574_v46  ;;  %v8544_v45 = vld [vmem:[%s8086_s7] sm:$0xff] }
 0xda7   : > { %3102 = vmatprep.subr.bf16.mxu1 %v6557_v15  ;;  %3145 = vmatprep.subr.bf16.mxu0 %v6559_v48  ;;  %v2121_v48 = vrot.slane %v8544_v45, %v8149_v43  ;;  %v2129_v49 = vrot.slane %v8544_v45, %v2128_v40  ;;  %v2117_v51 = vrot.slane %v8544_v45, %v8154_v47 }
 0xda8   : > { %v2125_v54 = vrot.slane %v8544_v45, %v8180_v62 }
 0xdaa   : > { %3103 = vmatpush1.bf16.msra.mxu1 %v6556_v63  ;;  %3146 = vmatpush1.bf16.msra.mxu0 %v6558_v1 }
 0xdab   : > { %3104 = vmatprep.subr.bf16.mxu1 %v6541_v2  ;;  %3147 = vmatprep.subr.bf16.mxu0 %v6543_v21 }
 0xdae   : > { %3105 = vmatpush1.bf16.msra.mxu1 %v6540_v7  ;;  %3148 = vmatpush1.bf16.msra.mxu0 %v6542_v50 }
 0xdaf   : > { %3106 = vmatprep.subr.bf16.mxu1 %v6525_v8  ;;  %3149 = vmatprep.subr.bf16.mxu0 %v6527_v9 }
 0xdb2   : > { %3107 = vmatpush1.bf16.msra.mxu1 %v6524_v10  ;;  %3150 = vmatpush1.bf16.msra.mxu0 %v6526_v11 }
 0xdb3   : > { %6975 = vmatprep.subr.bf16.mxu1 %v7608_v12  ;;  %6997 = vmatprep.subr.bf16.mxu0 %v7609_v34 }
 0xdb5   : > { %3125 = vmatmul.mubr.bf16.vlgmr.msra.gmra.mxu1 %v8404_v61  ;;  %3168 = vmatmul.mubr.bf16.vlgmr.msra.gmra.mxu0 %v8404_v61  ;;  %v7620_v61 = vld [vmem:[%s8071_s14 + $0x60] sm:$0xff]  }
 0xdb6   : > { %6976 = vmatpush3.bf16.msra.mxu1 %v7610_v13  ;;  %6998 = vmatpush3.bf16.msra.mxu0 %v7611_v44 }
 0xdb7   : > { %6977 = vmatprep.subr.bf16.mxu1 %v7612_v53  ;;  %6999 = vmatprep.subr.bf16.mxu0 %v7613_v55 }
 0xdba   : > { %6978 = vmatpush3.bf16.msra.mxu1 %v7614_v16  ;;  %7000 = vmatpush3.bf16.msra.mxu0 %v7615_v17 }
 0xdbb   : > { %6979 = vmatprep.subr.bf16.mxu1 %v7616_v52  ;;  %7001 = vmatprep.subr.bf16.mxu0 %v7617_v57  ;;  %v7642_v57 = vld [vmem:[%s8071_s14 + $0x138] sm:$0xff]  }
 0xdbe   : > { %6980 = vmatpush3.bf16.msra.mxu1 %v7618_v18  ;;  %7002 = vmatpush3.bf16.msra.mxu0 %v7619_v3  ;;  %v7643_v18 = vld [vmem:[%s8071_s14 + $0x1b8] sm:$0xff]  }
 0xdbf   : > { %6981 = vmatprep.subr.bf16.mxu1 %v7620_v61  ;;  %7003 = vmatprep.subr.bf16.mxu0 %v7621_v19  ;;  %v7644_v19 = vld [vmem:[%s8071_s14 + $0x170] sm:$0xff]  }
 0xdc2   : > { %6982 = vmatpush3.bf16.msra.mxu1 %v7622_v20  ;;  %7004 = vmatpush3.bf16.msra.mxu0 %v7623_v22  ;;  %v7645_v20 = vld [vmem:[%s8071_s14 + $0x1f0] sm:$0xff]  }
 0xdc3   : > { %6983 = vmatprep.subr.bf16.mxu1 %v7624_v23  ;;  %7005 = vmatprep.subr.bf16.mxu0 %v7625_v24  ;;  %v7646_v22 = vld [vmem:[%s8071_s14 + $0x130] sm:$0xff]   ;;  %v7648_v24 = vld [vmem:[%s8071_s14 + $0x168] sm:$0xff]  }
 0xdc4   : > { %v7647_v23 = vld [vmem:[%s8071_s14 + $0x1b0] sm:$0xff]  }
 0xdc6   : > { %6984 = vmatpush3.bf16.msra.mxu1 %v7626_v25  ;;  %7006 = vmatpush3.bf16.msra.mxu0 %v7627_v26  ;;  %v7649_v25 = vld [vmem:[%s8071_s14 + $0x1e8] sm:$0xff]  }
 0xdc7   : > { %6985 = vmatprep.subr.bf16.mxu1 %v7628_v27  ;;  %7007 = vmatprep.subr.bf16.mxu0 %v7629_v58  ;;  %v7650_v26 = vld [vmem:[%s8071_s14 + $0x128] sm:$0xff]   ;;  %v7652_v58 = vld [vmem:[%s8071_s14 + $0x160] sm:$0xff]  }
 0xdc8   : > { %v7651_v27 = vld [vmem:[%s8071_s14 + $0x1a8] sm:$0xff]  }
 0xdca   : > { %6986 = vmatpush3.bf16.msra.mxu1 %v7630_v28  ;;  %7008 = vmatpush3.bf16.msra.mxu0 %v7631_v29  ;;  %v7653_v28 = vld [vmem:[%s8071_s14 + $0x1e0] sm:$0xff]  }
 0xdcb   : > { %6987 = vmatprep.subr.bf16.mxu1 %v7632_v30  ;;  %7009 = vmatprep.subr.bf16.mxu0 %v7633_v31  ;;  %v7654_v29 = vld [vmem:[%s8071_s14 + $0x120] sm:$0xff]   ;;  %v7656_v31 = vld [vmem:[%s8071_s14 + $0x158] sm:$0xff]  }
 0xdcc   : > { %v7655_v30 = vld [vmem:[%s8071_s14 + $0x1a0] sm:$0xff]  }
 0xdce   : > { %6988 = vmatpush3.bf16.msra.mxu1 %v7634_v32  ;;  %7010 = vmatpush3.bf16.msra.mxu0 %v7635_v33  ;;  %v7657_v32 = vld [vmem:[%s8071_s14 + $0x1d8] sm:$0xff]  }
 0xdcf   : > { %6989 = vmatprep.subr.bf16.mxu1 %v7636_v14  ;;  %7011 = vmatprep.subr.bf16.mxu0 %v7637_v35  ;;  %v7658_v33 = vld [vmem:[%s8071_s14 + $0x118] sm:$0xff]   ;;  %v7660_v35 = vld [vmem:[%s8071_s14 + $0x150] sm:$0xff]  }
 0xdd0   : > { %v7659_v14 = vld [vmem:[%s8071_s14 + $0x198] sm:$0xff]  }
 0xdd2   : > { %6990 = vmatpush3.bf16.msra.mxu1 %v7638_v36  ;;  %7012 = vmatpush3.bf16.msra.mxu0 %v7639_v37  ;;  %v7661_v36 = vld [vmem:[%s8071_s14 + $0x1d0] sm:$0xff]   ;;  %v2136_v37 = vsub.s32 5, %v8146_v42 }
 0xdd3   : > { %7019 = vmatprep.subr.bf16.mxu1 %v7640_v38  ;;  %7041 = vmatprep.subr.bf16.mxu0 %v7641_v39  ;;  %v2144_v38 = vsub.s32 7, %v8146_v42  ;;  %v2132_v39 = vsub.s32 4, %v8146_v42 }
 0xe15   : > { %v2868_v46 = vpop.f32.mrf.mxu1  ;;  %v2911_v15 = vpop.f32.mrf.mxu0 }
 0xe16   : > { %v2869_v0 = vadd.f32 %v2868_v46, %v2117_v51  ;;  %v2912_v7 = vadd.f32 %v2911_v15, %v2125_v54  ;;  %v2140_v46 = vsub.s32 6, %v8146_v42  ;;  %v7662_v15 = vld [vmem:[%s8071_s14 + $0x110] sm:$0xff]  }
 0xe17   : > { %v2870_v56 = vpop.f32.mrf.mxu1  ;;  %v2913_v63 = vpop.f32.mrf.mxu0 }
 0xe18   : > { %v2871_v21 = vadd.f32 %v2870_v56, %v2121_v48  ;;  %v2914_v4 = vadd.f32 %v2913_v63, %v2129_v49  ;;  %v3178_v55 = vmax.f32 %v2869_v0, 0.0  ;;  %v3180_v16 = vmax.f32 %v2912_v7, 0.0  ;;  %v7665_v56 = vld [vmem:[%s8071_s14 + $0x1c8] sm:$0xff]  }
 0xe19   : > { %v2872_v1 = vpop.f32.mrf.mxu1  ;;  %v2915_v2 = vpop.f32.mrf.mxu0  ;;  %v2137_v63 = vrot.slane %v8544_v45, %v2136_v37  ;;  %v7667_v0 = vld [vmem:[%s8071_s14 + $0x188] sm:$0xff]  }
 0xe1a   : > { %v2873_v5 = vadd.f32 %v2872_v1, %v2117_v51  ;;  %v2916_v6 = vadd.f32 %v2915_v2, %v2125_v54  ;;  %v3179_v34 = vmax.f32 %v2871_v21, 0.0  ;;  %v3181_v13 = vmax.f32 %v2914_v4, 0.0  ;;  %v7664_v54 = vld [vmem:[%s8071_s14 + $0x148] sm:$0xff]  }
 0xe1b   : > { %v2874_v50 = vpop.f32.mrf.mxu1  ;;  %v2917_v8 = vpop.f32.mrf.mxu0  ;;  %v2145_v1 = vrot.slane %v8544_v45, %v2144_v38  ;;  %v2133_v2 = vrot.slane %v8544_v45, %v2132_v39  ;;  %v2141_v21 = vrot.slane %v8544_v45, %v2140_v46 }
 0xe1c   : > { %v2875_v9 = vadd.f32 %v2874_v50, %v2121_v48  ;;  %v2918_v10 = vadd.f32 %v2917_v8, %v2129_v49  ;;  %v3194_v11 = vmax.f32 %v2873_v5, 0.0  ;;  %v3196_v12 = vmax.f32 %v2916_v6, 0.0  ;;  %v7663_v48 = vld [vmem:[%s8071_s14 + $0x190] sm:$0xff]   ;;  %v7666_v6 = vld [vmem:[%s8071_s14 + $0x108] sm:$0xff]   ;;  %v7668_v8 = vld [vmem:[%s8071_s14 + $0x140] sm:$0xff]  }
 0xe1e   : > { %v3195_v44 = vmax.f32 %v2875_v9, 0.0  ;;  %v3197_v53 = vmax.f32 %v2918_v10, 0.0  ;;  %v3210_v3 = vpack.c.bf16 %v3194_v11, %v3178_v55  ;;  %v3212_v61 = vpack.c.bf16 %v3196_v12, %v3180_v16  ;;  %v7669_v9 = vld [vmem:[%s8071_s14 + $0x1c0] sm:$0xff]  }
 0xe20   : > { %v3211_v17 = vpack.c.bf16 %v3195_v44, %v3179_v34  ;;  %v3213_v52 = vpack.c.bf16 %v3197_v53, %v3181_v13 }
 0xe22   : > { %4287 = vmatprep.mubr.bf16.mxu1 %v3211_v17  ;;  %4328 = vmatprep.mubr.bf16.mxu0 %v3213_v52  ;;  %v7670_v17 = vld [vmem:[%s8071_s14 + $0x100] sm:$0xff]  }
 0xe23   : > { %4288 = vmatmul.mubr.bf16.vlgmr.msra.gmra.mxu1 %v3210_v3  ;;  %4329 = vmatmul.mubr.bf16.vlgmr.msra.gmra.mxu0 %v3212_v61  ;;  %v7671_v52 = vld [vmem:[%s8071_s14 + $0x180] sm:$0xff]   ;;  %v7672_v3 = vld [vmem:[%s8071_s14 + $0x278] sm:$0xff]  }
 0xe24   : > { %7020 = vmatpush3.bf16.msra.mxu1 %v7642_v57  ;;  %7042 = vmatpush3.bf16.msra.mxu0 %v7643_v18  ;;  %v7673_v61 = vld [vmem:[%s8071_s14 + $0x2f8] sm:$0xff]  }
 0xe25   : > { %7021 = vmatprep.subr.bf16.mxu1 %v7644_v19  ;;  %7043 = vmatprep.subr.bf16.mxu0 %v7645_v20 }
 0xe28   : > { %7022 = vmatpush3.bf16.msra.mxu1 %v7646_v22  ;;  %7044 = vmatpush3.bf16.msra.mxu0 %v7647_v23 }
 0xe29   : > { %7023 = vmatprep.subr.bf16.mxu1 %v7648_v24  ;;  %7045 = vmatprep.subr.bf16.mxu0 %v7649_v25 }
 0xe2c   : > { %7024 = vmatpush3.bf16.msra.mxu1 %v7650_v26  ;;  %7046 = vmatpush3.bf16.msra.mxu0 %v7651_v27 }
 0xe2d   : > { %7025 = vmatprep.subr.bf16.mxu1 %v7652_v58  ;;  %7047 = vmatprep.subr.bf16.mxu0 %v7653_v28  ;;  %v7674_v58 = vld [vmem:[%s8071_s14 + $0x238] sm:$0xff]  }
 0xe2e   : > { %v7675_v28 = vld [vmem:[%s8071_s14 + $0x2b8] sm:$0xff]  }
 0xe30   : > { %7026 = vmatpush3.bf16.msra.mxu1 %v7654_v29  ;;  %7048 = vmatpush3.bf16.msra.mxu0 %v7655_v30 }
 0xe31   : > { %7027 = vmatprep.subr.bf16.mxu1 %v7656_v31  ;;  %7049 = vmatprep.subr.bf16.mxu0 %v7657_v32  ;;  %v7676_v31 = vld [vmem:[%s8071_s14 + $0x270] sm:$0xff]  }
 0xe32   : > { %v7677_v32 = vld [vmem:[%s8071_s14 + $0x2f0] sm:$0xff]  }
 0xe34   : > { %7028 = vmatpush3.bf16.msra.mxu1 %v7658_v33  ;;  %7050 = vmatpush3.bf16.msra.mxu0 %v7659_v14  ;;  %v7678_v33 = vld [vmem:[%s8071_s14 + $0x230] sm:$0xff]  }
 0xe35   : > { %v2954_v49 = vpop.f32.mrf.mxu1  ;;  %v2997_v51 = vpop.f32.mrf.mxu0  ;;  %7029 = vmatprep.subr.bf16.mxu1 %v7660_v35  ;;  %7051 = vmatprep.subr.bf16.mxu0 %v7661_v36  ;;  %v7679_v14 = vld [vmem:[%s8071_s14 + $0x2b0] sm:$0xff]   ;;  %v7680_v35 = vld [vmem:[%s8071_s14 + $0x268] sm:$0xff]  }
 0xe36   : > { %v2955_v45 = vadd.f32 %v2954_v49, %v2133_v2  ;;  %v2998_v13 = vadd.f32 %v2997_v51, %v2141_v21  ;;  %v7681_v36 = vld [vmem:[%s8071_s14 + $0x2e8] sm:$0xff]   ;;  %v7684_v49 = vld [vmem:[%s8071_s14 + $0x260] sm:$0xff]  }
 0xe37   : > { %v2956_v4 = vpop.f32.mrf.mxu1  ;;  %v2999_v5 = vpop.f32.mrf.mxu0  ;;  %v7685_v51 = vld [vmem:[%s8071_s14 + $0x2e0] sm:$0xff]  }
 0xe38   : > { %7030 = vmatpush3.bf16.msra.mxu1 %v7662_v15  ;;  %7052 = vmatpush3.bf16.msra.mxu0 %v7663_v48  ;;  %v2957_v10 = vadd.f32 %v2956_v4, %v2137_v63  ;;  %v3000_v11 = vadd.f32 %v2999_v5, %v2145_v1  ;;  %v3182_v24 = vmax.f32 %v2955_v45, 0.0  ;;  %v3184_v25 = vmax.f32 %v2998_v13, 0.0  ;;  %v7682_v15 = vld [vmem:[%s8071_s14 + $0x228] sm:$0xff]   ;;  %v7692_v4 = vld [vmem:[%s8071_s14 + $0x250] sm:$0xff]  }
 0xe39   : > { %v2958_v7 = vpop.f32.mrf.mxu1  ;;  %v3001_v50 = vpop.f32.mrf.mxu0  ;;  %7031 = vmatprep.subr.bf16.mxu1 %v7664_v54  ;;  %7053 = vmatprep.subr.bf16.mxu0 %v7665_v56  ;;  %v7683_v48 = vld [vmem:[%s8071_s14 + $0x2a8] sm:$0xff]   ;;  %v7686_v54 = vld [vmem:[%s8071_s14 + $0x220] sm:$0xff]   ;;  %v7693_v5 = vld [vmem:[%s8071_s14 + $0x2d0] sm:$0xff]  }
 0xe3a   : > { %v2959_v12 = vadd.f32 %v2958_v7, %v2133_v2  ;;  %v3002_v34 = vadd.f32 %v3001_v50, %v2141_v21  ;;  %v3183_v19 = vmax.f32 %v2957_v10, 0.0  ;;  %v3185_v20 = vmax.f32 %v3000_v11, 0.0  ;;  %v7687_v56 = vld [vmem:[%s8071_s14 + $0x2a0] sm:$0xff]   ;;  %v7690_v2 = vld [vmem:[%s8071_s14 + $0x218] sm:$0xff]   ;;  %v7695_v7 = vld [vmem:[%s8071_s14 + $0x290] sm:$0xff]  }
 0xe3b   : > { %v2960_v44 = vpop.f32.mrf.mxu1  ;;  %v3003_v53 = vpop.f32.mrf.mxu0  ;;  %v7691_v21 = vld [vmem:[%s8071_s14 + $0x298] sm:$0xff]   ;;  %v7697_v10 = vld [vmem:[%s8071_s14 + $0x2c8] sm:$0xff]  }
 0xe3c   : > { %v2961_v55 = vadd.f32 %v2960_v44, %v2137_v63  ;;  %v3004_v16 = vadd.f32 %v3003_v53, %v2145_v1  ;;  %7032 = vmatpush3.bf16.msra.mxu1 %v7666_v6  ;;  %7054 = vmatpush3.bf16.msra.mxu0 %v7667_v0  ;;  %v3198_v57 = vmax.f32 %v2959_v12, 0.0  ;;  %v3200_v18 = vmax.f32 %v3002_v34, 0.0  ;;  %v7688_v63 = vld [vmem:[%s8071_s14 + $0x258] sm:$0xff]   ;;  %v8624_v6 = vld [vmem:[%s8086_s7 + $0x8] sm:$0xff]  ;;  %v7694_v0 = vld [vmem:[%s8071_s14 + $0x210] sm:$0xff]  }
 0xe3d   : > { %7033 = vmatprep.subr.bf16.mxu1 %v7668_v8  ;;  %7055 = vmatprep.subr.bf16.mxu0 %v7669_v9  ;;  %v7689_v1 = vld [vmem:[%s8071_s14 + $0x2d8] sm:$0xff]   ;;  %v7696_v9 = vld [vmem:[%s8071_s14 + $0x248] sm:$0xff]   ;;  %v2153_v11 = vrot.slane %v8624_v6, %v8149_v43  ;;  %v2161_v12 = vrot.slane %v8624_v6, %v2128_v40  ;;  %v2149_v34 = vrot.slane %v8624_v6, %v8154_v47  ;;  %v7700_v43 = vld [vmem:[%s8071_s14 + $0x240] sm:$0xff]  }
 0xe3e   : > { %v3199_v22 = vmax.f32 %v2961_v55, 0.0  ;;  %v3201_v23 = vmax.f32 %v3004_v16, 0.0  ;;  %v3214_v29 = vpack.c.bf16 %v3198_v57, %v3182_v24  ;;  %v3216_v30 = vpack.c.bf16 %v3200_v18, %v3184_v25  ;;  %v7698_v53 = vld [vmem:[%s8071_s14 + $0x208] sm:$0xff]   ;;  %v7701_v40 = vld [vmem:[%s8071_s14 + $0x2c0] sm:$0xff]  }
 0xe3f   : > { %v2157_v45 = vrot.slane %v8624_v6, %v8180_v62  ;;  %v7699_v55 = vld [vmem:[%s8071_s14 + $0x288] sm:$0xff]   ;;  %v7703_v24 = vld [vmem:[%s8071_s14 + $0x280] sm:$0xff]  }
 0xe40   : > { %v3215_v26 = vpack.c.bf16 %v3199_v22, %v3183_v19  ;;  %v3217_v27 = vpack.c.bf16 %v3201_v23, %v3185_v20  ;;  %7034 = vmatpush3.bf16.msra.mxu1 %v7670_v17  ;;  %7056 = vmatpush3.bf16.msra.mxu0 %v7671_v52  ;;  %v7702_v23 = vld [vmem:[%s8071_s14 + $0x200] sm:$0xff]  }
 0xe41   : > { %7063 = vmatprep.subr.bf16.mxu1 %v7672_v3  ;;  %7085 = vmatprep.subr.bf16.mxu0 %v7673_v61 }
 0xe42   : > { %4369 = vmatprep.mubr.bf16.mxu1 %v3215_v26  ;;  %4410 = vmatprep.mubr.bf16.mxu0 %v3217_v27  ;;  %v7704_v27 = vld [vmem:[%s8071_s14 + $0x378] sm:$0xff]  }
 0xe43   : > { %4370 = vmatmul.mubr.bf16.vlgmr.msra.gmra.mxu1 %v3214_v29  ;;  %4411 = vmatmul.mubr.bf16.vlgmr.msra.gmra.mxu0 %v3216_v30 }
 0xe44   : > { %7064 = vmatpush3.bf16.msra.mxu1 %v7674_v58  ;;  %7086 = vmatpush3.bf16.msra.mxu0 %v7675_v28  ;;  %v7705_v58 = vld [vmem:[%s8071_s14 + $0x3f8] sm:$0xff]  }
 0xe45   : > { %7065 = vmatprep.subr.bf16.mxu1 %v7676_v31  ;;  %7087 = vmatprep.subr.bf16.mxu0 %v7677_v32 }
 0xe48   : > { %7066 = vmatpush3.bf16.msra.mxu1 %v7678_v33  ;;  %7088 = vmatpush3.bf16.msra.mxu0 %v7679_v14 }
 0xe49   : > { %7067 = vmatprep.subr.bf16.mxu1 %v7680_v35  ;;  %7089 = vmatprep.subr.bf16.mxu0 %v7681_v36  ;;  %v7706_v36 = vld [vmem:[%s8071_s14 + $0x338] sm:$0xff]  }
 0xe4c   : > { %7068 = vmatpush3.bf16.msra.mxu1 %v7682_v15  ;;  %7090 = vmatpush3.bf16.msra.mxu0 %v7683_v48  ;;  %v7707_v15 = vld [vmem:[%s8071_s14 + $0x3b8] sm:$0xff]  }
 0xe4d   : > { %7069 = vmatprep.subr.bf16.mxu1 %v7684_v49  ;;  %7091 = vmatprep.subr.bf16.mxu0 %v7685_v51  ;;  %v7708_v51 = vld [vmem:[%s8071_s14 + $0x370] sm:$0xff]  }
 0xe50   : > { %7070 = vmatpush3.bf16.msra.mxu1 %v7686_v54  ;;  %7092 = vmatpush3.bf16.msra.mxu0 %v7687_v56  ;;  %v7709_v54 = vld [vmem:[%s8071_s14 + $0x3f0] sm:$0xff]  }
 0xe51   : > { %7071 = vmatprep.subr.bf16.mxu1 %v7688_v63  ;;  %7093 = vmatprep.subr.bf16.mxu0 %v7689_v1  ;;  %v7710_v56 = vld [vmem:[%s8071_s14 + $0x330] sm:$0xff]   ;;  %v7712_v1 = vld [vmem:[%s8071_s14 + $0x368] sm:$0xff]  }
 0xe52   : > { %v7711_v63 = vld [vmem:[%s8071_s14 + $0x3b0] sm:$0xff]  }
 0xe54   : > { %7072 = vmatpush3.bf16.msra.mxu1 %v7690_v2  ;;  %7094 = vmatpush3.bf16.msra.mxu0 %v7691_v21  ;;  %v7713_v2 = vld [vmem:[%s8071_s14 + $0x3e8] sm:$0xff]  }
 0xe55   : > { %v3040_v50 = vpop.f32.mrf.mxu1  ;;  %v3083_v8 = vpop.f32.mrf.mxu0  ;;  %7073 = vmatprep.subr.bf16.mxu1 %v7692_v4  ;;  %7095 = vmatprep.subr.bf16.mxu0 %v7693_v5  ;;  %v7714_v21 = vld [vmem:[%s8071_s14 + $0x328] sm:$0xff]   ;;  %v7716_v5 = vld [vmem:[%s8071_s14 + $0x360] sm:$0xff]  }
 0xe56   : > { %v3041_v62 = vadd.f32 %v3040_v50, %v2149_v34  ;;  %v3084_v3 = vadd.f32 %v3083_v8, %v2157_v45  ;;  %v7715_v4 = vld [vmem:[%s8071_s14 + $0x3a8] sm:$0xff]   ;;  %v7719_v50 = vld [vmem:[%s8071_s14 + $0x3a0] sm:$0xff]   ;;  %v7720_v8 = vld [vmem:[%s8071_s14 + $0x358] sm:$0xff]  }
 0xe57   : > { %v3042_v13 = vpop.f32.mrf.mxu1  ;;  %v3085_v44 = vpop.f32.mrf.mxu0 }
 0xe58   : > { %7074 = vmatpush3.bf16.msra.mxu1 %v7694_v0  ;;  %7096 = vmatpush3.bf16.msra.mxu0 %v7695_v7  ;;  %v3043_v52 = vadd.f32 %v3042_v13, %v2153_v11  ;;  %v3086_v57 = vadd.f32 %v3085_v44, %v2161_v12  ;;  %v3186_v32 = vmax.f32 %v3041_v62, 0.0  ;;  %v3188_v33 = vmax.f32 %v3084_v3, 0.0  ;;  %v7717_v0 = vld [vmem:[%s8071_s14 + $0x3e0] sm:$0xff]   ;;  %v7727_v13 = vld [vmem:[%s8071_s14 + $0x390] sm:$0xff]   ;;  %v7731_v62 = vld [vmem:[%s8071_s14 + $0x388] sm:$0xff]  }
 0xe59   : > { %v3044_v16 = vpop.f32.mrf.mxu1  ;;  %v3087_v17 = vpop.f32.mrf.mxu0  ;;  %7075 = vmatprep.subr.bf16.mxu1 %v7696_v9  ;;  %7097 = vmatprep.subr.bf16.mxu0 %v7697_v10  ;;  %v7718_v7 = vld [vmem:[%s8071_s14 + $0x320] sm:$0xff]   ;;  %v7721_v9 = vld [vmem:[%s8071_s14 + $0x3d8] sm:$0xff]  }
 0xe5a   : > { %v3045_v47 = vadd.f32 %v3044_v16, %v2149_v34  ;;  %v3088_v18 = vadd.f32 %v3087_v17, %v2157_v45  ;;  %v3187_v28 = vmax.f32 %v3043_v52, 0.0  ;;  %v3189_v29 = vmax.f32 %v3086_v57, 0.0  ;;  %v7722_v10 = vld [vmem:[%s8071_s14 + $0x318] sm:$0xff]   ;;  %v7725_v34 = vld [vmem:[%s8071_s14 + $0x3d0] sm:$0xff]   ;;  %v7729_v16 = vld [vmem:[%s8071_s14 + $0x3c8] sm:$0xff]  }
 0xe5b   : > { %v3046_v61 = vpop.f32.mrf.mxu1  ;;  %v3089_v19 = vpop.f32.mrf.mxu0  ;;  %v7726_v45 = vld [vmem:[%s8071_s14 + $0x310] sm:$0xff]   ;;  %v2169_v17 = vrot.slane %v8624_v6, %v2136_v37  ;;  %v2173_v52 = vrot.slane %v8624_v6, %v2140_v46 }
 0xe5c   : > { %v3047_v20 = vadd.f32 %v3046_v61, %v2153_v11  ;;  %v3090_v22 = vadd.f32 %v3089_v19, %v2161_v12  ;;  %7076 = vmatpush3.bf16.msra.mxu1 %v7698_v53  ;;  %7098 = vmatpush3.bf16.msra.mxu0 %v7699_v55  ;;  %v3202_v25 = vmax.f32 %v3045_v47, 0.0  ;;  %v3204_v26 = vmax.f32 %v3088_v18, 0.0  ;;  %v7723_v11 = vld [vmem:[%s8071_s14 + $0x398] sm:$0xff]   ;;  %v7724_v12 = vld [vmem:[%s8071_s14 + $0x350] sm:$0xff]   ;;  %v7728_v55 = vld [vmem:[%s8071_s14 + $0x348] sm:$0xff]  }
 0xe5d   : > { %7077 = vmatprep.subr.bf16.mxu1 %v7700_v43  ;;  %7099 = vmatprep.subr.bf16.mxu0 %v7701_v40  ;;  %v2177_v43 = vrot.slane %v8624_v6, %v2144_v38  ;;  %v2165_v40 = vrot.slane %v8624_v6, %v2132_v39  ;;  %v7730_v18 = vld [vmem:[%s8071_s14 + $0x308] sm:$0xff]   ;;  %v7732_v38 = vld [vmem:[%s8071_s14 + $0x340] sm:$0xff]  }
 0xe5e   : > { %v3203_v30 = vmax.f32 %v3047_v20, 0.0  ;;  %v3205_v31 = vmax.f32 %v3090_v22, 0.0  ;;  %v3218_v48 = vpack.c.bf16 %v3202_v25, %v3186_v32  ;;  %v3220_v49 = vpack.c.bf16 %v3204_v26, %v3188_v33  ;;  %v7733_v61 = vld [vmem:[%s8071_s14 + $0x3c0] sm:$0xff]  }
 0xe60   : > { %v3219_v14 = vpack.c.bf16 %v3203_v30, %v3187_v28  ;;  %v3221_v35 = vpack.c.bf16 %v3205_v31, %v3189_v29  ;;  %7078 = vmatpush3.bf16.msra.mxu1 %v7702_v23  ;;  %7100 = vmatpush3.bf16.msra.mxu0 %v7703_v24 }
 0xe61   : > { %7107 = vmatprep.subr.bf16.mxu1 %v7704_v27  ;;  %7129 = vmatprep.subr.bf16.mxu0 %v7705_v58  ;;  %v7734_v27 = vld [vmem:[%s8071_s14 + $0x300] sm:$0xff]  }
 0xe62   : > { %4451 = vmatprep.mubr.bf16.mxu1 %v3219_v14  ;;  %4492 = vmatprep.mubr.bf16.mxu0 %v3221_v35  ;;  %v7735_v58 = vld [vmem:[%s8071_s14 + $0x380] sm:$0xff]  }
 0xe63   : > { %4452 = vmatmul.mubr.bf16.vlgmr.msra.gmra.mxu1 %v3218_v48  ;;  %4493 = vmatmul.mubr.bf16.vlgmr.msra.gmra.mxu0 %v3220_v49 }
 0xe64   : > { %7108 = vmatpush3.bf16.msra.mxu1 %v7706_v36  ;;  %7130 = vmatpush3.bf16.msra.mxu0 %v7707_v15 }
 0xe65   : > { %7109 = vmatprep.subr.bf16.mxu1 %v7708_v51  ;;  %7131 = vmatprep.subr.bf16.mxu0 %v7709_v54 }
 0xe68   : > { %7110 = vmatpush3.bf16.msra.mxu1 %v7710_v56  ;;  %7132 = vmatpush3.bf16.msra.mxu0 %v7711_v63 }
 0xe69   : > { %7111 = vmatprep.subr.bf16.mxu1 %v7712_v1  ;;  %7133 = vmatprep.subr.bf16.mxu0 %v7713_v2 }
 0xe6c   : > { %7112 = vmatpush3.bf16.msra.mxu1 %v7714_v21  ;;  %7134 = vmatpush3.bf16.msra.mxu0 %v7715_v4 }
 0xe6d   : > { %7113 = vmatprep.subr.bf16.mxu1 %v7716_v5  ;;  %7135 = vmatprep.subr.bf16.mxu0 %v7717_v0 }
 0xe70   : > { %7114 = vmatpush3.bf16.msra.mxu1 %v7718_v7  ;;  %7136 = vmatpush3.bf16.msra.mxu0 %v7719_v50 }
 0xe71   : > { %7115 = vmatprep.subr.bf16.mxu1 %v7720_v8  ;;  %7137 = vmatprep.subr.bf16.mxu0 %v7721_v9 }
 0xe74   : > { %7116 = vmatpush3.bf16.msra.mxu1 %v7722_v10  ;;  %7138 = vmatpush3.bf16.msra.mxu0 %v7723_v11 }
 0xe75   : > { %v3126_v44 = vpop.f32.mrf.mxu1  ;;  %v3169_v53 = vpop.f32.mrf.mxu0  ;;  %7117 = vmatprep.subr.bf16.mxu1 %v7724_v12  ;;  %7139 = vmatprep.subr.bf16.mxu0 %v7725_v34  ;;  %v6640_v12 = vld [vmem:[%s8081_s23 + $0x1] ss:$0 sm:$0xff] }
 0xe76   : > { %v3127_v23 = vadd.f32 %v3126_v44, %v2165_v40  ;;  %v3170_v46 = vadd.f32 %v3169_v53, %v2173_v52 }
 0xe77   : > { %v3128_v57 = vpop.f32.mrf.mxu1  ;;  %v3171_v47 = vpop.f32.mrf.mxu0 }
 0xe78   : > { %7118 = vmatpush3.bf16.msra.mxu1 %v7726_v45  ;;  %7140 = vmatpush3.bf16.msra.mxu0 %v7727_v13  ;;  %v3129_v19 = vadd.f32 %v3128_v57, %v2169_v17  ;;  %v3172_v39 = vadd.f32 %v3171_v47, %v2177_v43  ;;  %v3190_v14 = vmax.f32 %v3127_v23, 0.0  ;;  %v3192_v35 = vmax.f32 %v3170_v46, 0.0 }
 0xe79   : > { %v3130_v3 = vpop.f32.mrf.mxu1  ;;  %v3173_v37 = vpop.f32.mrf.mxu0  ;;  %7119 = vmatprep.subr.bf16.mxu1 %v7728_v55  ;;  %7141 = vmatprep.subr.bf16.mxu0 %v7729_v16 }
 0xe7a   : > { %v3131_v20 = vadd.f32 %v3130_v3, %v2165_v40  ;;  %v3174_v22 = vadd.f32 %v3173_v37, %v2173_v52  ;;  %v3191_v30 = vmax.f32 %v3129_v19, 0.0  ;;  %v3193_v31 = vmax.f32 %v3172_v39, 0.0 }
 0xe7b   : > { %v3132_v6 = vpop.f32.mrf.mxu1  ;;  %v3175_v24 = vpop.f32.mrf.mxu0 }
 0xe7c   : > { %v3133_v25 = vadd.f32 %v3132_v6, %v2169_v17  ;;  %v3176_v26 = vadd.f32 %v3175_v24, %v2177_v43  ;;  %7120 = vmatpush3.bf16.msra.mxu1 %v7730_v18  ;;  %7142 = vmatpush3.bf16.msra.mxu0 %v7731_v62  ;;  %v3206_v28 = vmax.f32 %v3131_v20, 0.0  ;;  %v3208_v29 = vmax.f32 %v3174_v22, 0.0 }
 0xe7d   : > { %7121 = vmatprep.subr.bf16.mxu1 %v7732_v38  ;;  %7143 = vmatprep.subr.bf16.mxu0 %v7733_v61 }
 0xe7e   : > { %v3207_v32 = vmax.f32 %v3133_v25, 0.0  ;;  %v3209_v33 = vmax.f32 %v3176_v26, 0.0  ;;  %v3222_v48 = vpack.c.bf16 %v3206_v28, %v3190_v14  ;;  %v3224_v49 = vpack.c.bf16 %v3208_v29, %v3192_v35 }
 0xe80   : > { %v3223_v36 = vpack.c.bf16 %v3207_v32, %v3191_v30  ;;  %v3225_v15 = vpack.c.bf16 %v3209_v33, %v3193_v31  ;;  %7122 = vmatpush3.bf16.msra.mxu1 %v7734_v27  ;;  %7144 = vmatpush3.bf16.msra.mxu0 %v7735_v58 }
 0xe82   : > { %4533 = vmatprep.mubr.bf16.mxu1 %v3223_v36  ;;  %4574 = vmatprep.mubr.bf16.mxu0 %v3225_v15 }
 0xe83   : > { %4534 = vmatmul.mubr.bf16.vlgmr.msra.gmra.mxu1 %v3222_v48  ;;  %4575 = vmatmul.mubr.bf16.vlgmr.msra.gmra.mxu0 %v3224_v49 }
 0xee3   : > { %v6991_v51 = vpop.f32.mrf.mxu1  ;;  %v7013_v54 = vpop.f32.mrf.mxu0 }
 0xee5   : > { %v6992_v56 = vpop.f32.mrf.mxu1  ;;  %v7014_v63 = vpop.f32.mrf.mxu0 }
 0xee6   : > { %v6993_v11 = vadd.f32 %v6992_v56, %v6991_v51  ;;  %v7015_v16 = vadd.f32 %v7014_v63, %v7013_v54 }
 0xee7   : > { %v6994_v1 = vpop.f32.mrf.mxu1  ;;  %v7016_v2 = vpop.f32.mrf.mxu0 }
 0xee8   : > { %v4290_v44 = vadd.f32 %v6993_v11, %v6640_v12 }
 0xee9   : > { %v6995_v21 = vpop.f32.mrf.mxu1  ;;  %v7017_v4 = vpop.f32.mrf.mxu0 }
 0xeea   : > { %v6996_v53 = vadd.f32 %v6995_v21, %v6994_v1  ;;  %v4331_v40 = vadd.f32 %v7015_v16, %v4290_v44  ;;  %v7018_v47 = vadd.f32 %v7017_v4, %v7016_v2  ;;  %v6769_v44 = vld [vmem:[%s8081_s23 + $0x4] ss:$0 sm:$0xff] }
 0xeec   : > { %v4293_v52 = vadd.f32 %v6996_v53, %v6640_v12 }
 0xeee   : > { %v4334_v37 = vadd.f32 %v7018_v47, %v4293_v52 }
 0xf03   : > { %v7035_v5 = vpop.f32.mrf.mxu1  ;;  %v7057_v0 = vpop.f32.mrf.mxu0 }
 0xf05   : > { %v7036_v7 = vpop.f32.mrf.mxu1  ;;  %v7058_v50 = vpop.f32.mrf.mxu0 }
 0xf06   : > { %v7037_v17 = vadd.f32 %v7036_v7, %v7035_v5  ;;  %v7059_v38 = vadd.f32 %v7058_v50, %v7057_v0 }
 0xf07   : > { %v7038_v8 = vpop.f32.mrf.mxu1  ;;  %v7060_v9 = vpop.f32.mrf.mxu0 }
 0xf08   : > { %v4372_v18 = vadd.f32 %v7037_v17, %v4331_v40 }
 0xf09   : > { %v7039_v10 = vpop.f32.mrf.mxu1  ;;  %v7061_v34 = vpop.f32.mrf.mxu0 }
 0xf0a   : > { %v7040_v62 = vadd.f32 %v7039_v10, %v7038_v8  ;;  %v4413_v39 = vadd.f32 %v7059_v38, %v4372_v18  ;;  %v7062_v23 = vadd.f32 %v7061_v34, %v7060_v9 }
 0xf0c   : > { %v4375_v20 = vadd.f32 %v7040_v62, %v4334_v37 }
 0xf0e   : > { %v4416_v26 = vadd.f32 %v7062_v23, %v4375_v20 }
 0xf23   : > { %v7079_v45 = vpop.f32.mrf.mxu1  ;;  %v7101_v13 = vpop.f32.mrf.mxu0 }
 0xf25   : > { %v7080_v55 = vpop.f32.mrf.mxu1  ;;  %v7102_v43 = vpop.f32.mrf.mxu0 }
 0xf26   : > { %v7081_v61 = vadd.f32 %v7080_v55, %v7079_v45  ;;  %v7103_v27 = vadd.f32 %v7102_v43, %v7101_v13  ;;  %v6770_v55 = vld [vmem:[%s8081_s23 + $0x5] ss:$0 sm:$0xff] }
 0xf27   : > { %v7082_v57 = vpop.f32.mrf.mxu1  ;;  %v7104_v3 = vpop.f32.mrf.mxu0 }
 0xf28   : > { %v4454_v46 = vadd.f32 %v7081_v61, %v4413_v39 }
 0xf29   : > { %v7083_v19 = vpop.f32.mrf.mxu1  ;;  %v7105_v22 = vpop.f32.mrf.mxu0 }
 0xf2a   : > { %v7084_v6 = vadd.f32 %v7083_v19, %v7082_v57  ;;  %v4495_v29 = vadd.f32 %v7103_v27, %v4454_v46  ;;  %v7106_v14 = vadd.f32 %v7105_v22, %v7104_v3 }
 0xf2c   : > { %v4457_v30 = vadd.f32 %v7084_v6, %v4416_v26 }
 0xf2e   : > { %v4498_v49 = vadd.f32 %v7106_v14, %v4457_v30 }
 0xf43   : > { %v7123_v24 = vpop.f32.mrf.mxu1  ;;  %v7145_v25 = vpop.f32.mrf.mxu0 }
 0xf45   : > { %v7124_v58 = vpop.f32.mrf.mxu1  ;;  %v7146_v28 = vpop.f32.mrf.mxu0 }
 0xf46   : > { %v7125_v31 = vadd.f32 %v7124_v58, %v7123_v24  ;;  %v7147_v36 = vadd.f32 %v7146_v28, %v7145_v25 }
 0xf47   : > { %v7126_v32 = vpop.f32.mrf.mxu1  ;;  %v7148_v33 = vpop.f32.mrf.mxu0 }
 0xf48   : > { %v4536_v35 = vadd.f32 %v7125_v31, %v4495_v29 }
 0xf49   : > { %v7127_v15 = vpop.f32.mrf.mxu1  ;;  %v7149_v48 = vpop.f32.mrf.mxu0 }
 0xf4a   : > { %v4577_v51 = vadd.f32 %v7147_v36, %v4536_v35  ;;  %v7128_v54 = vadd.f32 %v7127_v15, %v7126_v32  ;;  %v7150_v63 = vadd.f32 %v7149_v48, %v7148_v33 }
 0xf4c   : > { %v4539_v56 = vadd.f32 %v7128_v54, %v4498_v49  ;;  %v4583_v1 = vadd.f32 %v4577_v51, %v8398_v59 }
 0xf4e   : > { %v4580_v2 = vadd.f32 %v7150_v63, %v4539_v56  ;;  %4587 = vadd.xlane.f32.xlu1 %v4583_v1 }
 0xf50   : > { %v4584_v21 = vadd.f32 %v4580_v2, %v8400_v60 }
 0xf52   : > { %4589 = vadd.xlane.f32.xlu0 %v4584_v21 }
 0xfd7   : > { %v4588_v4 = vpop.xlane.xlu1 %4587 }
 0xfd8   : > { %v4591_v5 = vmul.f32 0.0078125, %v4588_v4 }
 0xfda   : > { %v4593_v0 = vsub.f32 %v4583_v1, %v4591_v5 }
 0xfdb   : > { %v4590_v7 = vpop.xlane.xlu0 %4589 }
 0xfdc   : > { %v4592_v50 = vmul.f32 0.0078125, %v4590_v7  ;;  %v4595_v8 = vmul.f32 %v4593_v0, %v4593_v0 }
 0xfde   : > { %v4594_v9 = vsub.f32 %v4584_v21, %v4592_v50  ;;  %4597 = vadd.xlane.f32.xlu1 %v4595_v8 }
 0xfe0   : > { %v4596_v10 = vmul.f32 %v4594_v9, %v4594_v9 }
 0xfe2   : > { %4599 = vadd.xlane.f32.xlu0 %v4596_v10 }
0x1067   : > { %v4598_v11 = vpop.xlane.xlu1 %4597 }
0x1068   : > { %v4601_v12 = vmul.f32 0.0078125, %v4598_v11 }
0x106a   : > { %v4603_v59 = vadd.f32 1e-05, %v4601_v12 }
0x106b   : > { %v4600_v34 = vpop.xlane.xlu0 %4599 }
0x106c   : > { %7772 = vrsqrt.f32 %v4603_v59  ;;  %v4602_v45 = vmul.f32 0.0078125, %v4600_v34 }
0x106e   : > { %v4604_v60 = vadd.f32 1e-05, %v4602_v45 }
0x1070   : > { %7774 = vrsqrt.f32 %v4604_v60 }
0x1079   : > { %v7773_v13 = vpop.eup %7772 }
0x107a   : > { %v4607_v53 = vmul.f32 %v7773_v13, %v4593_v0 }
0x107c   : > { %v4613_v16 = vmul.f32 %v6769_v44, %v4607_v53 }
0x107d   : > { %v7775_v17 = vpop.eup %7774 }
0x107e   : > { %v4619_v43 = vadd.f32 %v6770_v55, %v4613_v16  ;;  %v4608_v40 = vmul.f32 %v7775_v17, %v4594_v9 }
0x1080   : > { %4621 = vst [vmem:[#allocation2] sm:$0xff] %v4619_v43  ;;  %v4614_v52 = vmul.f32 %v6769_v44, %v4608_v40  ;;  %4626 = sbr.rel (%p6771_p5) target bundleno = 4769 (0x12a1), region = 84 }
0x1082   : > { %v4620_v57 = vadd.f32 %v6770_v55, %v4614_v52 }
0x1084   : > { %4622 = vst [vmem:[#allocation2 + $0x8] sm:$0xff] %v4620_v57 }
0x1085   : > { %v7778_v47 = vld [vmem:[%s9185_s3 + $0xf8] sm:$0xff]   ;;  %v4638_v18 = vpack.c.bf16 %v4620_v57, %v4619_v43  ;;  %v7962_v62 = vmov 0.0   ;;  %v4630_v38 = vand.u32 127, %v690_v41  ;;  %vm7963_vm8 = vmmov 0   ;;  %v7781_v61 = vld [vmem:[%s9185_s3 + $0xf0] sm:$0xff]   ;;  %v7785_v22 = vld [vmem:[%s9185_s3 + $0xe8] sm:$0xff]  }
0x1086   : > { %7487 = vmatprep.subr.bf16.mxu1 %v7962_v62  ;;  %v7779_v3 = vld [vmem:[%s9185_s3 + $0xb8] sm:$0xff]   ;;  %7175 = vmatprep.subr.bf16.mxu0 %v7778_v47  ;;  %v4631_v19 = vmul.u32 8, %v8146_v42  ;;  %v7783_v20 = vld [vmem:[%s9185_s3 + $0xb0] sm:$0xff]   ;;  %vm4639_vm11 = vcmask 130048   ;;  %v7787_v24 = vld [vmem:[%s9185_s3 + $0xa8] sm:$0xff]  }
0x1087   : > { %7488 = vmatpush3.bf16.msra.mxu1 %v4638_v18  ;;  %v7780_v37 = vld [vmem:[%s9185_s3 + $0x78] sm:$0xff]   ;;  %7176 = vmatpush3.bf16.msra.mxu0 %v7779_v3  ;;  %v7784_v46 = vld [vmem:[%s9185_s3 + $0x70] sm:$0xff]   ;;  %v7789_v26 = vld [vmem:[%s9185_s3 + $0xe0] sm:$0xff]   ;;  %v7964_v14 = vmov 1966171168  }
0x1088   : > { %7489 = vmatprep.mubr.msk.bf16.mxu1 %vm7963_vm8, %v7962_v62  ;;  %7153 = vmatprep.subr.bf16.mxu1 %v7780_v37  ;;  %vm4632_vm9 = vcmp.ge.s32.totalorder %v4630_v38, %v4631_v19  ;;  %v4633_v39 = vadd.s32 8, %v4631_v19  ;;  %v7782_v41 = vld [vmem:[%s9185_s3 + $0x38] sm:$0xff]   ;;  %v7786_v25 = vld [vmem:[%s9185_s3 + $0x30] sm:$0xff]   ;;  %v7788_v27 = vld [vmem:[%s9185_s3 + $0x68] sm:$0xff]   ;;  %v4951_v35 = vunpack.c.l.s4 %v7964_v14 }
0x1089   : > { %7177 = vmatprep.subr.bf16.mxu0 %v7781_v61  ;;  %v7791_v58 = vld [vmem:[%s9185_s3 + $0xa0] sm:$0xff]   ;;  %v7790_v28 = vld [vmem:[%s9185_s3 + $0x28] sm:$0xff]   ;;  %v7793_v29 = vld [vmem:[%s9185_s3 + $0xd8] sm:$0xff]  }
0x108a   : > { %vm4634_vm10 = vcmp.lt.s32.totalorder %v4630_v38, %v4633_v39  ;;  %v7792_v30 = vld [vmem:[%s9185_s3 + $0x60] sm:$0xff]   ;;  %v7795_v31 = vld [vmem:[%s9185_s3 + $0x98] sm:$0xff]   ;;  %v7797_v33 = vld [vmem:[%s9185_s3 + $0xd0] sm:$0xff]   ;;  %v4952_v51 = vunpack.c.0.s8 %v4951_v35 }
0x108b   : > { %7178 = vmatpush3.bf16.msra.mxu0 %v7783_v20  ;;  %vm4635_vm12 = vmand %vm4632_vm9, %vm4634_vm10  ;;  %v7794_v32 = vld [vmem:[%s9185_s3 + $0x20] sm:$0xff]   ;;  %v7796_v36 = vld [vmem:[%s9185_s3 + $0x58] sm:$0xff]  }
0x108c   : > { %v4636_v23 = vsel %vm4635_vm12, 1.0, %v7962_v62  ;;  %7179 = vmatprep.subr.bf16.mxu0 %v7785_v22  ;;  %v7799_v15 = vld [vmem:[%s9185_s3 + $0x90] sm:$0xff]   ;;  %v7798_v48 = vld [vmem:[%s9185_s3 + $0x18] sm:$0xff]   ;;  %v7801_v49 = vld [vmem:[%s9185_s3 + $0xc8] sm:$0xff]   ;;  %v8783_v2 = vsub.s32 %v4952_v51, %v8146_v42 }
0x108d   : > { %v4637_v6 = vpack.c.bf16 %v4636_v23, %v4636_v23  ;;  %v7800_v54 = vld [vmem:[%s9185_s3 + $0x50] sm:$0xff]   ;;  %v7803_v56 = vld [vmem:[%s9185_s3 + $0x88] sm:$0xff]   ;;  %v7805_v1 = vld [vmem:[%s9185_s3 + $0xc0] sm:$0xff]  }
0x108e   : > { %v7802_v63 = vld [vmem:[%s9185_s3 + $0x10] sm:$0xff]   ;;  %v7804_v21 = vld [vmem:[%s9185_s3 + $0x48] sm:$0xff]   ;;  %v7807_v4 = vld [vmem:[%s9185_s3 + $0x80] sm:$0xff]  }
0x108f   : > { %7490 = vmatmul.mubr.msk.bf16.vlgmr.msra.gmra.mxu1 %vm4639_vm11, %v4637_v6  ;;  %7180 = vmatpush3.bf16.msra.mxu0 %v7787_v24  ;;  %v4684_v5 = vld [vmem:[%s9184_s2] sm:$0xff]  ;;  %v7810_v7 = vld [vmem:[%s9185_s3 + $0x1f8] sm:$0xff]   ;;  %v7806_v50 = vld [vmem:[%s9185_s3 + $0x8] sm:$0xff]  }
0x1090   : > { %7154 = vmatpush3.bf16.msra.mxu1 %v7782_v41  ;;  %7181 = vmatprep.subr.bf16.mxu0 %v7789_v26  ;;  %v4949_v0 = vcombine.high %v4684_v5, %v4684_v5  ;;  %v4956_v42 = vrot.slane %v4684_v5, %v8783_v2  ;;  %v7808_v8 = vld [vmem:[%s9185_s3 + $0x40] sm:$0xff]   ;;  %v7812_v60 = vld [vmem:[%s9185_s3 + $0x1b8] sm:$0xff]   ;;  %v7814_v55 = vld [vmem:[%s9185_s3 + $0x1f0] sm:$0xff]  }
0x1091   : > { %7155 = vmatprep.subr.bf16.mxu1 %v7784_v46  ;;  %v7811_v59 = vld [vmem:[%s9185_s3] sm:$0xff]   ;;  %v7813_v44 = vld [vmem:[%s9185_s3 + $0x178] sm:$0xff]   ;;  %v7816_v43 = vld [vmem:[%s9185_s3 + $0x1b0] sm:$0xff]  }
0x1092   : > { %v4964_v9 = vcombine.high %v4956_v42, %v4956_v42  ;;  %v4972_v10 = vrot.slane %v4956_v42, %v8783_v2  ;;  %v8806_v11 = vrot.slane %v4949_v0, %v8783_v2  ;;  %v7815_v16 = vld [vmem:[%s9185_s3 + $0x138] sm:$0xff]   ;;  %v7817_v40 = vld [vmem:[%s9185_s3 + $0x170] sm:$0xff]   ;;  %v7818_v52 = vld [vmem:[%s9185_s3 + $0x1e8] sm:$0xff]  }
0x1093   : > { %7182 = vmatpush3.bf16.msra.mxu0 %v7791_v58  ;;  %v7819_v57 = vld [vmem:[%s9185_s3 + $0x130] sm:$0xff]   ;;  %v7820_v47 = vld [vmem:[%s9185_s3 + $0x1a8] sm:$0xff]   ;;  %v7822_v3 = vld [vmem:[%s9185_s3 + $0x1e0] sm:$0xff]  }
0x1094   : > { %7156 = vmatpush3.bf16.msra.mxu1 %v7786_v25  ;;  %7183 = vmatprep.subr.bf16.mxu0 %v7793_v29  ;;  %v4986_v12 = vrot.slane %v4964_v9, %v8783_v2  ;;  %v4965_v34 = vcombine.high %v8806_v11, %v8806_v11  ;;  %v4994_v45 = vcombine.high %v4972_v10, %v4972_v10  ;;  %v7821_v18 = vld [vmem:[%s9185_s3 + $0x168] sm:$0xff]   ;;  %v7824_v38 = vld [vmem:[%s9185_s3 + $0x1a0] sm:$0xff]   ;;  %v7826_v19 = vld [vmem:[%s9185_s3 + $0x1d8] sm:$0xff]  }
0x1095   : > { %7157 = vmatprep.subr.bf16.mxu1 %v7788_v27  ;;  %v7823_v37 = vld [vmem:[%s9185_s3 + $0x128] sm:$0xff]   ;;  %v7825_v61 = vld [vmem:[%s9185_s3 + $0x160] sm:$0xff]   ;;  %v7828_v20 = vld [vmem:[%s9185_s3 + $0x198] sm:$0xff]  }
0x1096   : > { %v4996_v13 = vcombine.high %v4986_v12, %v4986_v12  ;;  %5863 = vmatprep.mubr.bf16.mxu1 %v4986_v12  ;;  %v4993_v53 = vrot.slane %v4965_v34, %v8783_v2  ;;  %v7827_v39 = vld [vmem:[%s9185_s3 + $0x120] sm:$0xff]   ;;  %v7829_v41 = vld [vmem:[%s9185_s3 + $0x158] sm:$0xff]   ;;  %v7830_v22 = vld [vmem:[%s9185_s3 + $0x1d0] sm:$0xff]  }
0x1097   : > { %7184 = vmatpush3.bf16.msra.mxu0 %v7795_v31  ;;  %v7831_v23 = vld [vmem:[%s9185_s3 + $0x118] sm:$0xff]   ;;  %v7832_v46 = vld [vmem:[%s9185_s3 + $0x190] sm:$0xff]   ;;  %v7834_v24 = vld [vmem:[%s9185_s3 + $0x1c8] sm:$0xff]  }
0x1098   : > { %7158 = vmatpush3.bf16.msra.mxu1 %v7790_v28  ;;  %7185 = vmatprep.subr.bf16.mxu0 %v7797_v33  ;;  %v4997_v17 = vcombine.high %v4993_v53, %v4993_v53  ;;  %v7833_v6 = vld [vmem:[%s9185_s3 + $0x150] sm:$0xff]   ;;  %v7836_v26 = vld [vmem:[%s9185_s3 + $0x188] sm:$0xff]   ;;  %v7838_v58 = vld [vmem:[%s9185_s3 + $0x1c0] sm:$0xff]  }
0x1099   : > { %7159 = vmatprep.subr.bf16.mxu1 %v7792_v30  ;;  %5903 = vmatprep.mubr.bf16.mxu0 %v4996_v13  ;;  %v7835_v25 = vld [vmem:[%s9185_s3 + $0x110] sm:$0xff]   ;;  %v7837_v27 = vld [vmem:[%s9185_s3 + $0x148] sm:$0xff]   ;;  %v7840_v29 = vld [vmem:[%s9185_s3 + $0x180] sm:$0xff]   ;;  %v4979_v30 = vrot.slane %v8806_v11, %v8783_v2 }
0x109a   : > { %v7839_v28 = vld [vmem:[%s9185_s3 + $0x108] sm:$0xff]   ;;  %v7841_v31 = vld [vmem:[%s9185_s3 + $0x140] sm:$0xff]   ;;  %v7844_v35 = vld [vmem:[%s9185_s3 + $0x2b8] sm:$0xff]  }
0x109b   : > { %7186 = vmatpush3.bf16.msra.mxu0 %v7799_v15  ;;  %v7843_v33 = vld [vmem:[%s9185_s3 + $0x100] sm:$0xff]   ;;  %v4995_v14 = vcombine.high %v4979_v30, %v4979_v30  ;;  %v7846_v15 = vld [vmem:[%s9185_s3 + $0x2f0] sm:$0xff]   ;;  %v7858_v42 = vld [vmem:[%s9185_s3 + $0x2d8] sm:$0xff]  }
0x109c   : > { %7160 = vmatpush3.bf16.msra.mxu1 %v7794_v32  ;;  %7187 = vmatprep.subr.bf16.mxu0 %v7801_v49  ;;  %v7842_v32 = vld [vmem:[%s9185_s3 + $0x2f8] sm:$0xff]   ;;  %v7848_v49 = vld [vmem:[%s9185_s3 + $0x2b0] sm:$0xff]   ;;  %v7856_v5 = vld [vmem:[%s9185_s3 + $0x2a0] sm:$0xff]  }
0x109d   : > { %7161 = vmatprep.subr.bf16.mxu1 %v7796_v36  ;;  %v7845_v36 = vld [vmem:[%s9185_s3 + $0x278] sm:$0xff]   ;;  %v7849_v51 = vld [vmem:[%s9185_s3 + $0x270] sm:$0xff]   ;;  %v7857_v0 = vld [vmem:[%s9185_s3 + $0x260] sm:$0xff]  }
0x109e   : > { %v7862_v9 = vld [vmem:[%s9185_s3 + $0x2d0] sm:$0xff]   ;;  %v7870_v13 = vld [vmem:[%s9185_s3 + $0x2c0] sm:$0xff]  }
0x109f   : > { %7188 = vmatpush3.bf16.msra.mxu0 %v7803_v56  ;;  %v7851_v56 = vld [vmem:[%s9185_s3 + $0x230] sm:$0xff]  }
0x10a0   : > { %7162 = vmatpush3.bf16.msra.mxu1 %v7798_v48  ;;  %7189 = vmatprep.subr.bf16.mxu0 %v7805_v1  ;;  %v7847_v48 = vld [vmem:[%s9185_s3 + $0x238] sm:$0xff]   ;;  %v7853_v1 = vld [vmem:[%s9185_s3 + $0x268] sm:$0xff]   ;;  %v7864_v11 = vld [vmem:[%s9185_s3 + $0x290] sm:$0xff]  }
0x10a1   : > { %7163 = vmatprep.subr.bf16.mxu1 %v7800_v54  ;;  %v7850_v54 = vld [vmem:[%s9185_s3 + $0x2e8] sm:$0xff]   ;;  %v7865_v12 = vld [vmem:[%s9185_s3 + $0x250] sm:$0xff]  }
0x10a2   : > { %v7867_v34 = vld [vmem:[%s9185_s3 + $0x210] sm:$0xff]  }
0x10a3   : > { %7190 = vmatpush3.bf16.msra.mxu0 %v7807_v4  ;;  %v7855_v4 = vld [vmem:[%s9185_s3 + $0x228] sm:$0xff]  }
0x10a4   : > { %7164 = vmatpush3.bf16.msra.mxu1 %v7802_v63  ;;  %7219 = vmatprep.subr.bf16.mxu0 %v7810_v7  ;;  %v7852_v63 = vld [vmem:[%s9185_s3 + $0x2a8] sm:$0xff]   ;;  %v7859_v7 = vld [vmem:[%s9185_s3 + $0x220] sm:$0xff]  }
0x10a5   : > { %7165 = vmatprep.subr.bf16.mxu1 %v7804_v21  ;;  %v7854_v21 = vld [vmem:[%s9185_s3 + $0x2e0] sm:$0xff]  }
0x10a6   : > { %5904 = vmatmul.mubr.bf16.vlgmr.msra.gmra.mxu0 %v4994_v45  ;;  %v7868_v45 = vld [vmem:[%s9185_s3 + $0x288] sm:$0xff]  }
0x10a7   : > { %7220 = vmatpush3.bf16.msra.mxu0 %v7812_v60  ;;  %5983 = vmatprep.mubr.bf16.mxu0 %v4997_v17  ;;  %v7869_v60 = vld [vmem:[%s9185_s3 + $0x248] sm:$0xff]   ;;  %v7872_v17 = vld [vmem:[%s9185_s3 + $0x280] sm:$0xff]  }
0x10a8   : > { %7166 = vmatpush3.bf16.msra.mxu1 %v7806_v50  ;;  %7221 = vmatprep.subr.bf16.mxu0 %v7814_v55  ;;  %v7860_v50 = vld [vmem:[%s9185_s3 + $0x298] sm:$0xff]  }
0x10a9   : > { %7167 = vmatprep.subr.bf16.mxu1 %v7808_v8  ;;  %v7861_v8 = vld [vmem:[%s9185_s3 + $0x258] sm:$0xff]  }
0x10ab   : > { %7222 = vmatpush3.bf16.msra.mxu0 %v7816_v43  ;;  %v7873_v43 = vld [vmem:[%s9185_s3 + $0x240] sm:$0xff]  }
0x10ac   : > { %7168 = vmatpush3.bf16.msra.mxu1 %v7811_v59  ;;  %7223 = vmatprep.subr.bf16.mxu0 %v7818_v52  ;;  %v7866_v59 = vld [vmem:[%s9185_s3 + $0x2c8] sm:$0xff]  }
0x10ad   : > { %7197 = vmatprep.subr.bf16.mxu1 %v7813_v44  ;;  %v4685_v44 = vld [vmem:[%s9184_s2 + $0x8] sm:$0xff] }
0x10ae   : > { %v5005_v55 = vrot.slane %v4685_v44, %v8783_v2 }
0x10af   : > { %5864 = vmatmul.mubr.bf16.vlgmr.msra.gmra.mxu1 %v4972_v10  ;;  %7224 = vmatpush3.bf16.msra.mxu0 %v7820_v47  ;;  %v7863_v10 = vld [vmem:[%s9185_s3 + $0x218] sm:$0xff]  }
0x10b0   : > { %7198 = vmatpush3.bf16.msra.mxu1 %v7815_v16  ;;  %5943 = vmatprep.mubr.bf16.mxu1 %v4993_v53  ;;  %v7871_v53 = vld [vmem:[%s9185_s3 + $0x208] sm:$0xff]   ;;  %v4998_v16 = vcombine.high %v4685_v44, %v4685_v44  ;;  %v5021_v52 = vrot.slane %v5005_v55, %v8783_v2  ;;  %v7874_v47 = vld [vmem:[%s9185_s3 + $0x3f8] sm:$0xff]  }
0x10b1   : > { %7199 = vmatprep.subr.bf16.mxu1 %v7817_v40  ;;  %7225 = vmatprep.subr.bf16.mxu0 %v7822_v3  ;;  %v5013_v40 = vcombine.high %v5005_v55, %v5005_v55  ;;  %v7875_v3 = vld [vmem:[%s9185_s3 + $0x200] sm:$0xff]  }
0x10b2   : > { %v7917_v55 = vld [vmem:[%s9209_s22] sm:$0xff]  }
0x10b3   : > { %7226 = vmatpush3.bf16.msra.mxu0 %v7824_v38  ;;  %v5043_v38 = vcombine.high %v5021_v52, %v5021_v52 }
0x10b4   : > { %7200 = vmatpush3.bf16.msra.mxu1 %v7819_v57  ;;  %7227 = vmatprep.subr.bf16.mxu0 %v7826_v19  ;;  %v9009_v57 = vrot.slane %v4998_v16, %v8783_v2 }
0x10b5   : > { %7201 = vmatprep.subr.bf16.mxu1 %v7821_v18  ;;  %v5035_v18 = vrot.slane %v5013_v40, %v8783_v2 }
0x10b7   : > { %7228 = vmatpush3.bf16.msra.mxu0 %v7828_v20  ;;  %v5045_v19 = vcombine.high %v5035_v18, %v5035_v18 }
0x10b8   : > { %7202 = vmatpush3.bf16.msra.mxu1 %v7823_v37  ;;  %7229 = vmatprep.subr.bf16.mxu0 %v7830_v22  ;;  %v5014_v37 = vcombine.high %v9009_v57, %v9009_v57  ;;  %v7879_v22 = vld [vmem:[%s9185_s3 + $0x338] sm:$0xff]  }
0x10b9   : > { %7203 = vmatprep.subr.bf16.mxu1 %v7825_v61  ;;  %v7876_v61 = vld [vmem:[%s9185_s3 + $0x3b8] sm:$0xff]  }
0x10ba   : > { %v5042_v20 = vrot.slane %v5014_v37, %v8783_v2 }
0x10bb   : > { %7230 = vmatpush3.bf16.msra.mxu0 %v7832_v46  ;;  %v7880_v46 = vld [vmem:[%s9185_s3 + $0x3b0] sm:$0xff]  }
0x10bc   : > { %7204 = vmatpush3.bf16.msra.mxu1 %v7827_v39  ;;  %7231 = vmatprep.subr.bf16.mxu0 %v7834_v24  ;;  %v7877_v39 = vld [vmem:[%s9185_s3 + $0x378] sm:$0xff]   ;;  %v7882_v24 = vld [vmem:[%s9185_s3 + $0x3e8] sm:$0xff]  }
0x10bd   : > { %7205 = vmatprep.subr.bf16.mxu1 %v7829_v41  ;;  %v7878_v41 = vld [vmem:[%s9185_s3 + $0x3f0] sm:$0xff]  }
0x10bf   : > { %7232 = vmatpush3.bf16.msra.mxu0 %v7836_v26  ;;  %v7884_v26 = vld [vmem:[%s9185_s3 + $0x3a8] sm:$0xff]  }
0x10c0   : > { %7206 = vmatpush3.bf16.msra.mxu1 %v7831_v23  ;;  %7233 = vmatprep.subr.bf16.mxu0 %v7838_v58  ;;  %v5046_v23 = vcombine.high %v5042_v20, %v5042_v20  ;;  %v7886_v58 = vld [vmem:[%s9185_s3 + $0x3e0] sm:$0xff]  }
0x10c1   : > { %7207 = vmatprep.subr.bf16.mxu1 %v7833_v6  ;;  %v7881_v6 = vld [vmem:[%s9185_s3 + $0x370] sm:$0xff]  }
0x10c3   : > { %7234 = vmatpush3.bf16.msra.mxu0 %v7840_v29  ;;  %v7888_v29 = vld [vmem:[%s9185_s3 + $0x3a0] sm:$0xff]  }
0x10c4   : > { %7208 = vmatpush3.bf16.msra.mxu1 %v7835_v25  ;;  %7263 = vmatprep.subr.bf16.mxu0 %v7842_v32  ;;  %v7883_v25 = vld [vmem:[%s9185_s3 + $0x330] sm:$0xff]   ;;  %v7891_v32 = vld [vmem:[%s9185_s3 + $0x320] sm:$0xff]  }
0x10c5   : > { %7209 = vmatprep.subr.bf16.mxu1 %v7837_v27  ;;  %v7885_v27 = vld [vmem:[%s9185_s3 + $0x368] sm:$0xff]  }
0x10c6   : > { %5984 = vmatmul.mubr.bf16.vlgmr.msra.gmra.mxu0 %v4995_v14  ;;  %v7893_v14 = vld [vmem:[%s9185_s3 + $0x358] sm:$0xff]  }
0x10c7   : > { %7264 = vmatpush3.bf16.msra.mxu0 %v7844_v35  ;;  %6063 = vmatprep.mubr.bf16.mxu0 %v5045_v19  ;;  %v7894_v35 = vld [vmem:[%s9185_s3 + $0x3d0] sm:$0xff]  }
0x10c8   : > { %7210 = vmatpush3.bf16.msra.mxu1 %v7839_v28  ;;  %7265 = vmatprep.subr.bf16.mxu0 %v7846_v15  ;;  %v7887_v28 = vld [vmem:[%s9185_s3 + $0x328] sm:$0xff]   ;;  %v7896_v15 = vld [vmem:[%s9185_s3 + $0x390] sm:$0xff]  }
0x10c9   : > { %7211 = vmatprep.subr.bf16.mxu1 %v7841_v31  ;;  %v7890_v31 = vld [vmem:[%s9185_s3 + $0x3d8] sm:$0xff]  }
0x10cb   : > { %7266 = vmatpush3.bf16.msra.mxu0 %v7848_v49  ;;  %v7898_v49 = vld [vmem:[%s9185_s3 + $0x3c8] sm:$0xff]  }
0x10cc   : > { %7212 = vmatpush3.bf16.msra.mxu1 %v7843_v33  ;;  %7267 = vmatprep.subr.bf16.mxu0 %v7850_v54  ;;  %v7892_v33 = vld [vmem:[%s9185_s3 + $0x398] sm:$0xff]   ;;  %v7900_v54 = vld [vmem:[%s9185_s3 + $0x388] sm:$0xff]  }
0x10cd   : > { %7241 = vmatprep.subr.bf16.mxu1 %v7845_v36  ;;  %v7895_v36 = vld [vmem:[%s9185_s3 + $0x318] sm:$0xff]  }
0x10cf   : > { %5944 = vmatmul.mubr.bf16.vlgmr.msra.gmra.mxu1 %v4979_v30  ;;  %7268 = vmatpush3.bf16.msra.mxu0 %v7852_v63  ;;  %v7889_v30 = vld [vmem:[%s9185_s3 + $0x360] sm:$0xff]  }
0x10d0   : > { %7242 = vmatpush3.bf16.msra.mxu1 %v7847_v48  ;;  %7269 = vmatprep.subr.bf16.mxu0 %v7854_v21  ;;  %v7897_v48 = vld [vmem:[%s9185_s3 + $0x350] sm:$0xff]   ;;  %v7902_v63 = vld [vmem:[%s9185_s3 + $0x3c0] sm:$0xff]  }
0x10d1   : > { %7243 = vmatprep.subr.bf16.mxu1 %v7849_v51  ;;  %6023 = vmatprep.mubr.bf16.mxu1 %v5035_v18  ;;  %v7899_v51 = vld [vmem:[%s9185_s3 + $0x310] sm:$0xff]   ;;  %v7904_v21 = vld [vmem:[%s9185_s3 + $0x380] sm:$0xff]  }
0x10d3   : > { %7270 = vmatpush3.bf16.msra.mxu0 %v7856_v5  ;;  %v7906_v5 = vld [vmem:[%s9185_s3 + $0x340] sm:$0xff]  }
0x10d4   : > { %7244 = vmatpush3.bf16.msra.mxu1 %v7851_v56  ;;  %7271 = vmatprep.subr.bf16.mxu0 %v7858_v42  ;;  %v7901_v56 = vld [vmem:[%s9185_s3 + $0x348] sm:$0xff]   ;;  %v7907_v42 = vld [vmem:[%s9185_s3 + $0x300] sm:$0xff]  }
0x10d5   : > { %7245 = vmatprep.subr.bf16.mxu1 %v7853_v1  ;;  %v7903_v1 = vld [vmem:[%s9185_s3 + $0x308] sm:$0xff]  }
0x10d7   : > { %7272 = vmatpush3.bf16.msra.mxu0 %v7860_v50  ;;  %v7910_v50 = vld [vmem:[%s9208_s20 + $0x28] sm:$0xff]  }
0x10d8   : > { %7246 = vmatpush3.bf16.msra.mxu1 %v7855_v4  ;;  %7273 = vmatprep.subr.bf16.mxu0 %v7862_v9  ;;  %v5028_v4 = vrot.slane %v9009_v57, %v8783_v2  ;;  %v7909_v2 = vld [vmem:[%s9208_s20 + $0x30] sm:$0xff]   ;;  %v7912_v9 = vld [vmem:[%s9208_s20 + $0x18] sm:$0xff]   ;;  %v6773_v57 = vld [vmem:[%s9188_s6 + $0x1] ss:$0 sm:$0xff] }
0x10d9   : > { %7247 = vmatprep.subr.bf16.mxu1 %v7857_v0 }
0x10da   : > { %v5044_v0 = vcombine.high %v5028_v4, %v5028_v4 }
0x10db   : > { %7274 = vmatpush3.bf16.msra.mxu0 %v7864_v11  ;;  %v7914_v11 = vld [vmem:[%s9208_s20 + $0x8] sm:$0xff]  }
0x10dc   : > { %7248 = vmatpush3.bf16.msra.mxu1 %v7859_v7  ;;  %7275 = vmatprep.subr.bf16.mxu0 %v7866_v59  ;;  %v7908_v7 = vld [vmem:[%s9208_s20 + $0x38] sm:$0xff]  }
0x10dd   : > { %7249 = vmatprep.subr.bf16.mxu1 %v7861_v8  ;;  %v7911_v8 = vld [vmem:[%s9208_s20 + $0x20] sm:$0xff]  }
0x10df   : > { %7276 = vmatpush3.bf16.msra.mxu0 %v7868_v45 }
0x10e0   : > { %7250 = vmatpush3.bf16.msra.mxu1 %v7863_v10  ;;  %7277 = vmatprep.subr.bf16.mxu0 %v7870_v13  ;;  %v7913_v10 = vld [vmem:[%s9208_s20 + $0x10] sm:$0xff]   ;;  %v7916_v13 = vld [vmem:[%s9209_s22 + $0x8] sm:$0xff]  }
0x10e1   : > { %7251 = vmatprep.subr.bf16.mxu1 %v7865_v12  ;;  %v7915_v12 = vld [vmem:[%s9208_s20] sm:$0xff]  }
0x10e3   : > { %7278 = vmatpush3.bf16.msra.mxu0 %v7872_v17 }
0x10e4   : > { %7252 = vmatpush3.bf16.msra.mxu1 %v7867_v34  ;;  %7307 = vmatprep.subr.bf16.mxu0 %v7874_v47 }
0x10e5   : > { %7253 = vmatprep.subr.bf16.mxu1 %v7869_v60 }
0x10e6   : > { %6064 = vmatmul.mubr.bf16.vlgmr.msra.gmra.mxu0 %v5043_v38 }
0x10e7   : > { %7308 = vmatpush3.bf16.msra.mxu0 %v7876_v61  ;;  %6143 = vmatprep.mubr.bf16.mxu0 %v5046_v23 }
0x10e8   : > { %7254 = vmatpush3.bf16.msra.mxu1 %v7871_v53  ;;  %7309 = vmatprep.subr.bf16.mxu0 %v7878_v41 }
0x10e9   : > { %7255 = vmatprep.subr.bf16.mxu1 %v7873_v43 }
0x10eb   : > { %7310 = vmatpush3.bf16.msra.mxu0 %v7880_v46 }
0x10ec   : > { %7256 = vmatpush3.bf16.msra.mxu1 %v7875_v3  ;;  %7311 = vmatprep.subr.bf16.mxu0 %v7882_v24 }
0x10ed   : > { %7285 = vmatprep.subr.bf16.mxu1 %v7877_v39 }
0x10ef   : > { %6024 = vmatmul.mubr.bf16.vlgmr.msra.gmra.mxu1 %v5021_v52  ;;  %7312 = vmatpush3.bf16.msra.mxu0 %v7884_v26 }
0x10f0   : > { %7286 = vmatpush3.bf16.msra.mxu1 %v7879_v22  ;;  %6103 = vmatprep.mubr.bf16.mxu1 %v5042_v20 }
0x10f1   : > { %7287 = vmatprep.subr.bf16.mxu1 %v7881_v6  ;;  %7313 = vmatprep.subr.bf16.mxu0 %v7886_v58 }
0x10f3   : > { %7314 = vmatpush3.bf16.msra.mxu0 %v7888_v29 }
0x10f4   : > { %7288 = vmatpush3.bf16.msra.mxu1 %v7883_v25  ;;  %7315 = vmatprep.subr.bf16.mxu0 %v7890_v31 }
0x10f5   : > { %7289 = vmatprep.subr.bf16.mxu1 %v7885_v27 }
0x10f7   : > { %7316 = vmatpush3.bf16.msra.mxu0 %v7892_v33 }
0x10f8   : > { %7290 = vmatpush3.bf16.msra.mxu1 %v7887_v28  ;;  %7317 = vmatprep.subr.bf16.mxu0 %v7894_v35 }
0x10f9   : > { %7291 = vmatprep.subr.bf16.mxu1 %v7889_v30 }
0x10fb   : > { %7318 = vmatpush3.bf16.msra.mxu0 %v7896_v15 }
0x10fc   : > { %7292 = vmatpush3.bf16.msra.mxu1 %v7891_v32  ;;  %7319 = vmatprep.subr.bf16.mxu0 %v7898_v49 }
0x10fd   : > { %7293 = vmatprep.subr.bf16.mxu1 %v7893_v14 }
0x10ff   : > { %7320 = vmatpush3.bf16.msra.mxu0 %v7900_v54 }
0x1100   : > { %7294 = vmatpush3.bf16.msra.mxu1 %v7895_v36  ;;  %7321 = vmatprep.subr.bf16.mxu0 %v7902_v63 }
0x1101   : > { %7295 = vmatprep.subr.bf16.mxu1 %v7897_v48 }
0x1103   : > { %7322 = vmatpush3.bf16.msra.mxu0 %v7904_v21 }
0x1104   : > { %7296 = vmatpush3.bf16.msra.mxu1 %v7899_v51  ;;  %7501 = vmatprep.subr.bf16.mxu0 %v7962_v62 }
0x1105   : > { %7297 = vmatprep.subr.bf16.mxu1 %v7901_v56 }
0x1106   : > { %6144 = vmatmul.mubr.bf16.vlgmr.msra.gmra.mxu0 %v5044_v0 }
0x1107   : > { %7502 = vmatpush3.bf16.msra.mxu0 %v7908_v7  ;;  %7517 = vmatprep.mubr.msk.bf16.mxu0 %vm7963_vm8, %v7962_v62 }
0x1108   : > { %7298 = vmatpush3.bf16.msra.mxu1 %v7903_v1  ;;  %7503 = vmatprep.subr.bf16.mxu0 %v7962_v62 }
0x1109   : > { %7299 = vmatprep.subr.bf16.mxu1 %v7906_v5 }
0x110b   : > { %7504 = vmatpush3.bf16.msra.mxu0 %v7909_v2 }
0x110c   : > { %7300 = vmatpush3.bf16.msra.mxu1 %v7907_v42  ;;  %7505 = vmatprep.subr.bf16.mxu0 %v7962_v62 }
0x110d   : > { %7493 = vmatprep.subr.bf16.mxu1 %v7962_v62 }
0x110f   : > { %6104 = vmatmul.mubr.bf16.vlgmr.msra.gmra.mxu1 %v5028_v4  ;;  %7506 = vmatpush3.bf16.msra.mxu0 %v7910_v50 }
0x1110   : > { %7497 = vmatprep.mubr.msk.bf16.mxu1 %vm7963_vm8, %v7962_v62  ;;  %7507 = vmatprep.subr.bf16.mxu0 %v7962_v62 }
0x1111   : > { %7494 = vmatpush3.bf16.msra.mxu1 %v7916_v13 }
0x1112   : > { %7495 = vmatprep.subr.bf16.mxu1 %v7962_v62 }
0x1113   : > { %7508 = vmatpush3.bf16.msra.mxu0 %v7911_v8 }
0x1114   : > { %7509 = vmatprep.subr.bf16.mxu0 %v7962_v62 }
0x1115   : > { %7496 = vmatpush3.bf16.msra.mxu1 %v7917_v55 }
0x1117   : > { %7510 = vmatpush3.bf16.msra.mxu0 %v7912_v9 }
0x1118   : > { %7511 = vmatprep.subr.bf16.mxu0 %v7962_v62 }
0x111b   : > { %7512 = vmatpush3.bf16.msra.mxu0 %v7913_v10 }
0x111c   : > { %7513 = vmatprep.subr.bf16.mxu0 %v7962_v62 }
0x111f   : > { %7514 = vmatpush3.bf16.msra.mxu0 %v7914_v11 }
0x1120   : > { %7515 = vmatprep.subr.bf16.mxu0 %v7962_v62 }
0x1123   : > { %7516 = vmatpush3.bf16.msra.mxu0 %v7915_v12  ;;  %v6913_v12 = vld [vmem:[%s9188_s6 + $0x2] ss:$0 sm:$0xff] }
0x114f   : > { %v4677_v59 = vpop.f32.mrf.mxu1 }
0x1150   : > { %v4683_v34 = vmul.f32 0.125, %v4677_v59 }
0x1151   : > { %v7491_v45 = vpop.f32.mrf.mxu1 }
0x1152   : > { %v6151_v60 = vpack.c.bf16 %v4683_v34, %v4683_v34 }
0x1153   : > { %v4680_v44 = vpop.f32.mrf.mxu1 }
0x1154   : > { %7518 = vmatmul.mubr.bf16.vlgmr.msra.gmra.mxu0 %v6151_v60 }
0x1155   : > { %v7492_v53 = vpop.f32.mrf.mxu1 }
0x1166   : > { %v7191_v16 = vpop.f32.mrf.mxu0 }
0x1168   : > { %v7192_v17 = vpop.f32.mrf.mxu0 }
0x1169   : > { %v7193_v43 = vadd.f32 %v7192_v17, %v7191_v16 }
0x116a   : > { %v7194_v52 = vpop.f32.mrf.mxu0 }
0x116c   : > { %v7195_v3 = vpop.f32.mrf.mxu0 }
0x116f   : > { %v7169_v40 = vpop.f32.mrf.mxu1 }
0x1171   : > { %v7170_v47 = vpop.f32.mrf.mxu1 }
0x1172   : > { %v7171_v18 = vadd.f32 %v7170_v47, %v7169_v40 }
0x1173   : > { %v7172_v37 = vpop.f32.mrf.mxu1 }
0x1174   : > { %v5866_v38 = vadd.f32 %v7171_v18, %v6773_v57 }
0x1175   : > { %v7173_v62 = vpop.f32.mrf.mxu1 }
0x1176   : > { %v5906_v61 = vadd.f32 %v7193_v43, %v5866_v38 }
0x1186   : > { %v7235_v19 = vpop.f32.mrf.mxu0 }
0x1188   : > { %v7236_v39 = vpop.f32.mrf.mxu0 }
0x1189   : > { %v7237_v32 = vadd.f32 %v7236_v39, %v7235_v19 }
0x118a   : > { %v7238_v41 = vpop.f32.mrf.mxu0 }
0x118c   : > { %v7239_v23 = vpop.f32.mrf.mxu0 }
0x118f   : > { %v7213_v20 = vpop.f32.mrf.mxu1 }
0x1191   : > { %v7214_v22 = vpop.f32.mrf.mxu1 }
0x1192   : > { %v7215_v31 = vadd.f32 %v7214_v22, %v7213_v20 }
0x1193   : > { %v7216_v46 = vpop.f32.mrf.mxu1 }
0x1194   : > { %v5946_v33 = vadd.f32 %v7215_v31, %v5906_v61 }
0x1195   : > { %v7217_v6 = vpop.f32.mrf.mxu1 }
0x1196   : > { %v5986_v35 = vadd.f32 %v7237_v32, %v5946_v33 }
0x11a6   : > { %v7279_v24 = vpop.f32.mrf.mxu0 }
0x11a8   : > { %v7280_v25 = vpop.f32.mrf.mxu0 }
0x11a9   : > { %v7281_v15 = vadd.f32 %v7280_v25, %v7279_v24 }
0x11aa   : > { %v7282_v27 = vpop.f32.mrf.mxu0 }
0x11ac   : > { %v7283_v28 = vpop.f32.mrf.mxu0 }
0x11af   : > { %v7257_v26 = vpop.f32.mrf.mxu1 }
0x11b1   : > { %v7258_v58 = vpop.f32.mrf.mxu1 }
0x11b2   : > { %v7259_v14 = vadd.f32 %v7258_v58, %v7257_v26 }
0x11b3   : > { %v7260_v29 = vpop.f32.mrf.mxu1 }
0x11b4   : > { %v6026_v48 = vadd.f32 %v7259_v14, %v5986_v35 }
0x11b5   : > { %v7261_v30 = vpop.f32.mrf.mxu1 }
0x11b6   : > { %v6066_v63 = vadd.f32 %v7281_v15, %v6026_v48 }
0x11c6   : > { %v7323_v36 = vpop.f32.mrf.mxu0 }
0x11c8   : > { %v7324_v49 = vpop.f32.mrf.mxu0 }
0x11c9   : > { %v7325_v5 = vadd.f32 %v7324_v49, %v7323_v36 }
0x11ca   : > { %v7326_v54 = vpop.f32.mrf.mxu0 }
0x11cc   : > { %v7327_v21 = vpop.f32.mrf.mxu0 }
0x11cf   : > { %v7301_v51 = vpop.f32.mrf.mxu1 }
0x11d1   : > { %v7302_v56 = vpop.f32.mrf.mxu1 }
0x11d2   : > { %v7303_v1 = vadd.f32 %v7302_v56, %v7301_v51 }
0x11d3   : > { %v7304_v4 = vpop.f32.mrf.mxu1 }
0x11d4   : > { %v6106_v0 = vadd.f32 %v7303_v1, %v6066_v63 }
0x11d5   : > { %v7305_v42 = vpop.f32.mrf.mxu1 }
0x11d6   : > { %v6146_v7 = vadd.f32 %v7325_v5, %v6106_v0 }
0x11d8   : > { %v6168_v2 = vpack.c.bf16 %v6146_v7, %v6146_v7 }
0x11da   : > { %7498 = vmatmul.mubr.msk.bf16.vlgmr.msra.gmra.mxu1 %vm921_vm3, %v6168_v2 }
0x1214   : > { %v6310_v50 = vpop.f32.mrf.mxu0 }
0x1216   : > { %v7519_v8 = vpop.f32.mrf.mxu0 }
0x1218   : > { %v6313_v9 = vpop.f32.mrf.mxu0 }
0x121a   : > { %v7520_v10 = vpop.f32.mrf.mxu0 }
0x129a   : > { %v6222_v11 = vpop.f32.mrf.mxu1 }
0x129b   : > { %v6311_v59 = vadd.f32 %v6310_v50, %v6222_v11 }
0x129c   : > { %v7499_v34 = vpop.f32.mrf.mxu1 }
0x129d   : > { %v6321_v45 = vadd.f32 %v6913_v12, %v6311_v59 }
0x129e   : > { %v6225_v60 = vpop.f32.mrf.mxu1 }
0x129f   : > { %6322 = vst [vmem:[#allocation3] sm:$0x3] %v6321_v45 }
0x12a0   : > { %v7500_v13 = vpop.f32.mrf.mxu1 }
0x12a1 PF: > { %p7527_p6 = scmp.eq.s32.totalorder %s8047_s30, 1  ;;  %s7965_s29 = smov [#allocation3]  }
0x12a2   : > { %s6330_s15 = sshll.u32 %s7965_s29, 4  ;;  %s6331_s15 = int_to_ptr.vmem [resolvable:$true] %s6330_s15 }
0x12a3   : > { %s7918_s5 = scalar_lea.vmem %s6331_s15, 32  ;;  %p7925_p10 = scmp.lt.s32.totalorder %s6331_s15, %s6331_s15 }
0x12a4   : > { %p7919_p7 = scmp.ne.s32.totalorder %s6331_s15, %s7918_s5  ;;  %p7926_p11 = scmp.lt.s32.totalorder %s7918_s5, %s7918_s5 }
0x12a6   : > { %p7920_p8 = pnand %p7919_p7, %p7527_p6  ;;  %p7927_p12 = por %p7926_p11, %p7925_p10 }
0x12a8   : > { %p7921_p9 = pneg %p7920_p8 }
0x12aa   : > { %p7928_p13 = pnand %p7927_p12, %p7921_p9 }
0x12ac   : > { %7931 = shalt.err (!%p7928_p13)
}
0x12ad   : > { %s9210_s28 = sld [smem:[#allocation11_spill]] }
0x12b3   : > { %7524 = dma.vmem_to_hbm [thread:$0]  (%p7527_p6), %s6331_s15, 32, %s9210_s28, [#allocation4]  }
0x12b4   : > { %7947 = dma.done.wait (%p7527_p6), [#allocation4], 32  }
0x12b5   : > { %7949 = vsyncadd (%p7527_p6), [#allocation4], 4294967264 }
0x12b6 PF: > { %s9211_s18 = sld [smem:[#allocation6_spill]] }
0x12bc   : > { %s25_s29 = sadd.s32 1, %s9211_s18  }
0x12bd   : > { %p22_p0 = scmp.ge.s32.totalorder %s25_s29, 4  }
0x12bf   :  { %24 = sbr.rel (!%p22_p0) target bundleno = 7 (0x7), region = 129 }
0x12c4   :  { %6343 = vsyncpa [#allocation4], 1 }
0x12c5   :  { %6345 = vsyncpa [#allocation4 + $0x1], 1 }

</bundles_post_ra>
